<compile_context>
chip_gen: v5e
topology: v5e:2x2
jax: 0.10.0
libtpu: 0.0.40
codegen_flags: <defaults>
</compile_context>

<pallas_src>
import numpy as np

import jax
import jax.numpy as jnp
from jax import lax
from jax.experimental import pallas as pl
from jax.experimental.pallas import tpu as pltpu


# ----------------------------------------------------------------------------
# Fused kernel: one batch element per grid step.
# ----------------------------------------------------------------------------
def _fused_attention_kernel(
    x_ref, taps_ref,
    qdw_ref, qdb_ref, qpw_ref, qpb_ref,
    kdw_ref, kdb_ref, kpw_ref, kpb_ref,
    vdw_ref, vdb_ref, vpw_ref, vpb_ref,
    rep_ref, bdm_ref, g0_ref, b0_ref, ones_ref, g1_ref, rdn_ref, rup_ref,
    out_ref):
  f32 = jnp.float32
  x_cn = x_ref[0]                                       # (C, N)

  # 9 shifted + SAME-padded copies of x shared by the q/k/v depthwise convs.
  # Taps are precomputed constant 0/1 matrices -> one tiny MXU matmul each.
  xs = []
  ti = 0
  for t in range(9):
    if t == 4:                                          # (dy, dx) == (0, 0)
      xs.append(x_cn)
    else:
      xs.append(jnp.dot(x_cn, taps_ref[ti], preferred_element_type=f32))
      ti += 1

  # Depthwise 3x3 (+bias) for q / k / v, all in (C, N) layout.
  qdw = qdw_ref[...]
  kdw = kdw_ref[...]
  vdw = vdw_ref[...]
  dep_q = qdb_ref[...]
  dep_k = kdb_ref[...]
  dep_v = vdb_ref[...]
  for t in range(9):
    dep_q = dep_q + qdw[:, t:t + 1] * xs[t]
    dep_k = dep_k + kdw[:, t:t + 1] * xs[t]
    dep_v = dep_v + vdw[:, t:t + 1] * xs[t]

  # Pointwise 1x1 (+bias).  The attention scale is folded into qpw / qpb.
  q_fn = jnp.dot(qpw_ref[...], dep_q, preferred_element_type=f32) + qpb_ref[...]  # (EC, N)
  k_fn = jnp.dot(kpw_ref[...], dep_k, preferred_element_type=f32) + kpb_ref[...]  # (EC, N)
  v_cn = jnp.dot(vpw_ref[...], dep_v, preferred_element_type=f32) + vpb_ref[...]  # (C, N)

  # Lane-packed attention: attn[:, e*N:(e+1)*N] = q_e^T @ k_e.  k is replicated
  # E times along lanes (MXU) and masked block-diagonally so one dot_general
  # contracting the channel axis emits all E maps at once.
  k_bd = jnp.dot(k_fn, rep_ref[...], preferred_element_type=f32) * bdm_ref[...]   # (EC, EN)
  attn = lax.dot_general(q_fn, k_bd, (((0,), (0,)), ((), ())),
                         preferred_element_type=f32)                               # (N, EN)

  # conv0 (3x3, E->E, BatchNorm folded): column shifts + channel mixing live in
  # the constant g0 matrices; row shifts are two banded matmuls.
  a0 = jnp.dot(attn, g0_ref[1], preferred_element_type=f32)
  a0 = a0 + jnp.dot(rdn_ref[...],
                    jnp.dot(attn, g0_ref[0], preferred_element_type=f32),
                    preferred_element_type=f32)
  a0 = a0 + jnp.dot(rup_ref[...],
                    jnp.dot(attn, g0_ref[2], preferred_element_type=f32),
                    preferred_element_type=f32)
  a0 = a0 + b0_ref[...]

  # Per-block softmax along the key axis, kept lane-packed.  The row-wide max
  # is a valid per-block stabiliser (it cancels in the ratio); the per-block
  # sums come from one matmul against a block-diagonal all-ones matrix.
  m = jnp.max(a0, axis=-1, keepdims=True)
  ex = jnp.exp(a0 - m)
  s = jnp.dot(ex, ones_ref[...], preferred_element_type=f32)       # block sums
  inv = pl.reciprocal(s, approx=True)
  inv = inv * (2.0 - s * inv)                 # one Newton step -> ~f32 accurate
  a1 = a0 * (ex * inv)                        # attn * softmax(attn); attn_drop p=0

  # conv1 (3x3, E->1) -> final (N, N) attention map.
  u0 = jnp.dot(a1, g1_ref[0], preferred_element_type=f32)
  u1 = jnp.dot(a1, g1_ref[1], preferred_element_type=f32)
  u2 = jnp.dot(a1, g1_ref[2], preferred_element_type=f32)
  fa = (u1
        + jnp.dot(rdn_ref[...], u0, preferred_element_type=f32)
        + jnp.dot(rup_ref[...], u2, preferred_element_type=f32))

  # out[c, n] = sum_m v[c, m] * fa[n, m].
  out = lax.dot_general(v_cn, fa, (((1,), (1,)), ((), ())),
                        preferred_element_type=f32)
  out_ref[0] = out.astype(out_ref.dtype)


# ----------------------------------------------------------------------------
# Wrapper: trace-time constant construction + weight folding + pallas_call.
# ----------------------------------------------------------------------------
def attention_module_forward(x, p):
  B, C, H, W = x.shape
  E = 4                                  # channel_expand
  N = H * W
  EC = E * C
  EN = E * N
  scale = float(C) ** -0.5               # num_heads = 1 -> head_dim = C

  x_cn = x.reshape(B, C, N)

  # ---- structural constants (numpy -> compile-time constants) --------------
  hh, ww = np.arange(N) // W, np.arange(N) % W
  taps = []
  for dy in (-1, 0, 1):
    for dx in (-1, 0, 1):
      if dy == 0 and dx == 0:
        continue
      ok = (hh + dy >= 0) & (hh + dy < H) & (ww + dx >= 0) & (ww + dx < W)
      t = np.zeros((N, N), np.float32)
      t[((hh + dy) * W + (ww + dx))[ok], np.arange(N)[ok]] = 1.0
      taps.append(t)
  taps = jnp.asarray(np.stack(taps))                                   # (8,N,N)

  s_col_np = np.stack([np.eye(N, k=1), np.eye(N), np.eye(N, k=-1)]
                      ).astype(np.float32)           # column shifts dx=-1,0,+1
  s_col = jnp.asarray(s_col_np)
  rdn = jnp.asarray(np.eye(N, k=-1, dtype=np.float32))     # row shift dy = -1
  rup = jnp.asarray(np.eye(N, k=+1, dtype=np.float32))     # row shift dy = +1
  rep = jnp.asarray(np.tile(np.eye(N, dtype=np.float32), (1, E)))      # (N,EN)
  bdm = jnp.asarray(np.kron(np.eye(E, dtype=np.float32),
                            np.ones((C, N), np.float32)))              # (EC,EN)
  ones_bd = jnp.asarray(np.kron(np.eye(E, dtype=np.float32),
                                np.ones((N, N), np.float32)))          # (EN,EN)

  # ---- weight folding -------------------------------------------------------
  qdw = p['q_dw_w'].reshape(C, 9)
  qdb = p['q_dw_b'].reshape(C, 1)
  qpw = p['q_pw_w'] * scale                                            # (EC,C)
  qpb = (p['q_pw_b'] * scale).reshape(EC, 1)
  kdw = p['k_dw_w'].reshape(C, 9)
  kdb = p['k_dw_b'].reshape(C, 1)
  kpw = p['k_pw_w']
  kpb = p['k_pw_b'].reshape(EC, 1)
  vdw = p['v_dw_w'].reshape(C, 9)
  vdb = p['v_dw_b'].reshape(C, 1)
  vpw = p['v_pw_w']
  vpb = p['v_pw_b'].reshape(C, 1)

  eps = 1e-5
  s_bn = p['bn_gamma'] / jnp.sqrt(p['bn_var'] + eps)
  w0f = p['conv0_w'] * s_bn[:, None, None, None]          # BN scale folded
  b0 = p['bn_beta'] - p['bn_mean'] * s_bn                 # BN shift
  g0 = jnp.einsum('oiyx,xmn->yimon', w0f, s_col).reshape(3, EN, EN)
  b0row = jnp.repeat(b0, N).reshape(1, EN)
  g1 = jnp.einsum('iyx,xmn->yimn', p['conv1_w'][0], s_col).reshape(3, EN, N)

  def cspec(shape):
    zeros = (0,) * len(shape)
    return pl.BlockSpec(shape, lambda b, z=zeros: z)

  out = pl.pallas_call(
      _fused_attention_kernel,
      out_shape=jax.ShapeDtypeStruct((B, C, N), jnp.float32),
      grid=(B,),
      in_specs=[
          pl.BlockSpec((1, C, N), lambda b: (b, 0, 0)),
          cspec((8, N, N)),
          cspec((C, 9)), cspec((C, 1)), cspec((EC, C)), cspec((EC, 1)),
          cspec((C, 9)), cspec((C, 1)), cspec((EC, C)), cspec((EC, 1)),
          cspec((C, 9)), cspec((C, 1)), cspec((C, C)), cspec((C, 1)),
          cspec((N, EN)), cspec((EC, EN)),
          cspec((3, EN, EN)), cspec((1, EN)), cspec((EN, EN)),
          cspec((3, EN, N)),
          cspec((N, N)), cspec((N, N)),
      ],
      out_specs=pl.BlockSpec((1, C, N), lambda b: (b, 0, 0)),
      compiler_params=pltpu.CompilerParams(
          dimension_semantics=("parallel",)),
  )(x_cn, taps, qdw, qdb, qpw, qpb, kdw, kdb, kpw, kpb,
    vdw, vdb, vpw, vpb, rep, bdm, g0, b0row, ones_bd, g1, rdn, rup)

  return out.reshape(B, C, H, W)


# ----------------------------------------------------------------------------
# Pure-JAX reference (lax.conv) for validating the Pallas pipeline.
# ----------------------------------------------------------------------------
def ref_forward(x, p):
  B, C, H, W = x.shape
  E = 4
  scale = float(C) ** -0.5
  dn = ('NCHW', 'OIHW', 'NCHW')

  def dwconv_ref(x, dww, dwb, pww, pwb):
    Cin = x.shape[1]
    dep = lax.conv_general_dilated(x, dww.reshape(Cin, 1, 3, 3), (1, 1), 'SAME',
                                   feature_group_count=Cin,
                                   dimension_numbers=dn)
    dep = dep + dwb[None, :, None, None]
    out = lax.conv_general_dilated(dep, pww[:, :, None, None], (1, 1), 'VALID',
                                   dimension_numbers=dn)
    return out + pwb[None, :, None, None]

  q = dwconv_ref(x, p['q_dw_w'], p['q_dw_b'], p['q_pw_w'], p['q_pw_b'])
  k = dwconv_ref(x, p['k_dw_w'], p['k_dw_b'], p['k_pw_w'], p['k_pw_b'])
  v = dwconv_ref(x, p['v_dw_w'], p['v_dw_b'], p['v_pw_w'], p['v_pw_b'])
  N = H * W
  q = q.reshape(B, E, C, N).transpose(0, 1, 3, 2)
  k = k.reshape(B, E, C, N)
  v = v.reshape(B, 1, C, N).transpose(0, 1, 3, 2)

  attn = jnp.einsum('benc,becm->benm', q, k) * scale
  attn = lax.conv_general_dilated(attn, p['conv0_w'], (1, 1), 'SAME',
                                  dimension_numbers=dn)
  eps = 1e-5
  s = p['bn_gamma'] / jnp.sqrt(p['bn_var'] + eps)
  attn = attn * s[None, :, None, None] + \
      (p['bn_beta'] - p['bn_mean'] * s)[None, :, None, None]
  scores = jax.nn.softmax(attn, axis=-1)
  attn = attn * scores
  attn = lax.conv_general_dilated(attn, p['conv1_w'], (1, 1), 'SAME',
                                  dimension_numbers=dn)
  out = jnp.einsum('bonm,bomc->bonc', attn, v)
  return out.transpose(0, 1, 3, 2).reshape(B, C, H, W)


def init_params(key, C):
  E = 4
  ks = jax.random.split(key, 16)

  def nrm(k, shape, s=0.1):
    return s * jax.random.normal(k, shape, dtype=jnp.float32)

  return {
      'q_dw_w': nrm(ks[0], (C, 3, 3)), 'q_dw_b': nrm(ks[1], (C,)),
      'q_pw_w': nrm(ks[2], (E * C, C)), 'q_pw_b': nrm(ks[3], (E * C,)),
      'k_dw_w': nrm(ks[4], (C, 3, 3)), 'k_dw_b': nrm(ks[5], (C,)),
      'k_pw_w': nrm(ks[6], (E * C, C)), 'k_pw_b': nrm(ks[7], (E * C,)),
      'v_dw_w': nrm(ks[8], (C, 3, 3)), 'v_dw_b': nrm(ks[9], (C,)),
      'v_pw_w': nrm(ks[10], (C, C)), 'v_pw_b': nrm(ks[11], (C,)),
      'conv0_w': nrm(ks[12], (E, E, 3, 3)),
      'conv1_w': nrm(ks[13], (1, E, 3, 3)),
      'bn_gamma': 1.0 + nrm(ks[14], (E,)),
      'bn_beta': nrm(ks[15], (E,)),
      'bn_mean': jnp.zeros((E,), jnp.float32),
      'bn_var': jnp.ones((E,), jnp.float32),
  }


if __name__ == "__main__":
  key = jax.random.PRNGKey(0)
  kx, kp = jax.random.split(key)
  B, C, H, W = 2, 8, 8, 8          # dim = 8, spatial 8x8 -> attention maps 64x64
  x = jax.random.normal(kx, (B, C, H, W), dtype=jnp.float32)
  params = init_params(kp, C)

  out = jax.jit(attention_module_forward)(x, params)
  out = jax.block_until_ready(out)

  ref = ref_forward(x, params)
  assert out.shape == (B, C, H, W)
  err = float(jnp.max(jnp.abs(out - ref)))
  assert jnp.allclose(out, ref, rtol=1e-3, atol=2e-3), err
  print("KERNEL_OK")
</pallas_src>

<mosaic_0001>
module attributes {stable_mosaic.version = 11 : i64} {
  func.func @_fused_attention_kernel(%arg0: i32, %arg1: memref<1x8x64xf32, #tpu.memory_space<vmem>>, %arg2: memref<8x64x64xf32, #tpu.memory_space<vmem>>, %arg3: memref<8x9xf32, #tpu.memory_space<vmem>>, %arg4: memref<8x1xf32, #tpu.memory_space<vmem>>, %arg5: memref<32x8xf32, #tpu.memory_space<vmem>>, %arg6: memref<32x1xf32, #tpu.memory_space<vmem>>, %arg7: memref<8x9xf32, #tpu.memory_space<vmem>>, %arg8: memref<8x1xf32, #tpu.memory_space<vmem>>, %arg9: memref<32x8xf32, #tpu.memory_space<vmem>>, %arg10: memref<32x1xf32, #tpu.memory_space<vmem>>, %arg11: memref<8x9xf32, #tpu.memory_space<vmem>>, %arg12: memref<8x1xf32, #tpu.memory_space<vmem>>, %arg13: memref<8x8xf32, #tpu.memory_space<vmem>>, %arg14: memref<8x1xf32, #tpu.memory_space<vmem>>, %arg15: memref<64x256xf32, #tpu.memory_space<vmem>>, %arg16: memref<32x256xf32, #tpu.memory_space<vmem>>, %arg17: memref<3x256x256xf32, #tpu.memory_space<vmem>>, %arg18: memref<1x256xf32, #tpu.memory_space<vmem>>, %arg19: memref<256x256xf32, #tpu.memory_space<vmem>>, %arg20: memref<3x256x64xf32, #tpu.memory_space<vmem>>, %arg21: memref<64x64xf32, #tpu.memory_space<vmem>>, %arg22: memref<64x64xf32, #tpu.memory_space<vmem>>, %arg23: memref<1x8x64xf32, #tpu.memory_space<vmem>>) attributes {dimension_semantics = [#tpu.dimension_semantics<parallel>], iteration_bounds = array<i64: 2>, scalar_prefetch = 0 : i64, scratch_operands = 0 : i64, tpu.core_type = #tpu.core_type<tc>, window_params = [{transform_indices = @transform_0, window_bounds = array<i64: 1, 8, 64>}, {pipeline_mode = #tpu.pipeline_mode<synchronous>, transform_indices = @transform_1, window_bounds = array<i64: 8, 64, 64>}, {pipeline_mode = #tpu.pipeline_mode<synchronous>, transform_indices = @transform_2, window_bounds = array<i64: 8, 9>}, {pipeline_mode = #tpu.pipeline_mode<synchronous>, transform_indices = @transform_3, window_bounds = array<i64: 8, 1>}, {pipeline_mode = #tpu.pipeline_mode<synchronous>, transform_indices = @transform_4, window_bounds = array<i64: 32, 8>}, {pipeline_mode = #tpu.pipeline_mode<synchronous>, transform_indices = @transform_5, window_bounds = array<i64: 32, 1>}, {pipeline_mode = #tpu.pipeline_mode<synchronous>, transform_indices = @transform_6, window_bounds = array<i64: 8, 9>}, {pipeline_mode = #tpu.pipeline_mode<synchronous>, transform_indices = @transform_7, window_bounds = array<i64: 8, 1>}, {pipeline_mode = #tpu.pipeline_mode<synchronous>, transform_indices = @transform_8, window_bounds = array<i64: 32, 8>}, {pipeline_mode = #tpu.pipeline_mode<synchronous>, transform_indices = @transform_9, window_bounds = array<i64: 32, 1>}, {pipeline_mode = #tpu.pipeline_mode<synchronous>, transform_indices = @transform_10, window_bounds = array<i64: 8, 9>}, {pipeline_mode = #tpu.pipeline_mode<synchronous>, transform_indices = @transform_11, window_bounds = array<i64: 8, 1>}, {pipeline_mode = #tpu.pipeline_mode<synchronous>, transform_indices = @transform_12, window_bounds = array<i64: 8, 8>}, {pipeline_mode = #tpu.pipeline_mode<synchronous>, transform_indices = @transform_13, window_bounds = array<i64: 8, 1>}, {pipeline_mode = #tpu.pipeline_mode<synchronous>, transform_indices = @transform_14, window_bounds = array<i64: 64, 256>}, {pipeline_mode = #tpu.pipeline_mode<synchronous>, transform_indices = @transform_15, window_bounds = array<i64: 32, 256>}, {pipeline_mode = #tpu.pipeline_mode<synchronous>, transform_indices = @transform_16, window_bounds = array<i64: 3, 256, 256>}, {pipeline_mode = #tpu.pipeline_mode<synchronous>, transform_indices = @transform_17, window_bounds = array<i64: 1, 256>}, {pipeline_mode = #tpu.pipeline_mode<synchronous>, transform_indices = @transform_18, window_bounds = array<i64: 256, 256>}, {pipeline_mode = #tpu.pipeline_mode<synchronous>, transform_indices = @transform_19, window_bounds = array<i64: 3, 256, 64>}, {pipeline_mode = #tpu.pipeline_mode<synchronous>, transform_indices = @transform_20, window_bounds = array<i64: 64, 64>}, {pipeline_mode = #tpu.pipeline_mode<synchronous>, transform_indices = @transform_21, window_bounds = array<i64: 64, 64>}, {transform_indices = @transform_22, window_bounds = array<i64: 1, 8, 64>}]} {
    %c0 = arith.constant 0 : index
    %c0_0 = arith.constant 0 : index
    %c0_1 = arith.constant 0 : index
    %0 = vector.load %arg1[%c0, %c0_0, %c0_1] : memref<1x8x64xf32, #tpu.memory_space<vmem>>, vector<1x8x64xf32>
    %1 = vector.shape_cast %0 : vector<1x8x64xf32> to vector<8x64xf32>
    %c0_2 = arith.constant 0 : index
    %c0_3 = arith.constant 0 : index
    %c0_4 = arith.constant 0 : index
    %2 = vector.load %arg2[%c0_2, %c0_3, %c0_4] : memref<8x64x64xf32, #tpu.memory_space<vmem>>, vector<1x64x64xf32>
    %3 = vector.shape_cast %2 : vector<1x64x64xf32> to vector<64x64xf32>
    %cst = arith.constant dense<0.000000e+00> : vector<8x64xf32>
    %4 = tpu.matmul %1, %3, %cst {dimension_numbers = #tpu.dot_dimension_numbers<[1], [0], [0], [1], [0, 0, 1, 1], [], []>} : vector<8x64xf32>, vector<64x64xf32>, vector<8x64xf32> -> vector<8x64xf32>
    %c1 = arith.constant 1 : index
    %c0_5 = arith.constant 0 : index
    %c0_6 = arith.constant 0 : index
    %5 = vector.load %arg2[%c1, %c0_5, %c0_6] : memref<8x64x64xf32, #tpu.memory_space<vmem>>, vector<1x64x64xf32>
    %6 = vector.shape_cast %5 : vector<1x64x64xf32> to vector<64x64xf32>
    %cst_7 = arith.constant dense<0.000000e+00> : vector<8x64xf32>
    %7 = tpu.matmul %1, %6, %cst_7 {dimension_numbers = #tpu.dot_dimension_numbers<[1], [0], [0], [1], [0, 0, 1, 1], [], []>} : vector<8x64xf32>, vector<64x64xf32>, vector<8x64xf32> -> vector<8x64xf32>
    %c2 = arith.constant 2 : index
    %c0_8 = arith.constant 0 : index
    %c0_9 = arith.constant 0 : index
    %8 = vector.load %arg2[%c2, %c0_8, %c0_9] : memref<8x64x64xf32, #tpu.memory_space<vmem>>, vector<1x64x64xf32>
    %9 = vector.shape_cast %8 : vector<1x64x64xf32> to vector<64x64xf32>
    %cst_10 = arith.constant dense<0.000000e+00> : vector<8x64xf32>
    %10 = tpu.matmul %1, %9, %cst_10 {dimension_numbers = #tpu.dot_dimension_numbers<[1], [0], [0], [1], [0, 0, 1, 1], [], []>} : vector<8x64xf32>, vector<64x64xf32>, vector<8x64xf32> -> vector<8x64xf32>
    %c3 = arith.constant 3 : index
    %c0_11 = arith.constant 0 : index
    %c0_12 = arith.constant 0 : index
    %11 = vector.load %arg2[%c3, %c0_11, %c0_12] : memref<8x64x64xf32, #tpu.memory_space<vmem>>, vector<1x64x64xf32>
    %12 = vector.shape_cast %11 : vector<1x64x64xf32> to vector<64x64xf32>
    %cst_13 = arith.constant dense<0.000000e+00> : vector<8x64xf32>
    %13 = tpu.matmul %1, %12, %cst_13 {dimension_numbers = #tpu.dot_dimension_numbers<[1], [0], [0], [1], [0, 0, 1, 1], [], []>} : vector<8x64xf32>, vector<64x64xf32>, vector<8x64xf32> -> vector<8x64xf32>
    %c4 = arith.constant 4 : index
    %c0_14 = arith.constant 0 : index
    %c0_15 = arith.constant 0 : index
    %14 = vector.load %arg2[%c4, %c0_14, %c0_15] : memref<8x64x64xf32, #tpu.memory_space<vmem>>, vector<1x64x64xf32>
    %15 = vector.shape_cast %14 : vector<1x64x64xf32> to vector<64x64xf32>
    %cst_16 = arith.constant dense<0.000000e+00> : vector<8x64xf32>
    %16 = tpu.matmul %1, %15, %cst_16 {dimension_numbers = #tpu.dot_dimension_numbers<[1], [0], [0], [1], [0, 0, 1, 1], [], []>} : vector<8x64xf32>, vector<64x64xf32>, vector<8x64xf32> -> vector<8x64xf32>
    %c5 = arith.constant 5 : index
    %c0_17 = arith.constant 0 : index
    %c0_18 = arith.constant 0 : index
    %17 = vector.load %arg2[%c5, %c0_17, %c0_18] : memref<8x64x64xf32, #tpu.memory_space<vmem>>, vector<1x64x64xf32>
    %18 = vector.shape_cast %17 : vector<1x64x64xf32> to vector<64x64xf32>
    %cst_19 = arith.constant dense<0.000000e+00> : vector<8x64xf32>
    %19 = tpu.matmul %1, %18, %cst_19 {dimension_numbers = #tpu.dot_dimension_numbers<[1], [0], [0], [1], [0, 0, 1, 1], [], []>} : vector<8x64xf32>, vector<64x64xf32>, vector<8x64xf32> -> vector<8x64xf32>
    %c6 = arith.constant 6 : index
    %c0_20 = arith.constant 0 : index
    %c0_21 = arith.constant 0 : index
    %20 = vector.load %arg2[%c6, %c0_20, %c0_21] : memref<8x64x64xf32, #tpu.memory_space<vmem>>, vector<1x64x64xf32>
    %21 = vector.shape_cast %20 : vector<1x64x64xf32> to vector<64x64xf32>
    %cst_22 = arith.constant dense<0.000000e+00> : vector<8x64xf32>
    %22 = tpu.matmul %1, %21, %cst_22 {dimension_numbers = #tpu.dot_dimension_numbers<[1], [0], [0], [1], [0, 0, 1, 1], [], []>} : vector<8x64xf32>, vector<64x64xf32>, vector<8x64xf32> -> vector<8x64xf32>
    %c7 = arith.constant 7 : index
    %c0_23 = arith.constant 0 : index
    %c0_24 = arith.constant 0 : index
    %23 = vector.load %arg2[%c7, %c0_23, %c0_24] : memref<8x64x64xf32, #tpu.memory_space<vmem>>, vector<1x64x64xf32>
    %24 = vector.shape_cast %23 : vector<1x64x64xf32> to vector<64x64xf32>
    %cst_25 = arith.constant dense<0.000000e+00> : vector<8x64xf32>
    %25 = tpu.matmul %1, %24, %cst_25 {dimension_numbers = #tpu.dot_dimension_numbers<[1], [0], [0], [1], [0, 0, 1, 1], [], []>} : vector<8x64xf32>, vector<64x64xf32>, vector<8x64xf32> -> vector<8x64xf32>
    %c0_26 = arith.constant 0 : index
    %c0_27 = arith.constant 0 : index
    %26 = vector.load %arg3[%c0_26, %c0_27] : memref<8x9xf32, #tpu.memory_space<vmem>>, vector<8x9xf32>
    %c0_28 = arith.constant 0 : index
    %c0_29 = arith.constant 0 : index
    %27 = vector.load %arg7[%c0_28, %c0_29] : memref<8x9xf32, #tpu.memory_space<vmem>>, vector<8x9xf32>
    %c0_30 = arith.constant 0 : index
    %c0_31 = arith.constant 0 : index
    %28 = vector.load %arg11[%c0_30, %c0_31] : memref<8x9xf32, #tpu.memory_space<vmem>>, vector<8x9xf32>
    %c0_32 = arith.constant 0 : index
    %c0_33 = arith.constant 0 : index
    %29 = vector.load %arg4[%c0_32, %c0_33] : memref<8x1xf32, #tpu.memory_space<vmem>>, vector<8x1xf32>
    %c0_34 = arith.constant 0 : index
    %c0_35 = arith.constant 0 : index
    %30 = vector.load %arg8[%c0_34, %c0_35] : memref<8x1xf32, #tpu.memory_space<vmem>>, vector<8x1xf32>
    %c0_36 = arith.constant 0 : index
    %c0_37 = arith.constant 0 : index
    %31 = vector.load %arg12[%c0_36, %c0_37] : memref<8x1xf32, #tpu.memory_space<vmem>>, vector<8x1xf32>
    %32 = vector.extract_strided_slice %26 {offsets = [0, 0], sizes = [8, 1], strides = [1, 1]} : vector<8x9xf32> to vector<8x1xf32>
    %33 = vector.broadcast %32 : vector<8x1xf32> to vector<8x64xf32>
    %34 = arith.mulf %33, %4 : vector<8x64xf32>
    %35 = vector.broadcast %29 : vector<8x1xf32> to vector<8x64xf32>
    %36 = arith.addf %35, %34 : vector<8x64xf32>
    %37 = vector.extract_strided_slice %27 {offsets = [0, 0], sizes = [8, 1], strides = [1, 1]} : vector<8x9xf32> to vector<8x1xf32>
    %38 = vector.broadcast %37 : vector<8x1xf32> to vector<8x64xf32>
    %39 = arith.mulf %38, %4 : vector<8x64xf32>
    %40 = vector.broadcast %30 : vector<8x1xf32> to vector<8x64xf32>
    %41 = arith.addf %40, %39 : vector<8x64xf32>
    %42 = vector.extract_strided_slice %28 {offsets = [0, 0], sizes = [8, 1], strides = [1, 1]} : vector<8x9xf32> to vector<8x1xf32>
    %43 = vector.broadcast %42 : vector<8x1xf32> to vector<8x64xf32>
    %44 = arith.mulf %43, %4 : vector<8x64xf32>
    %45 = vector.broadcast %31 : vector<8x1xf32> to vector<8x64xf32>
    %46 = arith.addf %45, %44 : vector<8x64xf32>
    %47 = vector.extract_strided_slice %26 {offsets = [0, 1], sizes = [8, 1], strides = [1, 1]} : vector<8x9xf32> to vector<8x1xf32>
    %48 = vector.broadcast %47 : vector<8x1xf32> to vector<8x64xf32>
    %49 = arith.mulf %48, %7 : vector<8x64xf32>
    %50 = arith.addf %36, %49 : vector<8x64xf32>
    %51 = vector.extract_strided_slice %27 {offsets = [0, 1], sizes = [8, 1], strides = [1, 1]} : vector<8x9xf32> to vector<8x1xf32>
    %52 = vector.broadcast %51 : vector<8x1xf32> to vector<8x64xf32>
    %53 = arith.mulf %52, %7 : vector<8x64xf32>
    %54 = arith.addf %41, %53 : vector<8x64xf32>
    %55 = vector.extract_strided_slice %28 {offsets = [0, 1], sizes = [8, 1], strides = [1, 1]} : vector<8x9xf32> to vector<8x1xf32>
    %56 = vector.broadcast %55 : vector<8x1xf32> to vector<8x64xf32>
    %57 = arith.mulf %56, %7 : vector<8x64xf32>
    %58 = arith.addf %46, %57 : vector<8x64xf32>
    %59 = vector.extract_strided_slice %26 {offsets = [0, 2], sizes = [8, 1], strides = [1, 1]} : vector<8x9xf32> to vector<8x1xf32>
    %60 = vector.broadcast %59 : vector<8x1xf32> to vector<8x64xf32>
    %61 = arith.mulf %60, %10 : vector<8x64xf32>
    %62 = arith.addf %50, %61 : vector<8x64xf32>
    %63 = vector.extract_strided_slice %27 {offsets = [0, 2], sizes = [8, 1], strides = [1, 1]} : vector<8x9xf32> to vector<8x1xf32>
    %64 = vector.broadcast %63 : vector<8x1xf32> to vector<8x64xf32>
    %65 = arith.mulf %64, %10 : vector<8x64xf32>
    %66 = arith.addf %54, %65 : vector<8x64xf32>
    %67 = vector.extract_strided_slice %28 {offsets = [0, 2], sizes = [8, 1], strides = [1, 1]} : vector<8x9xf32> to vector<8x1xf32>
    %68 = vector.broadcast %67 : vector<8x1xf32> to vector<8x64xf32>
    %69 = arith.mulf %68, %10 : vector<8x64xf32>
    %70 = arith.addf %58, %69 : vector<8x64xf32>
    %71 = vector.extract_strided_slice %26 {offsets = [0, 3], sizes = [8, 1], strides = [1, 1]} : vector<8x9xf32> to vector<8x1xf32>
    %72 = vector.broadcast %71 : vector<8x1xf32> to vector<8x64xf32>
    %73 = arith.mulf %72, %13 : vector<8x64xf32>
    %74 = arith.addf %62, %73 : vector<8x64xf32>
    %75 = vector.extract_strided_slice %27 {offsets = [0, 3], sizes = [8, 1], strides = [1, 1]} : vector<8x9xf32> to vector<8x1xf32>
    %76 = vector.broadcast %75 : vector<8x1xf32> to vector<8x64xf32>
    %77 = arith.mulf %76, %13 : vector<8x64xf32>
    %78 = arith.addf %66, %77 : vector<8x64xf32>
    %79 = vector.extract_strided_slice %28 {offsets = [0, 3], sizes = [8, 1], strides = [1, 1]} : vector<8x9xf32> to vector<8x1xf32>
    %80 = vector.broadcast %79 : vector<8x1xf32> to vector<8x64xf32>
    %81 = arith.mulf %80, %13 : vector<8x64xf32>
    %82 = arith.addf %70, %81 : vector<8x64xf32>
    %83 = vector.extract_strided_slice %26 {offsets = [0, 4], sizes = [8, 1], strides = [1, 1]} : vector<8x9xf32> to vector<8x1xf32>
    %84 = vector.broadcast %83 : vector<8x1xf32> to vector<8x64xf32>
    %85 = arith.mulf %84, %1 : vector<8x64xf32>
    %86 = arith.addf %74, %85 : vector<8x64xf32>
    %87 = vector.extract_strided_slice %27 {offsets = [0, 4], sizes = [8, 1], strides = [1, 1]} : vector<8x9xf32> to vector<8x1xf32>
    %88 = vector.broadcast %87 : vector<8x1xf32> to vector<8x64xf32>
    %89 = arith.mulf %88, %1 : vector<8x64xf32>
    %90 = arith.addf %78, %89 : vector<8x64xf32>
    %91 = vector.extract_strided_slice %28 {offsets = [0, 4], sizes = [8, 1], strides = [1, 1]} : vector<8x9xf32> to vector<8x1xf32>
    %92 = vector.broadcast %91 : vector<8x1xf32> to vector<8x64xf32>
    %93 = arith.mulf %92, %1 : vector<8x64xf32>
    %94 = arith.addf %82, %93 : vector<8x64xf32>
    %95 = vector.extract_strided_slice %26 {offsets = [0, 5], sizes = [8, 1], strides = [1, 1]} : vector<8x9xf32> to vector<8x1xf32>
    %96 = vector.broadcast %95 : vector<8x1xf32> to vector<8x64xf32>
    %97 = arith.mulf %96, %16 : vector<8x64xf32>
    %98 = arith.addf %86, %97 : vector<8x64xf32>
    %99 = vector.extract_strided_slice %27 {offsets = [0, 5], sizes = [8, 1], strides = [1, 1]} : vector<8x9xf32> to vector<8x1xf32>
    %100 = vector.broadcast %99 : vector<8x1xf32> to vector<8x64xf32>
    %101 = arith.mulf %100, %16 : vector<8x64xf32>
    %102 = arith.addf %90, %101 : vector<8x64xf32>
    %103 = vector.extract_strided_slice %28 {offsets = [0, 5], sizes = [8, 1], strides = [1, 1]} : vector<8x9xf32> to vector<8x1xf32>
    %104 = vector.broadcast %103 : vector<8x1xf32> to vector<8x64xf32>
    %105 = arith.mulf %104, %16 : vector<8x64xf32>
    %106 = arith.addf %94, %105 : vector<8x64xf32>
    %107 = vector.extract_strided_slice %26 {offsets = [0, 6], sizes = [8, 1], strides = [1, 1]} : vector<8x9xf32> to vector<8x1xf32>
    %108 = vector.broadcast %107 : vector<8x1xf32> to vector<8x64xf32>
    %109 = arith.mulf %108, %19 : vector<8x64xf32>
    %110 = arith.addf %98, %109 : vector<8x64xf32>
    %111 = vector.extract_strided_slice %27 {offsets = [0, 6], sizes = [8, 1], strides = [1, 1]} : vector<8x9xf32> to vector<8x1xf32>
    %112 = vector.broadcast %111 : vector<8x1xf32> to vector<8x64xf32>
    %113 = arith.mulf %112, %19 : vector<8x64xf32>
    %114 = arith.addf %102, %113 : vector<8x64xf32>
    %115 = vector.extract_strided_slice %28 {offsets = [0, 6], sizes = [8, 1], strides = [1, 1]} : vector<8x9xf32> to vector<8x1xf32>
    %116 = vector.broadcast %115 : vector<8x1xf32> to vector<8x64xf32>
    %117 = arith.mulf %116, %19 : vector<8x64xf32>
    %118 = arith.addf %106, %117 : vector<8x64xf32>
    %119 = vector.extract_strided_slice %26 {offsets = [0, 7], sizes = [8, 1], strides = [1, 1]} : vector<8x9xf32> to vector<8x1xf32>
    %120 = vector.broadcast %119 : vector<8x1xf32> to vector<8x64xf32>
    %121 = arith.mulf %120, %22 : vector<8x64xf32>
    %122 = arith.addf %110, %121 : vector<8x64xf32>
    %123 = vector.extract_strided_slice %27 {offsets = [0, 7], sizes = [8, 1], strides = [1, 1]} : vector<8x9xf32> to vector<8x1xf32>
    %124 = vector.broadcast %123 : vector<8x1xf32> to vector<8x64xf32>
    %125 = arith.mulf %124, %22 : vector<8x64xf32>
    %126 = arith.addf %114, %125 : vector<8x64xf32>
    %127 = vector.extract_strided_slice %28 {offsets = [0, 7], sizes = [8, 1], strides = [1, 1]} : vector<8x9xf32> to vector<8x1xf32>
    %128 = vector.broadcast %127 : vector<8x1xf32> to vector<8x64xf32>
    %129 = arith.mulf %128, %22 : vector<8x64xf32>
    %130 = arith.addf %118, %129 : vector<8x64xf32>
    %131 = vector.extract_strided_slice %26 {offsets = [0, 8], sizes = [8, 1], strides = [1, 1]} : vector<8x9xf32> to vector<8x1xf32>
    %132 = vector.broadcast %131 : vector<8x1xf32> to vector<8x64xf32>
    %133 = arith.mulf %132, %25 : vector<8x64xf32>
    %134 = arith.addf %122, %133 : vector<8x64xf32>
    %135 = vector.extract_strided_slice %27 {offsets = [0, 8], sizes = [8, 1], strides = [1, 1]} : vector<8x9xf32> to vector<8x1xf32>
    %136 = vector.broadcast %135 : vector<8x1xf32> to vector<8x64xf32>
    %137 = arith.mulf %136, %25 : vector<8x64xf32>
    %138 = arith.addf %126, %137 : vector<8x64xf32>
    %139 = vector.extract_strided_slice %28 {offsets = [0, 8], sizes = [8, 1], strides = [1, 1]} : vector<8x9xf32> to vector<8x1xf32>
    %140 = vector.broadcast %139 : vector<8x1xf32> to vector<8x64xf32>
    %141 = arith.mulf %140, %25 : vector<8x64xf32>
    %142 = arith.addf %130, %141 : vector<8x64xf32>
    %c0_38 = arith.constant 0 : index
    %c0_39 = arith.constant 0 : index
    %143 = vector.load %arg5[%c0_38, %c0_39] : memref<32x8xf32, #tpu.memory_space<vmem>>, vector<32x8xf32>
    %cst_40 = arith.constant dense<0.000000e+00> : vector<32x64xf32>
    %144 = tpu.matmul %143, %134, %cst_40 {dimension_numbers = #tpu.dot_dimension_numbers<[1], [0], [0], [1], [0, 0, 1, 1], [], []>} : vector<32x8xf32>, vector<8x64xf32>, vector<32x64xf32> -> vector<32x64xf32>
    %c0_41 = arith.constant 0 : index
    %c0_42 = arith.constant 0 : index
    %145 = vector.load %arg6[%c0_41, %c0_42] : memref<32x1xf32, #tpu.memory_space<vmem>>, vector<32x1xf32>
    %146 = vector.broadcast %145 : vector<32x1xf32> to vector<32x64xf32>
    %147 = arith.addf %144, %146 : vector<32x64xf32>
    %c0_43 = arith.constant 0 : index
    %c0_44 = arith.constant 0 : index
    %148 = vector.load %arg9[%c0_43, %c0_44] : memref<32x8xf32, #tpu.memory_space<vmem>>, vector<32x8xf32>
    %cst_45 = arith.constant dense<0.000000e+00> : vector<32x64xf32>
    %149 = tpu.matmul %148, %138, %cst_45 {dimension_numbers = #tpu.dot_dimension_numbers<[1], [0], [0], [1], [0, 0, 1, 1], [], []>} : vector<32x8xf32>, vector<8x64xf32>, vector<32x64xf32> -> vector<32x64xf32>
    %c0_46 = arith.constant 0 : index
    %c0_47 = arith.constant 0 : index
    %150 = vector.load %arg10[%c0_46, %c0_47] : memref<32x1xf32, #tpu.memory_space<vmem>>, vector<32x1xf32>
    %151 = vector.broadcast %150 : vector<32x1xf32> to vector<32x64xf32>
    %152 = arith.addf %149, %151 : vector<32x64xf32>
    %c0_48 = arith.constant 0 : index
    %c0_49 = arith.constant 0 : index
    %153 = vector.load %arg13[%c0_48, %c0_49] : memref<8x8xf32, #tpu.memory_space<vmem>>, vector<8x8xf32>
    %cst_50 = arith.constant dense<0.000000e+00> : vector<8x64xf32>
    %154 = tpu.matmul %153, %142, %cst_50 {dimension_numbers = #tpu.dot_dimension_numbers<[1], [0], [0], [1], [0, 0, 1, 1], [], []>} : vector<8x8xf32>, vector<8x64xf32>, vector<8x64xf32> -> vector<8x64xf32>
    %c0_51 = arith.constant 0 : index
    %c0_52 = arith.constant 0 : index
    %155 = vector.load %arg14[%c0_51, %c0_52] : memref<8x1xf32, #tpu.memory_space<vmem>>, vector<8x1xf32>
    %156 = vector.broadcast %155 : vector<8x1xf32> to vector<8x64xf32>
    %157 = arith.addf %154, %156 : vector<8x64xf32>
    %c0_53 = arith.constant 0 : index
    %c0_54 = arith.constant 0 : index
    %158 = vector.load %arg15[%c0_53, %c0_54] : memref<64x256xf32, #tpu.memory_space<vmem>>, vector<64x256xf32>
    %cst_55 = arith.constant dense<0.000000e+00> : vector<32x256xf32>
    %159 = tpu.matmul %152, %158, %cst_55 {dimension_numbers = #tpu.dot_dimension_numbers<[1], [0], [0], [1], [0, 0, 1, 1], [], []>} : vector<32x64xf32>, vector<64x256xf32>, vector<32x256xf32> -> vector<32x256xf32>
    %c0_56 = arith.constant 0 : index
    %c0_57 = arith.constant 0 : index
    %160 = vector.load %arg16[%c0_56, %c0_57] : memref<32x256xf32, #tpu.memory_space<vmem>>, vector<32x256xf32>
    %161 = arith.mulf %159, %160 : vector<32x256xf32>
    %cst_58 = arith.constant dense<0.000000e+00> : vector<64x256xf32>
    %162 = tpu.matmul %147, %161, %cst_58 {dimension_numbers = #tpu.dot_dimension_numbers<[0], [0], [1], [1], [0, 1, 1, 1], [], []>} : vector<32x64xf32>, vector<32x256xf32>, vector<64x256xf32> -> vector<64x256xf32>
    %c1_59 = arith.constant 1 : index
    %c0_60 = arith.constant 0 : index
    %c0_61 = arith.constant 0 : index
    %163 = vector.load %arg17[%c1_59, %c0_60, %c0_61] : memref<3x256x256xf32, #tpu.memory_space<vmem>>, vector<1x256x256xf32>
    %164 = vector.shape_cast %163 : vector<1x256x256xf32> to vector<256x256xf32>
    %cst_62 = arith.constant dense<0.000000e+00> : vector<64x256xf32>
    %165 = tpu.matmul %162, %164, %cst_62 {dimension_numbers = #tpu.dot_dimension_numbers<[1], [0], [0], [1], [0, 0, 1, 1], [], []>} : vector<64x256xf32>, vector<256x256xf32>, vector<64x256xf32> -> vector<64x256xf32>
    %c0_63 = arith.constant 0 : index
    %c0_64 = arith.constant 0 : index
    %166 = vector.load %arg21[%c0_63, %c0_64] : memref<64x64xf32, #tpu.memory_space<vmem>>, vector<64x64xf32>
    %c0_65 = arith.constant 0 : index
    %c0_66 = arith.constant 0 : index
    %c0_67 = arith.constant 0 : index
    %167 = vector.load %arg17[%c0_65, %c0_66, %c0_67] : memref<3x256x256xf32, #tpu.memory_space<vmem>>, vector<1x256x256xf32>
    %168 = vector.shape_cast %167 : vector<1x256x256xf32> to vector<256x256xf32>
    %cst_68 = arith.constant dense<0.000000e+00> : vector<64x256xf32>
    %169 = tpu.matmul %162, %168, %cst_68 {dimension_numbers = #tpu.dot_dimension_numbers<[1], [0], [0], [1], [0, 0, 1, 1], [], []>} : vector<64x256xf32>, vector<256x256xf32>, vector<64x256xf32> -> vector<64x256xf32>
    %cst_69 = arith.constant dense<0.000000e+00> : vector<64x256xf32>
    %170 = tpu.matmul %166, %169, %cst_69 {dimension_numbers = #tpu.dot_dimension_numbers<[1], [0], [0], [1], [0, 0, 1, 1], [], []>} : vector<64x64xf32>, vector<64x256xf32>, vector<64x256xf32> -> vector<64x256xf32>
    %171 = arith.addf %165, %170 : vector<64x256xf32>
    %c0_70 = arith.constant 0 : index
    %c0_71 = arith.constant 0 : index
    %172 = vector.load %arg22[%c0_70, %c0_71] : memref<64x64xf32, #tpu.memory_space<vmem>>, vector<64x64xf32>
    %c2_72 = arith.constant 2 : index
    %c0_73 = arith.constant 0 : index
    %c0_74 = arith.constant 0 : index
    %173 = vector.load %arg17[%c2_72, %c0_73, %c0_74] : memref<3x256x256xf32, #tpu.memory_space<vmem>>, vector<1x256x256xf32>
    %174 = vector.shape_cast %173 : vector<1x256x256xf32> to vector<256x256xf32>
    %cst_75 = arith.constant dense<0.000000e+00> : vector<64x256xf32>
    %175 = tpu.matmul %162, %174, %cst_75 {dimension_numbers = #tpu.dot_dimension_numbers<[1], [0], [0], [1], [0, 0, 1, 1], [], []>} : vector<64x256xf32>, vector<256x256xf32>, vector<64x256xf32> -> vector<64x256xf32>
    %cst_76 = arith.constant dense<0.000000e+00> : vector<64x256xf32>
    %176 = tpu.matmul %172, %175, %cst_76 {dimension_numbers = #tpu.dot_dimension_numbers<[1], [0], [0], [1], [0, 0, 1, 1], [], []>} : vector<64x64xf32>, vector<64x256xf32>, vector<64x256xf32> -> vector<64x256xf32>
    %177 = arith.addf %171, %176 : vector<64x256xf32>
    %c0_77 = arith.constant 0 : index
    %c0_78 = arith.constant 0 : index
    %178 = vector.load %arg18[%c0_77, %c0_78] : memref<1x256xf32, #tpu.memory_space<vmem>>, vector<1x256xf32>
    %179 = vector.broadcast %178 : vector<1x256xf32> to vector<64x256xf32>
    %180 = arith.addf %177, %179 : vector<64x256xf32>
    %cst_79 = arith.constant dense<0xFF800000> : vector<64xf32>
    %181 = vector.multi_reduction <maximumf>, %180, %cst_79 [1] : vector<64x256xf32> to vector<64xf32>
    %182 = vector.shape_cast %181 : vector<64xf32> to vector<64x1xf32>
    %183 = vector.broadcast %182 : vector<64x1xf32> to vector<64x256xf32>
    %184 = arith.subf %180, %183 : vector<64x256xf32>
    %185 = math.exp %184 : vector<64x256xf32>
    %c0_80 = arith.constant 0 : index
    %c0_81 = arith.constant 0 : index
    %186 = vector.load %arg19[%c0_80, %c0_81] : memref<256x256xf32, #tpu.memory_space<vmem>>, vector<256x256xf32>
    %cst_82 = arith.constant dense<0.000000e+00> : vector<64x256xf32>
    %187 = tpu.matmul %185, %186, %cst_82 {dimension_numbers = #tpu.dot_dimension_numbers<[1], [0], [0], [1], [0, 0, 1, 1], [], []>} : vector<64x256xf32>, vector<256x256xf32>, vector<64x256xf32> -> vector<64x256xf32>
    %188 = tpu.reciprocal %187 {approx = true} : vector<64x256xf32> -> vector<64x256xf32>
    %189 = arith.mulf %187, %188 : vector<64x256xf32>
    %cst_83 = arith.constant 2.000000e+00 : f32
    %190 = vector.broadcast %cst_83 : f32 to vector<64x256xf32>
    %191 = arith.subf %190, %189 : vector<64x256xf32>
    %192 = arith.mulf %188, %191 : vector<64x256xf32>
    %193 = arith.mulf %185, %192 : vector<64x256xf32>
    %194 = arith.mulf %180, %193 : vector<64x256xf32>
    %c0_84 = arith.constant 0 : index
    %c0_85 = arith.constant 0 : index
    %c0_86 = arith.constant 0 : index
    %195 = vector.load %arg20[%c0_84, %c0_85, %c0_86] : memref<3x256x64xf32, #tpu.memory_space<vmem>>, vector<1x256x64xf32>
    %196 = vector.shape_cast %195 : vector<1x256x64xf32> to vector<256x64xf32>
    %cst_87 = arith.constant dense<0.000000e+00> : vector<64x64xf32>
    %197 = tpu.matmul %194, %196, %cst_87 {dimension_numbers = #tpu.dot_dimension_numbers<[1], [0], [0], [1], [0, 0, 1, 1], [], []>} : vector<64x256xf32>, vector<256x64xf32>, vector<64x64xf32> -> vector<64x64xf32>
    %c1_88 = arith.constant 1 : index
    %c0_89 = arith.constant 0 : index
    %c0_90 = arith.constant 0 : index
    %198 = vector.load %arg20[%c1_88, %c0_89, %c0_90] : memref<3x256x64xf32, #tpu.memory_space<vmem>>, vector<1x256x64xf32>
    %199 = vector.shape_cast %198 : vector<1x256x64xf32> to vector<256x64xf32>
    %cst_91 = arith.constant dense<0.000000e+00> : vector<64x64xf32>
    %200 = tpu.matmul %194, %199, %cst_91 {dimension_numbers = #tpu.dot_dimension_numbers<[1], [0], [0], [1], [0, 0, 1, 1], [], []>} : vector<64x256xf32>, vector<256x64xf32>, vector<64x64xf32> -> vector<64x64xf32>
    %c2_92 = arith.constant 2 : index
    %c0_93 = arith.constant 0 : index
    %c0_94 = arith.constant 0 : index
    %201 = vector.load %arg20[%c2_92, %c0_93, %c0_94] : memref<3x256x64xf32, #tpu.memory_space<vmem>>, vector<1x256x64xf32>
    %202 = vector.shape_cast %201 : vector<1x256x64xf32> to vector<256x64xf32>
    %cst_95 = arith.constant dense<0.000000e+00> : vector<64x64xf32>
    %203 = tpu.matmul %194, %202, %cst_95 {dimension_numbers = #tpu.dot_dimension_numbers<[1], [0], [0], [1], [0, 0, 1, 1], [], []>} : vector<64x256xf32>, vector<256x64xf32>, vector<64x64xf32> -> vector<64x64xf32>
    %c0_96 = arith.constant 0 : index
    %c0_97 = arith.constant 0 : index
    %204 = vector.load %arg21[%c0_96, %c0_97] : memref<64x64xf32, #tpu.memory_space<vmem>>, vector<64x64xf32>
    %cst_98 = arith.constant dense<0.000000e+00> : vector<64x64xf32>
    %205 = tpu.matmul %204, %197, %cst_98 {dimension_numbers = #tpu.dot_dimension_numbers<[1], [0], [0], [1], [0, 0, 1, 1], [], []>} : vector<64x64xf32>, vector<64x64xf32>, vector<64x64xf32> -> vector<64x64xf32>
    %206 = arith.addf %200, %205 : vector<64x64xf32>
    %c0_99 = arith.constant 0 : index
    %c0_100 = arith.constant 0 : index
    %207 = vector.load %arg22[%c0_99, %c0_100] : memref<64x64xf32, #tpu.memory_space<vmem>>, vector<64x64xf32>
    %cst_101 = arith.constant dense<0.000000e+00> : vector<64x64xf32>
    %208 = tpu.matmul %207, %203, %cst_101 {dimension_numbers = #tpu.dot_dimension_numbers<[1], [0], [0], [1], [0, 0, 1, 1], [], []>} : vector<64x64xf32>, vector<64x64xf32>, vector<64x64xf32> -> vector<64x64xf32>
    %209 = arith.addf %206, %208 : vector<64x64xf32>
    %cst_102 = arith.constant dense<0.000000e+00> : vector<8x64xf32>
    %210 = tpu.matmul %157, %209, %cst_102 {dimension_numbers = #tpu.dot_dimension_numbers<[1], [1], [0], [0], [0, 0, 1, 0], [], []>} : vector<8x64xf32>, vector<64x64xf32>, vector<8x64xf32> -> vector<8x64xf32>
    %c0_103 = arith.constant 0 : index
    %c0_104 = arith.constant 0 : index
    %c0_105 = arith.constant 0 : index
    %211 = vector.load %arg23[%c0_103, %c0_104, %c0_105] : memref<1x8x64xf32, #tpu.memory_space<vmem>>, vector<1x8x64xf32>
    %212 = vector.shape_cast %211 : vector<1x8x64xf32> to vector<8x64xf32>
    %213 = vector.shape_cast %210 : vector<8x64xf32> to vector<1x8x64xf32>
    tpu.vector_store %arg23[%c0_103, %c0_104, %c0_105], %213 {strides = array<i32>} : memref<1x8x64xf32, #tpu.memory_space<vmem>>, vector<1x8x64xf32>,
    return
  }
  func.func @transform_0(%arg0: i32) -> (i32, i32, i32) {
    %c0_i32 = arith.constant 0 : i32
    %c0_i32_0 = arith.constant 0 : i32
    %c0_i32_1 = arith.constant 0 : i32
    return %arg0, %c0_i32, %c0_i32_0 : i32, i32, i32
  }
  func.func @transform_1(%arg0: i32) -> (i32, i32, i32) {
    %c0_i32 = arith.constant 0 : i32
    %c0_i32_0 = arith.constant 0 : i32
    %c0_i32_1 = arith.constant 0 : i32
    %c0_i32_2 = arith.constant 0 : i32
    return %c0_i32, %c0_i32_0, %c0_i32_1 : i32, i32, i32
  }
  func.func @transform_2(%arg0: i32) -> (i32, i32) {
    %c0_i32 = arith.constant 0 : i32
    %c0_i32_0 = arith.constant 0 : i32
    %c0_i32_1 = arith.constant 0 : i32
    return %c0_i32, %c0_i32_0 : i32, i32
  }
  func.func @transform_3(%arg0: i32) -> (i32, i32) {
    %c0_i32 = arith.constant 0 : i32
    %c0_i32_0 = arith.constant 0 : i32
    %c0_i32_1 = arith.constant 0 : i32
    return %c0_i32, %c0_i32_0 : i32, i32
  }
  func.func @transform_4(%arg0: i32) -> (i32, i32) {
    %c0_i32 = arith.constant 0 : i32
    %c0_i32_0 = arith.constant 0 : i32
    %c0_i32_1 = arith.constant 0 : i32
    return %c0_i32, %c0_i32_0 : i32, i32
  }
  func.func @transform_5(%arg0: i32) -> (i32, i32) {
    %c0_i32 = arith.constant 0 : i32
    %c0_i32_0 = arith.constant 0 : i32
    %c0_i32_1 = arith.constant 0 : i32
    return %c0_i32, %c0_i32_0 : i32, i32
  }
  func.func @transform_6(%arg0: i32) -> (i32, i32) {
    %c0_i32 = arith.constant 0 : i32
    %c0_i32_0 = arith.constant 0 : i32
    %c0_i32_1 = arith.constant 0 : i32
    return %c0_i32, %c0_i32_0 : i32, i32
  }
  func.func @transform_7(%arg0: i32) -> (i32, i32) {
    %c0_i32 = arith.constant 0 : i32
    %c0_i32_0 = arith.constant 0 : i32
    %c0_i32_1 = arith.constant 0 : i32
    return %c0_i32, %c0_i32_0 : i32, i32
  }
  func.func @transform_8(%arg0: i32) -> (i32, i32) {
    %c0_i32 = arith.constant 0 : i32
    %c0_i32_0 = arith.constant 0 : i32
    %c0_i32_1 = arith.constant 0 : i32
    return %c0_i32, %c0_i32_0 : i32, i32
  }
  func.func @transform_9(%arg0: i32) -> (i32, i32) {
    %c0_i32 = arith.constant 0 : i32
    %c0_i32_0 = arith.constant 0 : i32
    %c0_i32_1 = arith.constant 0 : i32
    return %c0_i32, %c0_i32_0 : i32, i32
  }
  func.func @transform_10(%arg0: i32) -> (i32, i32) {
    %c0_i32 = arith.constant 0 : i32
    %c0_i32_0 = arith.constant 0 : i32
    %c0_i32_1 = arith.constant 0 : i32
    return %c0_i32, %c0_i32_0 : i32, i32
  }
  func.func @transform_11(%arg0: i32) -> (i32, i32) {
    %c0_i32 = arith.constant 0 : i32
    %c0_i32_0 = arith.constant 0 : i32
    %c0_i32_1 = arith.constant 0 : i32
    return %c0_i32, %c0_i32_0 : i32, i32
  }
  func.func @transform_12(%arg0: i32) -> (i32, i32) {
    %c0_i32 = arith.constant 0 : i32
    %c0_i32_0 = arith.constant 0 : i32
    %c0_i32_1 = arith.constant 0 : i32
    return %c0_i32, %c0_i32_0 : i32, i32
  }
  func.func @transform_13(%arg0: i32) -> (i32, i32) {
    %c0_i32 = arith.constant 0 : i32
    %c0_i32_0 = arith.constant 0 : i32
    %c0_i32_1 = arith.constant 0 : i32
    return %c0_i32, %c0_i32_0 : i32, i32
  }
  func.func @transform_14(%arg0: i32) -> (i32, i32) {
    %c0_i32 = arith.constant 0 : i32
    %c0_i32_0 = arith.constant 0 : i32
    %c0_i32_1 = arith.constant 0 : i32
    return %c0_i32, %c0_i32_0 : i32, i32
  }
  func.func @transform_15(%arg0: i32) -> (i32, i32) {
    %c0_i32 = arith.constant 0 : i32
    %c0_i32_0 = arith.constant 0 : i32
    %c0_i32_1 = arith.constant 0 : i32
    return %c0_i32, %c0_i32_0 : i32, i32
  }
  func.func @transform_16(%arg0: i32) -> (i32, i32, i32) {
    %c0_i32 = arith.constant 0 : i32
    %c0_i32_0 = arith.constant 0 : i32
    %c0_i32_1 = arith.constant 0 : i32
    %c0_i32_2 = arith.constant 0 : i32
    return %c0_i32, %c0_i32_0, %c0_i32_1 : i32, i32, i32
  }
  func.func @transform_17(%arg0: i32) -> (i32, i32) {
    %c0_i32 = arith.constant 0 : i32
    %c0_i32_0 = arith.constant 0 : i32
    %c0_i32_1 = arith.constant 0 : i32
    return %c0_i32, %c0_i32_0 : i32, i32
  }
  func.func @transform_18(%arg0: i32) -> (i32, i32) {
    %c0_i32 = arith.constant 0 : i32
    %c0_i32_0 = arith.constant 0 : i32
    %c0_i32_1 = arith.constant 0 : i32
    return %c0_i32, %c0_i32_0 : i32, i32
  }
  func.func @transform_19(%arg0: i32) -> (i32, i32, i32) {
    %c0_i32 = arith.constant 0 : i32
    %c0_i32_0 = arith.constant 0 : i32
    %c0_i32_1 = arith.constant 0 : i32
    %c0_i32_2 = arith.constant 0 : i32
    return %c0_i32, %c0_i32_0, %c0_i32_1 : i32, i32, i32
  }
  func.func @transform_20(%arg0: i32) -> (i32, i32) {
    %c0_i32 = arith.constant 0 : i32
    %c0_i32_0 = arith.constant 0 : i32
    %c0_i32_1 = arith.constant 0 : i32
    return %c0_i32, %c0_i32_0 : i32, i32
  }
  func.func @transform_21(%arg0: i32) -> (i32, i32) {
    %c0_i32 = arith.constant 0 : i32
    %c0_i32_0 = arith.constant 0 : i32
    %c0_i32_1 = arith.constant 0 : i32
    return %c0_i32, %c0_i32_0 : i32, i32
  }
  func.func @transform_22(%arg0: i32) -> (i32, i32, i32) {
    %c0_i32 = arith.constant 0 : i32
    %c0_i32_0 = arith.constant 0 : i32
    %c0_i32_1 = arith.constant 0 : i32
    return %arg0, %c0_i32, %c0_i32_0 : i32, i32, i32
  }
}

</mosaic_0001>

<bundles_post_ra>
// kernel: attention_module_forward.1
= control target key start
LH: loop header
LB: loop body
LE: loop exit
PB: predicated region body
PF: predicated region fallthrough
CT: control target
= control target key end

     0   :  { %s6296_s0 = inlined_call_operand.vmem [shape: f32[2,8,64], index: 0, kind: input, shape index: {}]   ;;  %s6297_s1 = inlined_call_operand.vmem [shape: f32[8,64,64], index: 1, kind: input, shape index: {}]   ;;  %s6298_s2 = inlined_call_operand.vmem [shape: f32[8,9], index: 2, kind: input, shape index: {}]   ;;  %s6299_s3 = inlined_call_operand.vmem [shape: f32[8,1], index: 3, kind: input, shape index: {}]   ;;  %s6300_s4 = inlined_call_operand.vmem [shape: f32[32,8], index: 4, kind: input, shape index: {}]   ;;  %s6301_s5 = inlined_call_operand.vmem [shape: f32[32,1], index: 5, kind: input, shape index: {}]   ;;  %s6302_s6 = inlined_call_operand.vmem [shape: f32[8,9], index: 6, kind: input, shape index: {}]   ;;  %s6303_s7 = inlined_call_operand.vmem [shape: f32[8,1], index: 7, kind: input, shape index: {}]   ;;  %s6304_s8 = inlined_call_operand.vmem [shape: f32[32,8], index: 8, kind: input, shape index: {}]   ;;  %s6305_s9 = inlined_call_operand.vmem [shape: f32[32,1], index: 9, kind: input, shape index: {}]   ;;  %s6306_s10 = inlined_call_operand.vmem [shape: f32[8,9], index: 10, kind: input, shape index: {}]   ;;  %s6307_s11 = inlined_call_operand.vmem [shape: f32[8,1], index: 11, kind: input, shape index: {}]   ;;  %s6308_s12 = inlined_call_operand.vmem [shape: f32[8,8], index: 12, kind: input, shape index: {}]   ;;  %s6309_s13 = inlined_call_operand.vmem [shape: f32[8,1], index: 13, kind: input, shape index: {}]   ;;  %s6310_s14 = inlined_call_operand.vmem [shape: f32[64,256], index: 14, kind: input, shape index: {}]   ;;  %s6311_s15 = inlined_call_operand.vmem [shape: f32[32,256], index: 15, kind: input, shape index: {}]   ;;  %s6312_s16 = inlined_call_operand.vmem [shape: f32[3,256,256], index: 16, kind: input, shape index: {}]   ;;  %s6313_s17 = inlined_call_operand.vmem [shape: f32[1,256], index: 17, kind: input, shape index: {}]   ;;  %s6314_s18 = inlined_call_operand.vmem [shape: f32[256,256], index: 18, kind: input, shape index: {}]   ;;  %s6315_s19 = inlined_call_operand.vmem [shape: f32[3,256,64], index: 19, kind: input, shape index: {}]   ;;  %s6316_s20 = inlined_call_operand.vmem [shape: f32[64,64], index: 20, kind: input, shape index: {}]   ;;  %s6317_s21 = inlined_call_operand.vmem [shape: f32[64,64], index: 21, kind: input, shape index: {}]   ;;  %s6318_s22 = inlined_call_operand.vmem [shape: f32[2,8,64], index: 22, kind: output, shape index: {}]  }
   0x1   :  { %6322 = sst [smem:[#allocation19_spill]] %s6296_s0 }
   0x2   :  { %6323 = sst [smem:[#allocation20_spill]] %s6297_s1 }
   0x3   :  { %6324 = sst [smem:[#allocation21_spill]] %s6298_s2 }
   0x4   :  { %6325 = sst [smem:[#allocation22_spill]] %s6299_s3  ;;  %s4012_s3 = smov 0  }
   0x5   :  { %6326 = sst [smem:[#allocation23_spill]] %s6300_s4 }
   0x6   :  { %6327 = sst [smem:[#allocation24_spill]] %s6301_s5 }
   0x7   :  { %6328 = sst [smem:[#allocation25_spill]] %s6302_s6 }
   0x8   :  { %6329 = sst [smem:[#allocation26_spill]] %s6303_s7 }
   0x9 LB: > { %s3394_s28 = sadd.s32 4294967295, %s3886_s3   ;;  %p3398_p0 = scmp.ge.s32.totalorder %s3886_s3, 1  ;;  %s3886_s3 = sphi %s4012_s3, %s32_s3  }
   0xa   : > { %p611_p1 = scmp.lt.s32.totalorder %s3886_s3, 3 }
   0xc   : > { %p612_p2 = pnand %p3398_p0, %p611_p1 }
   0xe   : > { %615 = sbr.rel (%p612_p2) target bundleno = 2147 (0x863), region = 108 }
  0x13   : > { %s6330_s4 = sld [smem:[#allocation20_spill]]  ;;  %v3888_v3 = vmov 3   ;;  %v3889_v4 = vmov 1   ;;  %v3890_v7 = vmov 0   ;;  %p4063_p3 = scmp.lt.s32.totalorder %s3394_s28, 1  ;;  %v3891_v26 = vmov 4  }
  0x14   : > { %3771 = vset.pattern.permute.xlu2 %v3888_v3  ;;  %3769 = vset.pattern.permute.xlu1 %v3889_v4  ;;  %s6331_s2 = sld [smem:[#allocation25_spill]]  ;;  %v3892_v27 = vmov 2   ;;  %vm688_vm0 = vcmask 523264   ;;  %v3893_v48 = vmov 5   ;;  %v3894_v50 = vmov 7  }
  0x15   : > { %3768 = vset.pattern.permute.xlu0 %v3890_v7  ;;  %s6374_s28 = smov (!%p4063_p3, %s3394_s28), 1  ;;  %s6333_s7 = sld [smem:[#allocation26_spill]]  ;;  %v3895_v51 = vmov 6   ;;  %vm1129_vm1 = vcmask 64512   ;;  %vm1404_vm2 = vcmask 261120  }
  0x16   : > { %s3399_s30 = sshll.u32 %s6374_s28, 3  ;;  %s6334_s5 = sld [smem:[#allocation19_spill]] }
  0x17   : > { %s6335_s6 = sld [smem:[#allocation22_spill]]  ;;  %s678_s29 = scalar_lea.vmem %s6318_s22, %s3399_s30 }
  0x19   : > { %v687_v0 = vld [vmem:[%s6330_s4 + $0x38] sm:$0xff]  ;;  %v686_v8 = vld [vmem:[%s6330_s4 + $0x30] sm:$0xff]  ;;  %v685_v12 = vld [vmem:[%s6330_s4 + $0x28] sm:$0xff] }
  0x1a   : > { %v3409_v1 = vld [vmem:[%s6330_s4 + $0x78] sm:$0xff]  ;;  %v4037_v6 = vld [vmem:[%s6331_s2] sm:$0xff]  ;;  %700 = vmatpush.msra.mxu0 %v687_v0  ;;  %v3408_v9 = vld [vmem:[%s6330_s4 + $0x70] sm:$0xff]  ;;  %s6337_s2 = sld [smem:[#allocation24_spill]] }
  0x1b   : > { %v3418_v2 = vld [vmem:[%s6330_s4 + $0xb8] sm:$0xff]  ;;  %729 = vmatpush.msra.mxu1 %v3409_v1  ;;  %1000 = vperm.xlu2 %3771, %v4037_v6   ;;  %v3417_v10 = vld [vmem:[%s6330_s4 + $0xb0] sm:$0xff]  ;;  %v3407_v13 = vld [vmem:[%s6330_s4 + $0x68] sm:$0xff] }
  0x1c   : > { %v3427_v5 = vld [vmem:[%s6330_s4 + $0xf8] sm:$0xff]  ;;  %758 = vmatpush.msra.mxu2 %v3418_v2  ;;  %v3426_v11 = vld [vmem:[%s6330_s4 + $0xf0] sm:$0xff]  ;;  %964 = vperm.xlu1 %3769, %v4037_v6   ;;  %v3416_v14 = vld [vmem:[%s6330_s4 + $0xa8] sm:$0xff]  ;;  %s674_s24 = scalar_lea.vmem %s6334_s5, %s3399_s30  ;;  %s6336_s5 = sld [smem:[#allocation21_spill]] }
  0x1d   : > { %787 = vmatpush.msra.mxu3 %v3427_v5  ;;  %935 = vperm.xlu0 %3768, %v4037_v6   ;;  %v3425_v15 = vld [vmem:[%s6330_s4 + $0xe8] sm:$0xff]  ;;  %v684_v16 = vld [vmem:[%s6330_s4 + $0x20] sm:$0xff]  ;;  %v683_v20 = vld [vmem:[%s6330_s4 + $0x18] sm:$0xff] }
  0x1e   : > { %701 = vmatpush.msra.mxu0 %v686_v8  ;;  %730 = vmatpush.msra.mxu1 %v3408_v9  ;;  %v3406_v17 = vld [vmem:[%s6330_s4 + $0x60] sm:$0xff]  ;;  %v3405_v21 = vld [vmem:[%s6330_s4 + $0x58] sm:$0xff]  ;;  %v682_v25 = vld [vmem:[%s6330_s4 + $0x10] sm:$0xff] }
  0x1f   : > { %759 = vmatpush.msra.mxu2 %v3417_v10  ;;  %788 = vmatpush.msra.mxu3 %v3426_v11  ;;  %v3415_v18 = vld [vmem:[%s6330_s4 + $0xa0] sm:$0xff]  ;;  %v3414_v22 = vld [vmem:[%s6330_s4 + $0x98] sm:$0xff]  ;;  %v3404_v28 = vld [vmem:[%s6330_s4 + $0x50] sm:$0xff]  ;;  %v3896_v11 = vmov 8  }
  0x20   : > { %702 = vmatpush.msra.mxu0 %v685_v12  ;;  %731 = vmatpush.msra.mxu1 %v3407_v13  ;;  %v3424_v19 = vld [vmem:[%s6330_s4 + $0xe0] sm:$0xff]  ;;  %v3423_v23 = vld [vmem:[%s6330_s4 + $0xd8] sm:$0xff]  ;;  %v3413_v29 = vld [vmem:[%s6330_s4 + $0x90] sm:$0xff] }
  0x21   : > { %760 = vmatpush.msra.mxu2 %v3416_v14  ;;  %789 = vmatpush.msra.mxu3 %v3425_v15  ;;  %v919_v24 = vld [vmem:[%s6333_s7] sm:$0xff]  ;;  %v3422_v30 = vld [vmem:[%s6330_s4 + $0xd0] sm:$0xff]  ;;  %v681_v31 = vld [vmem:[%s6330_s4 + $0x8] sm:$0xff] }
  0x22   : > { %703 = vmatpush.msra.mxu0 %v684_v16  ;;  %732 = vmatpush.msra.mxu1 %v3406_v17  ;;  %v3403_v32 = vld [vmem:[%s6330_s4 + $0x48] sm:$0xff]  ;;  %v680_v35 = vld [vmem:[%s6330_s4] sm:$0xff]  ;;  %v3436_v40 = vld [vmem:[%s6330_s4 + $0x138] sm:$0xff] }
  0x23   : > { %761 = vmatpush.msra.mxu2 %v3415_v18  ;;  %790 = vmatpush.msra.mxu3 %v3424_v19  ;;  %v3412_v33 = vld [vmem:[%s6330_s4 + $0x88] sm:$0xff]  ;;  %v3402_v36 = vld [vmem:[%s6330_s4 + $0x40] sm:$0xff]  ;;  %v3445_v41 = vld [vmem:[%s6330_s4 + $0x178] sm:$0xff] }
  0x24   : > { %704 = vmatpush.msra.mxu0 %v683_v20  ;;  %733 = vmatpush.msra.mxu1 %v3405_v21  ;;  %v3421_v34 = vld [vmem:[%s6330_s4 + $0xc8] sm:$0xff]  ;;  %v3411_v37 = vld [vmem:[%s6330_s4 + $0x80] sm:$0xff]  ;;  %v3454_v42 = vld [vmem:[%s6330_s4 + $0x1b8] sm:$0xff] }
  0x25   : > { %762 = vmatpush.msra.mxu2 %v3414_v22  ;;  %791 = vmatpush.msra.mxu3 %v3423_v23  ;;  %v3420_v38 = vld [vmem:[%s6330_s4 + $0xc0] sm:$0xff]  ;;  %v3463_v43 = vld [vmem:[%s6330_s4 + $0x1f8] sm:$0xff]  ;;  %v3435_v44 = vld [vmem:[%s6330_s4 + $0x130] sm:$0xff] }
  0x26   : > { %3772 = vset.pattern.permute.xlu2 %v3891_v26  ;;  %3770 = vset.pattern.permute.xlu1 %v3892_v27  ;;  %v4152_v39 = vld [vmem:[%s674_s24] sm:$0xff]  ;;  %v3444_v45 = vld [vmem:[%s6330_s4 + $0x170] sm:$0xff]  ;;  %v3434_v49 = vld [vmem:[%s6330_s4 + $0x128] sm:$0xff] }
  0x27   : > { %941 = vperm.xlu0 %3768, %v919_v24   ;;  %1018 = vperm.xlu2 %3772, %v4037_v6   ;;  %v3453_v46 = vld [vmem:[%s6330_s4 + $0x1b0] sm:$0xff]  ;;  %v3443_v52 = vld [vmem:[%s6330_s4 + $0x168] sm:$0xff]  ;;  %v3433_v55 = vld [vmem:[%s6330_s4 + $0x120] sm:$0xff] }
  0x28   : > { %982 = vperm.xlu1 %3770, %v4037_v6   ;;  %705 = vmatpush.msra.mxu0 %v682_v25  ;;  %v3462_v47 = vld [vmem:[%s6330_s4 + $0x1f0] sm:$0xff]  ;;  %v3452_v53 = vld [vmem:[%s6330_s4 + $0x1a8] sm:$0xff]  ;;  %v3442_v56 = vld [vmem:[%s6330_s4 + $0x160] sm:$0xff] }
  0x29   : > { %734 = vmatpush.msra.mxu1 %v3404_v28  ;;  %763 = vmatpush.msra.mxu2 %v3413_v29  ;;  %v3461_v54 = vld [vmem:[%s6330_s4 + $0x1e8] sm:$0xff]  ;;  %v3451_v57 = vld [vmem:[%s6330_s4 + $0x1a0] sm:$0xff]  ;;  %v3432_v59 = vld [vmem:[%s6330_s4 + $0x118] sm:$0xff] }
  0x2a   : > { %792 = vmatpush.msra.mxu3 %v3422_v30  ;;  %706 = vmatpush.msra.mxu0 %v681_v31  ;;  %v3460_v58 = vld [vmem:[%s6330_s4 + $0x1e0] sm:$0xff]  ;;  %v3441_v60 = vld [vmem:[%s6330_s4 + $0x158] sm:$0xff]  ;;  %v3431_v63 = vld [vmem:[%s6330_s4 + $0x110] sm:$0xff] }
  0x2b   : > { %735 = vmatpush.msra.mxu1 %v3403_v32  ;;  %764 = vmatpush.msra.mxu2 %v3412_v33  ;;  %v3450_v61 = vld [vmem:[%s6330_s4 + $0x198] sm:$0xff]  ;;  %v3440_v0 = vld [vmem:[%s6330_s4 + $0x150] sm:$0xff]  ;;  %v918_v5 = vld [vmem:[%s6335_s6] sm:$0xff]  ;;  %s6338_s6 = sld [smem:[#allocation23_spill]] }
  0x2c   : > { %793 = vmatpush.msra.mxu3 %v3421_v34  ;;  %707 = vmatpush.msra.mxu0 %v680_v35  ;;  %v3459_v62 = vld [vmem:[%s6330_s4 + $0x1d8] sm:$0xff]  ;;  %v3449_v1 = vld [vmem:[%s6330_s4 + $0x190] sm:$0xff]  ;;  %v3430_v8 = vld [vmem:[%s6330_s4 + $0x108] sm:$0xff] }
  0x2d   : > { %736 = vmatpush.msra.mxu1 %v3402_v36  ;;  %765 = vmatpush.msra.mxu2 %v3411_v37  ;;  %v3458_v2 = vld [vmem:[%s6330_s4 + $0x1d0] sm:$0xff]  ;;  %v3439_v9 = vld [vmem:[%s6330_s4 + $0x148] sm:$0xff]  ;;  %v915_v13 = vld [vmem:[%s6336_s5] sm:$0xff] }
  0x2e   : > { %794 = vmatpush.msra.mxu3 %v3420_v38  ;;  %3401 = vmatmul.msk.f32.vlgmr.msra.gmra.mxu0 %vm688_vm0, %v4152_v39  ;;  %v3448_v10 = vld [vmem:[%s6330_s4 + $0x188] sm:$0xff]  ;;  %v3429_v14 = vld [vmem:[%s6330_s4 + $0x100] sm:$0xff] }
  0x2f   : > { %3410 = vmatmul.msk.f32.vlgmr.msra.gmra.mxu1 %vm688_vm0, %v4152_v39  ;;  %3419 = vmatmul.msk.f32.vlgmr.msra.gmra.mxu2 %vm688_vm0, %v4152_v39  ;;  %v3457_v12 = vld [vmem:[%s6330_s4 + $0x1c8] sm:$0xff]  ;;  %v3438_v15 = vld [vmem:[%s6330_s4 + $0x140] sm:$0xff] }
  0x30   : > { %3428 = vmatmul.msk.f32.vlgmr.msra.gmra.mxu3 %vm688_vm0, %v4152_v39  ;;  %816 = vmatpush.msrb.mxu0 %v3436_v40  ;;  %v3447_v16 = vld [vmem:[%s6330_s4 + $0x180] sm:$0xff] }
  0x31   : > { %845 = vmatpush.msrb.mxu1 %v3445_v41  ;;  %874 = vmatpush.msrb.mxu2 %v3454_v42  ;;  %v3456_v17 = vld [vmem:[%s6330_s4 + $0x1c0] sm:$0xff] }
  0x32   : > { %903 = vmatpush.msrb.mxu3 %v3463_v43  ;;  %3773 = vset.pattern.permute.xlu0 %v3893_v48  ;;  %v917_v18 = vld [vmem:[%s6306_s10] sm:$0xff] }
  0x33   : > { %817 = vmatpush.msrb.mxu0 %v3435_v44  ;;  %846 = vmatpush.msrb.mxu1 %v3444_v45  ;;  %v1105_v37 = vld [vmem:[%s6337_s2] sm:$0xff] }
  0x34   : > { %875 = vmatpush.msrb.mxu2 %v3453_v46  ;;  %904 = vmatpush.msrb.mxu3 %v3462_v47  ;;  %v1176_v46 = vld [vmem:[%s6305_s9 + $0x8] sm:$0xff] }
  0x35   : > { %3775 = vset.pattern.permute.xlu2 %v3894_v50  ;;  %3774 = vset.pattern.permute.xlu1 %v3895_v51 }
  0x36   : > { %1036 = vperm.xlu0 %3773, %v4037_v6   ;;  %1072 = vperm.xlu2 %3775, %v4037_v6  }
  0x37   : > { %1054 = vperm.xlu1 %3774, %v4037_v6   ;;  %818 = vmatpush.msrb.mxu0 %v3434_v49 }
  0x38   : > { %847 = vmatpush.msrb.mxu1 %v3443_v52  ;;  %876 = vmatpush.msrb.mxu2 %v3452_v53  ;;  %v1108_v53 = vld [vmem:[%s6337_s2 + $0x18] sm:$0xff] }
  0x39   : > { %905 = vmatpush.msrb.mxu3 %v3461_v54  ;;  %819 = vmatpush.msrb.mxu0 %v3433_v55 }
  0x3a   : > { %848 = vmatpush.msrb.mxu1 %v3442_v56  ;;  %877 = vmatpush.msrb.mxu2 %v3451_v57 }
  0x3b   : > { %906 = vmatpush.msrb.mxu3 %v3460_v58  ;;  %820 = vmatpush.msrb.mxu0 %v3432_v59 }
  0x3c   : > { %849 = vmatpush.msrb.mxu1 %v3441_v60  ;;  %878 = vmatpush.msrb.mxu2 %v3450_v61 }
  0x3d   : > { %907 = vmatpush.msrb.mxu3 %v3459_v62  ;;  %821 = vmatpush.msrb.mxu0 %v3431_v63 }
  0x3e   : > { %850 = vmatpush.msrb.mxu1 %v3440_v0  ;;  %879 = vmatpush.msrb.mxu2 %v3449_v1  ;;  %v1107_v0 = vld [vmem:[%s6337_s2 + $0x10] sm:$0xff]  ;;  %v1175_v1 = vld [vmem:[%s6305_s9] sm:$0xff] }
  0x3f   : > { %908 = vmatpush.msrb.mxu3 %v3458_v2  ;;  %3778 = vset.pattern.permute.xlu0 %v3890_v7 }
  0x40   : > { %3777 = vset.pattern.permute.xlu2 %v3890_v7  ;;  %3776 = vset.pattern.permute.xlu1 %v3896_v11 }
  0x41   : > { %929 = vperm.xlu0 %3778, %v918_v5   ;;  %822 = vmatpush.msrb.mxu0 %v3430_v8 }
  0x42   : > { %851 = vmatpush.msrb.mxu1 %v3439_v9  ;;  %880 = vmatpush.msrb.mxu2 %v3448_v10 }
  0x43   : > { %909 = vmatpush.msrb.mxu3 %v3457_v12  ;;  %1090 = vperm.xlu1 %3776, %v4037_v6   ;;  %v920_v6 = vld [vmem:[%s6307_s11] sm:$0xff] }
  0x44   : > { %923 = vperm.xlu2 %3777, %v915_v13   ;;  %823 = vmatpush.msrb.mxu0 %v3429_v14  ;;  %v1171_v14 = vld [vmem:[%s6304_s8] sm:$0xff] }
  0x45   : > { %852 = vmatpush.msrb.mxu1 %v3438_v15  ;;  %881 = vmatpush.msrb.mxu2 %v3447_v16 }
  0x46   : > { %910 = vmatpush.msrb.mxu3 %v3456_v17  ;;  %3437 = vmatmul.msk.f32.vlgmr.msrb.gmra.mxu0 %vm688_vm0, %v4152_v39  ;;  %v1178_v17 = vld [vmem:[%s6305_s9 + $0x18] sm:$0xff] }
  0x47   : > { %3446 = vmatmul.msk.f32.vlgmr.msrb.gmra.mxu1 %vm688_vm0, %v4152_v39  ;;  %3455 = vmatmul.msk.f32.vlgmr.msrb.gmra.mxu2 %vm688_vm0, %v4152_v39 }
  0x48   : > { %3464 = vmatmul.msk.f32.vlgmr.msrb.gmra.mxu3 %vm688_vm0, %v4152_v39 }
  0x49   : > { %3783 = vset.pattern.permute.xlu0 %v3893_v48 }
  0x4a   : > { %1030 = vperm.xlu0 %3783, %v915_v13  }
  0x4b   : > { %3779 = vset.pattern.permute.xlu1 %v3889_v4 }
  0x4c   : > { %3780 = vset.pattern.permute.xlu2 %v3892_v27  ;;  %958 = vperm.xlu1 %3779, %v915_v13  }
  0x4d   : > { %976 = vperm.xlu2 %3780, %v915_v13  }
  0x52   : > { %3788 = vset.pattern.permute.xlu0 %v3890_v7 }
  0x53   : > { %953 = vperm.xlu0 %3788, %v920_v6  }
  0x54   : > { %3781 = vset.pattern.permute.xlu1 %v3888_v3 }
  0x55   : > { %3782 = vset.pattern.permute.xlu2 %v3891_v26  ;;  %994 = vperm.xlu1 %3781, %v915_v13  }
  0x56   : > { %1012 = vperm.xlu2 %3782, %v915_v13  }
  0x5b   : > { %3793 = vset.pattern.permute.xlu0 %v3893_v48 }
  0x5c   : > { %1042 = vperm.xlu0 %3793, %v917_v18  }
  0x5d   : > { %3784 = vset.pattern.permute.xlu1 %v3895_v51 }
  0x5e   : > { %3785 = vset.pattern.permute.xlu2 %v3894_v50  ;;  %1048 = vperm.xlu1 %3784, %v915_v13  }
  0x5f   : > { %1066 = vperm.xlu2 %3785, %v915_v13  }
  0x64   : > { %3798 = vset.pattern.permute.xlu0 %v3890_v7 }
  0x65   : > { %1186 = vperm.xlu0 %3798, %v1176_v46  }
  0x66   : > { %3786 = vset.pattern.permute.xlu1 %v3896_v11 }
  0x67   : > { %3787 = vset.pattern.permute.xlu2 %v3890_v7  ;;  %1084 = vperm.xlu1 %3786, %v915_v13  }
  0x68   : > { %947 = vperm.xlu2 %3787, %v917_v18  }
  0x6d   : > { %1121 = vperm.xlu0 %3798, %v1107_v0  }
  0x6f   : > { %3789 = vset.pattern.permute.xlu1 %v3889_v4 }
  0x70   : > { %3790 = vset.pattern.permute.xlu2 %v3892_v27  ;;  %970 = vperm.xlu1 %3789, %v917_v18   ;;  %v1177_v27 = vld [vmem:[%s6305_s9 + $0x10] sm:$0xff] }
  0x71   : > { %988 = vperm.xlu2 %3790, %v917_v18  }
  0x75   : > { %v1001_v4 = vpop.permute.xlu2 %1000 }
  0x78   : > { %3791 = vset.pattern.permute.xlu1 %v3888_v3 }
  0x79   : > { %3792 = vset.pattern.permute.xlu2 %v3891_v26  ;;  %1006 = vperm.xlu1 %3791, %v917_v18  }
  0x7a   : > { %1024 = vperm.xlu2 %3792, %v917_v18  }
  0x81   : > { %3794 = vset.pattern.permute.xlu1 %v3895_v51  ;;  %v1019_v20 = vpop.permute.xlu2 %1018 }
  0x82   : > { %3795 = vset.pattern.permute.xlu2 %v3894_v50  ;;  %1060 = vperm.xlu1 %3794, %v917_v18   ;;  %v1021_v47 = vmul.f32 %v1019_v20, %v4152_v39 }
  0x83   : > { %1078 = vperm.xlu2 %3795, %v917_v18  }
  0x8a   : > { %3796 = vset.pattern.permute.xlu1 %v3896_v11 }
  0x8b   : > { %1096 = vperm.xlu1 %3796, %v917_v18   ;;  %3797 = vset.pattern.permute.xlu2 %v3890_v7 }
  0x8c   : > { %1181 = vperm.xlu2 %3797, %v1175_v1   ;;  %v1280_v1 = vld [vmem:[%s6310_s14 + $0x50] sm:$0xff] }
  0x8e   : > { %v965_v19 = vpop.permute.xlu1 %964 }
  0x8f   : > { %v936_v21 = vpop.permute.xlu0 %935 }
  0x90   : > { %v1073_v22 = vpop.permute.xlu2 %1072 }
  0x93   : > { %3799 = vset.pattern.permute.xlu1 %v3890_v7 }
  0x94   : > { %1191 = vperm.xlu1 %3799, %v1177_v27   ;;  %1196 = vperm.xlu2 %3797, %v1178_v17   ;;  %v1271_v17 = vld [vmem:[%s6310_s14 + $0x8] sm:$0xff] }
  0x99   : > { %v942_v24 = vpop.permute.xlu0 %941 }
  0x9a   : > { %v983_v3 = vpop.permute.xlu1 %982 }
  0x9c   : > { %1111 = vperm.xlu1 %3799, %v1105_v37  }
  0x9e   : > { %v924_v28 = vpop.permute.xlu2 %923 }
  0xa4   : > { %1126 = vperm.xlu1 %3799, %v1108_v53  }
  0xa7   : > { %v977_v41 = vpop.permute.xlu2 %976 }
  0xa8   : > { %v1037_v32 = vpop.permute.xlu0 %1036 }
  0xa9   : > { %v1055_v23 = vpop.permute.xlu1 %1054 }
  0xab   : > { %v4306_v25 = vpop.f32.mrf.mxu0 }
  0xac   : > { %v938_v26 = vmul.f32 %v936_v21, %v4306_v25  ;;  %v4312_v7 = vpop.f32.mrf.mxu1  ;;  %v926_v43 = vmul.f32 %v924_v28, %v4306_v25  ;;  %v1172_v21 = vld [vmem:[%s6304_s8 + $0x8] sm:$0xff] }
  0xad   : > { %v967_v33 = vmul.f32 %v965_v19, %v4312_v7 }
  0xae   : > { %v944_v31 = vadd.f32 %v942_v24, %v938_v26 }
  0xb0   : > { %v968_v35 = vadd.f32 %v967_v33, %v944_v31  ;;  %v1013_v60 = vpop.permute.xlu2 %1012  ;;  %v1102_v31 = vld [vmem:[%s6338_s6 + $0x8] sm:$0xff]  ;;  %v1173_v33 = vld [vmem:[%s6304_s8 + $0x10] sm:$0xff] }
  0xb1   : > { %v1015_v9 = vmul.f32 %v1013_v60, %v4152_v39 }
  0xb2   : > { %v4314_v30 = vpop.f32.mrf.mxu2 }
  0xb3   : > { %v985_v34 = vmul.f32 %v983_v3, %v4314_v30  ;;  %v4318_v36 = vpop.f32.mrf.mxu3  ;;  %v930_v48 = vpop.permute.xlu0 %929  ;;  %v979_v58 = vmul.f32 %v977_v41, %v4314_v30 }
  0xb4   : > { %v1003_v42 = vmul.f32 %v1001_v4, %v4318_v36  ;;  %v932_v50 = vadd.f32 %v930_v48, %v926_v43 }
  0xb5   : > { %v1091_v29 = vpop.permute.xlu1 %1090  ;;  %v986_v38 = vadd.f32 %v985_v34, %v968_v35  ;;  %v1103_v35 = vld [vmem:[%s6338_s6 + $0x10] sm:$0xff] }
  0xb7   : > { %v1004_v44 = vadd.f32 %v1003_v42, %v986_v38  ;;  %v1174_v42 = vld [vmem:[%s6304_s8 + $0x18] sm:$0xff] }
  0xb9   : > { %v1022_v52 = vadd.f32 %v1021_v47, %v1004_v44  ;;  %v1067_v19 = vpop.permute.xlu2 %1066 }
  0xbc   : > { %v1031_v6 = vpop.permute.xlu0 %1030 }
  0xbe   : > { %v959_v40 = vpop.permute.xlu1 %958 }
  0xbf   : > { %v961_v45 = vmul.f32 %v959_v40, %v4312_v7 }
  0xc1   : > { %v962_v54 = vadd.f32 %v961_v45, %v932_v50 }
  0xc3   : > { %v4330_v49 = vpop.f32.mrf.mxu0  ;;  %v980_v62 = vadd.f32 %v979_v58, %v962_v54 }
  0xc4   : > { %v1039_v51 = vmul.f32 %v1037_v32, %v4330_v49  ;;  %v4336_v55 = vpop.f32.mrf.mxu1  ;;  %v1033_v18 = vmul.f32 %v1031_v6, %v4330_v49  ;;  %v948_v32 = vpop.permute.xlu2 %947 }
  0xc5   : > { %v1057_v61 = vmul.f32 %v1055_v23, %v4336_v55  ;;  %v1106_v23 = vld [vmem:[%s6337_s2 + $0x8] sm:$0xff]  ;;  %v954_v37 = vpop.permute.xlu0 %953  ;;  %v950_v38 = vmul.f32 %v948_v32, %v4306_v25  ;;  %v1104_v25 = vld [vmem:[%s6338_s6 + $0x18] sm:$0xff] }
  0xc6   : > { %v1040_v56 = vadd.f32 %v1039_v51, %v1022_v52  ;;  %1116 = vperm.xlu2 %3797, %v1106_v23  }
  0xc7   : > { %v995_v57 = vpop.permute.xlu1 %994  ;;  %v956_v43 = vadd.f32 %v954_v37, %v950_v38 }
  0xc8   : > { %v997_v59 = vmul.f32 %v995_v57, %v4318_v36  ;;  %v1058_v2 = vadd.f32 %v1057_v61, %v1040_v56 }
  0xca   : > { %v4341_v63 = vpop.f32.mrf.mxu2  ;;  %v998_v10 = vadd.f32 %v997_v59, %v980_v62 }
  0xcb   : > { %v1075_v5 = vmul.f32 %v1073_v22, %v4341_v63  ;;  %v4350_v8 = vpop.f32.mrf.mxu3  ;;  %v1069_v22 = vmul.f32 %v1067_v19, %v4341_v63 }
  0xcc   : > { %v1093_v12 = vmul.f32 %v1091_v29, %v4350_v8  ;;  %v1016_v15 = vadd.f32 %v1015_v9, %v998_v10  ;;  %v1101_v29 = vld [vmem:[%s6338_s6] sm:$0xff]  ;;  %v989_v41 = vpop.permute.xlu2 %988  ;;  %v1276_v10 = vld [vmem:[%s6310_s14 + $0x30] sm:$0xff] }
  0xcd   : > { %v1076_v11 = vadd.f32 %v1075_v5, %v1058_v2  ;;  %v991_v46 = vmul.f32 %v989_v41, %v4314_v30  ;;  %v1281_v2 = vld [vmem:[%s6310_s14 + $0x58] sm:$0xff]  ;;  %v1278_v5 = vld [vmem:[%s6310_s14 + $0x40] sm:$0xff] }
  0xce   : > { %v1034_v20 = vadd.f32 %v1033_v18, %v1016_v15  ;;  %v1043_v52 = vpop.permute.xlu0 %1042  ;;  %v1240_v9 = vld [vmem:[%s6308_s12] sm:$0xff]  ;;  %v1273_v15 = vld [vmem:[%s6310_s14 + $0x18] sm:$0xff] }
  0xcf   : > { %v1094_v13 = vadd.f32 %v1093_v12, %v1076_v11  ;;  %v1045_v56 = vmul.f32 %v1043_v52, %v4330_v49  ;;  %v1285_v49 = vld [vmem:[%s6310_s14 + $0x78] sm:$0xff]  ;;  %v1274_v12 = vld [vmem:[%s6310_s14 + $0x20] sm:$0xff]  ;;  %v1361_v52 = vld [vmem:[%s6311_s15 + $0x28] sm:$0xff] }
  0xd0   : > { %v1049_v16 = vpop.permute.xlu1 %1048  ;;  %v1277_v11 = vld [vmem:[%s6310_s14 + $0x38] sm:$0xff] }
  0xd1   : > { %1226 = vmatpush.msra.mxu3 %v1094_v13  ;;  %v1051_v4 = vmul.f32 %v1049_v16, %v4336_v55  ;;  %v1275_v13 = vld [vmem:[%s6310_s14 + $0x28] sm:$0xff]  ;;  %v1270_v16 = vld [vmem:[%s6310_s14] sm:$0xff] }
  0xd2   : > { %3469 = vmatmul.msk.f32.vlgmr.msra.gmra.mxu3 %vm1129_vm1, %v1171_v14  ;;  %v1272_v14 = vld [vmem:[%s6310_s14 + $0x10] sm:$0xff] }
  0xd3   : > { %v1052_v3 = vadd.f32 %v1051_v4, %v1034_v20 }
  0xd4   : > { %v1025_v48 = vpop.permute.xlu2 %1024 }
  0xd5   : > { %v1070_v26 = vadd.f32 %v1069_v22, %v1052_v3  ;;  %v1027_v50 = vmul.f32 %v1025_v48, %v4152_v39  ;;  %v1284_v39 = vld [vmem:[%s6310_s14 + $0x70] sm:$0xff] }
  0xd6   : > { %1306 = vmatpush.msrb.mxu3 %v1284_v39  ;;  %v1362_v48 = vld [vmem:[%s6311_s15 + $0x30] sm:$0xff] }
  0xd7   : > { %v1187_v22 = vpop.permute.xlu0 %1186 }
  0xd9   : > { %v1085_v24 = vpop.permute.xlu1 %1084 }
  0xda   : > { %3470 = vmatmul.msk.f32.gmra.mxu3 %vm1129_vm1, %v1172_v21  ;;  %v1087_v27 = vmul.f32 %v1085_v24, %v4350_v8 }
  0xdc   : > { %v1088_v28 = vadd.f32 %v1087_v27, %v1070_v26 }
  0xde   : > { %1157 = vmatpush.msra.mxu0 %v1088_v28  ;;  %3749 = vmatpush.msra.mxu2 %v1088_v28 }
  0xdf   : > { %3465 = vmatmul.msk.f32.vlgmr.msra.gmra.mxu0 %vm1129_vm1, %v1101_v29  ;;  %3466 = vmatmul.msk.f32.vlgmr.msra.gmra.mxu2 %vm1129_vm1, %v1102_v31 }
  0xe2   : > { %3471 = vmatmul.msk.f32.gmra.mxu3 %vm1129_vm1, %v1173_v33  ;;  %v971_v34 = vpop.permute.xlu1 %970 }
  0xe3   : > { %v973_v40 = vmul.f32 %v971_v34, %v4312_v7  ;;  %v1122_v34 = vpop.permute.xlu0 %1121 }
  0xe5   : > { %v974_v44 = vadd.f32 %v973_v40, %v956_v43 }
  0xe7   : > { %3467 = vmatmul.msk.f32.gmra.mxu2 %vm1129_vm1, %v1103_v35  ;;  %v992_v7 = vadd.f32 %v991_v46, %v974_v44 }
  0xea   : > { %3472 = vmatmul.msk.f32.gmra.mxu3 %vm1129_vm1, %v1174_v42 }
  0xeb   : > { %v1007_v45 = vpop.permute.xlu1 %1006 }
  0xec   : > { %v1009_v47 = vmul.f32 %v1007_v45, %v4318_v36  ;;  %v1079_v36 = vpop.permute.xlu2 %1078 }
  0xed   : > { %v1081_v59 = vmul.f32 %v1079_v36, %v4341_v63  ;;  %v1283_v63 = vld [vmem:[%s6310_s14 + $0x68] sm:$0xff]  ;;  %v1359_v36 = vld [vmem:[%s6311_s15 + $0x18] sm:$0xff] }
  0xee   : > { %v1010_v51 = vadd.f32 %v1009_v47, %v992_v7 }
  0xef   : > { %3468 = vmatmul.msk.f32.gmra.mxu2 %vm1129_vm1, %v1104_v25 }
  0xf0   : > { %v1028_v53 = vadd.f32 %v1027_v50, %v1010_v51  ;;  %v1363_v50 = vld [vmem:[%s6311_s15 + $0x38] sm:$0xff]  ;;  %v1360_v51 = vld [vmem:[%s6311_s15 + $0x20] sm:$0xff] }
  0xf2   : > { %v1046_v57 = vadd.f32 %v1045_v56, %v1028_v53 }
  0xf4   : > { %v1061_v54 = vpop.permute.xlu1 %1060  ;;  %v1182_v6 = vpop.permute.xlu2 %1181 }
  0xf5   : > { %v1063_v30 = vmul.f32 %v1061_v54, %v4336_v55  ;;  %v1282_v55 = vld [vmem:[%s6310_s14 + $0x60] sm:$0xff] }
  0xf6   : > { %1307 = vmatpush.msrb.mxu3 %v1282_v55 }
  0xf7   : > { %v1064_v58 = vadd.f32 %v1063_v30, %v1046_v57  ;;  %v1358_v57 = vld [vmem:[%s6311_s15 + $0x10] sm:$0xff] }
  0xf8   : > { %1308 = vmatpush.msrb.mxu3 %v1280_v1 }
  0xf9   : > { %v1082_v61 = vadd.f32 %v1081_v59, %v1064_v58 }
  0xfa   : > { %1309 = vmatpush.msrb.mxu3 %v1278_v5  ;;  %v1614_v5 = vld [vmem:[%s6312_s16 + $0xf0] sm:$0xff] }
  0xfc   : > { %1310 = vmatpush.msrb.mxu3 %v1276_v10  ;;  %v1197_v20 = vpop.permute.xlu2 %1196  ;;  %v1647_v10 = vld [vmem:[%s6312_s16 + $0x1f8] sm:$0xff] }
  0xfd   : > { %v1097_v60 = vpop.permute.xlu1 %1096 }
  0xfe   : > { %v1099_v62 = vmul.f32 %v1097_v60, %v4350_v8  ;;  %v1279_v8 = vld [vmem:[%s6310_s14 + $0x48] sm:$0xff]  ;;  %1311 = vmatpush.msrb.mxu3 %v1274_v12  ;;  %v1356_v60 = vld [vmem:[%s6311_s15] sm:$0xff] }
  0xff   : > { %v1644_v12 = vld [vmem:[%s6312_s16 + $0x1e0] sm:$0xff] }
 0x100   : > { %v1100_v0 = vadd.f32 %v1099_v62, %v1082_v61  ;;  %1312 = vmatpush.msrb.mxu3 %v1272_v14  ;;  %v1357_v61 = vld [vmem:[%s6311_s15 + $0x8] sm:$0xff] }
 0x101   : > { %v1645_v14 = vld [vmem:[%s6312_s16 + $0x1e8] sm:$0xff] }
 0x102   : > { %1265 = vmatpush.msrb.mxu2 %v1100_v0  ;;  %1313 = vmatpush.msrb.mxu3 %v1270_v16 }
 0x103   : > { %3473 = vmatmul.msk.f32.vlgmr.msrb.gmra.mxu2 %vm1129_vm1, %v1240_v9  ;;  %v1615_v9 = vld [vmem:[%s6312_s16 + $0xf8] sm:$0xff] }
 0x104   : > { %1335 = vmatpush.msra.mxu2 %v1285_v49  ;;  %1648 = vmatpush.msra.mxu3 %v1614_v5  ;;  %v1619_v5 = vld [vmem:[%s6312_s16 + $0x118] sm:$0xff] }
 0x106   : > { %1336 = vmatpush.msra.mxu2 %v1283_v63  ;;  %v1192_v18 = vpop.permute.xlu1 %1191 }
 0x108   : > { %1337 = vmatpush.msra.mxu2 %v1281_v2 }
 0x10a   : > { %1338 = vmatpush.msra.mxu2 %v1279_v8  ;;  %v1646_v8 = vld [vmem:[%s6312_s16 + $0x1f0] sm:$0xff] }
 0x10c   : > { %1339 = vmatpush.msra.mxu2 %v1277_v11  ;;  %v1612_v11 = vld [vmem:[%s6312_s16 + $0xe0] sm:$0xff] }
 0x10d   : > { %1649 = vmatpush.msra.mxu3 %v1612_v11  ;;  %v1617_v11 = vld [vmem:[%s6312_s16 + $0x108] sm:$0xff] }
 0x10e   : > { %1340 = vmatpush.msra.mxu2 %v1275_v13  ;;  %v1112_v3 = vpop.permute.xlu1 %1111  ;;  %v1613_v13 = vld [vmem:[%s6312_s16 + $0xe8] sm:$0xff] }
 0x110   : > { %1341 = vmatpush.msra.mxu2 %v1273_v15  ;;  %v1610_v15 = vld [vmem:[%s6312_s16 + $0xd0] sm:$0xff] }
 0x111   : > { %1650 = vmatpush.msra.mxu3 %v1610_v15  ;;  %v3560_v15 = vld [vmem:[%s6312_s16 + $0x3f0] sm:$0xff] }
 0x112   : > { %1342 = vmatpush.msra.mxu2 %v1271_v17  ;;  %v1642_v17 = vld [vmem:[%s6312_s16 + $0x1d0] sm:$0xff] }
 0x114   : > { %1689 = vmatpush.msrb.mxu2 %v1646_v8  ;;  %v1584_v8 = vld [vmem:[%s6312_s16] sm:$0xff] }
 0x116   : > { %v1127_v41 = vpop.permute.xlu1 %1126  ;;  %1690 = vmatpush.msrb.mxu2 %v1644_v12 }
 0x118   : > { %1691 = vmatpush.msrb.mxu2 %v1642_v17  ;;  %v3558_v17 = vld [vmem:[%s6312_s16 + $0x3e0] sm:$0xff] }
 0x120   : > { %v1117_v28 = vpop.permute.xlu2 %1116 }
 0x155   : > { %v1228_v4 = vpop.f32.mrf.mxu3 }
 0x156   : > { %v1229_v19 = vadd.f32 %v1228_v4, %v1182_v6  ;;  %v1611_v6 = vld [vmem:[%s6312_s16 + $0xd8] sm:$0xff]  ;;  %v1608_v4 = vld [vmem:[%s6312_s16 + $0xc0] sm:$0xff] }
 0x157   : > { %1651 = vmatpush.msra.mxu3 %v1608_v4 }
 0x158   : > { %3474 = vmatmul.msk.f32.vlgmr.msrb.gmra.mxu3 %vm688_vm0, %v1229_v19  ;;  %3478 = vmatmul.msk.f32.vlgmr.msra.gmra.mxu2 %vm688_vm0, %v1229_v19  ;;  %v1640_v19 = vld [vmem:[%s6312_s16 + $0x1c0] sm:$0xff] }
 0x159   : > { %1692 = vmatpush.msrb.mxu2 %v1640_v19 }
 0x15c   : > { %v1159_v21 = vpop.f32.mrf.mxu0 }
 0x15d   : > { %v1231_v23 = vpop.f32.mrf.mxu3  ;;  %v1160_v24 = vadd.f32 %v1159_v21, %v1112_v3  ;;  %v1641_v3 = vld [vmem:[%s6312_s16 + $0x1c8] sm:$0xff]  ;;  %v1606_v21 = vld [vmem:[%s6312_s16 + $0xb0] sm:$0xff] }
 0x15e   : > { %v1232_v26 = vadd.f32 %v1231_v23, %v1187_v22  ;;  %v1638_v22 = vld [vmem:[%s6312_s16 + $0x1b0] sm:$0xff]  ;;  %v1607_v23 = vld [vmem:[%s6312_s16 + $0xb8] sm:$0xff]  ;;  %1652 = vmatpush.msra.mxu3 %v1606_v21 }
 0x15f   : > { %1372 = vxpose.xlu2.b32.start [1/4] (short) (narrow) %v1160_v24, 64  ;;  %v1639_v24 = vld [vmem:[%s6312_s16 + $0x1b8] sm:$0xff]  ;;  %1693 = vmatpush.msrb.mxu2 %v1638_v22  ;;  %v3520_v21 = vld [vmem:[%s6312_s16 + $0x2b0] sm:$0xff] }
 0x160   : > { %3475 = vmatmul.msk.f32.gmra.mxu3 %vm688_vm0, %v1232_v26  ;;  %3479 = vmatmul.msk.f32.gmra.mxu2 %vm688_vm0, %v1232_v26  ;;  %v1604_v26 = vld [vmem:[%s6312_s16 + $0xa0] sm:$0xff]  ;;  %v3552_v22 = vld [vmem:[%s6312_s16 + $0x3b0] sm:$0xff] }
 0x161   : > { %1653 = vmatpush.msra.mxu3 %v1604_v26 }
 0x162   : > { %v1162_v27 = vpop.f32.mrf.mxu2 }
 0x163   : > { %v1163_v29 = vadd.f32 %v1162_v27, %v1117_v28  ;;  %v1636_v27 = vld [vmem:[%s6312_s16 + $0x1a0] sm:$0xff]  ;;  %v1605_v28 = vld [vmem:[%s6312_s16 + $0xa8] sm:$0xff] }
 0x164   : > { %1694 = vmatpush.msrb.mxu2 %v1636_v27 }
 0x165   : > { %v1234_v31 = vpop.f32.mrf.mxu3 }
 0x166   : > { %v1235_v32 = vadd.f32 %v1234_v31, %v1192_v18  ;;  %v1643_v18 = vld [vmem:[%s6312_s16 + $0x1d8] sm:$0xff] }
 0x167   : > { %1373 = vxpose.xlu2.b32.cont [2/4] (short) (narrow) %v1163_v29, 64  ;;  %v1637_v29 = vld [vmem:[%s6312_s16 + $0x1a8] sm:$0xff] }
 0x168   : > { %3476 = vmatmul.msk.f32.gmra.mxu3 %vm688_vm0, %v1235_v32  ;;  %3480 = vmatmul.msk.f32.gmra.mxu2 %vm688_vm0, %v1235_v32  ;;  %v1602_v32 = vld [vmem:[%s6312_s16 + $0x90] sm:$0xff] }
 0x169   : > { %1654 = vmatpush.msra.mxu3 %v1602_v32  ;;  %v3546_v32 = vld [vmem:[%s6312_s16 + $0x380] sm:$0xff] }
 0x16a   : > { %v1165_v33 = vpop.f32.mrf.mxu2 }
 0x16b   : > { %v1166_v35 = vadd.f32 %v1165_v33, %v1122_v34  ;;  %v1634_v33 = vld [vmem:[%s6312_s16 + $0x190] sm:$0xff]  ;;  %v1603_v34 = vld [vmem:[%s6312_s16 + $0x98] sm:$0xff] }
 0x16c   : > { %1695 = vmatpush.msrb.mxu2 %v1634_v33  ;;  %v3512_v33 = vld [vmem:[%s6312_s16 + $0x270] sm:$0xff] }
 0x16d   : > { %v1237_v37 = vpop.f32.mrf.mxu3 }
 0x16e   : > { %v1238_v38 = vadd.f32 %v1237_v37, %v1197_v20  ;;  %v1609_v20 = vld [vmem:[%s6312_s16 + $0xc8] sm:$0xff]  ;;  %v1600_v37 = vld [vmem:[%s6312_s16 + $0x80] sm:$0xff] }
 0x16f   : > { %1374 = vxpose.xlu2.b32.cont [3/4] (short) (narrow) %v1166_v35, 64  ;;  %v1635_v35 = vld [vmem:[%s6312_s16 + $0x198] sm:$0xff]  ;;  %1655 = vmatpush.msra.mxu3 %v1600_v37 }
 0x170   : > { %3477 = vmatmul.msk.f32.gmra.mxu3 %vm688_vm0, %v1238_v38  ;;  %3481 = vmatmul.msk.f32.gmra.mxu2 %vm688_vm0, %v1238_v38  ;;  %v1632_v38 = vld [vmem:[%s6312_s16 + $0x180] sm:$0xff] }
 0x171   : > { %1696 = vmatpush.msrb.mxu2 %v1632_v38  ;;  %v3510_v38 = vld [vmem:[%s6312_s16 + $0x260] sm:$0xff] }
 0x172   : > { %v1168_v40 = vpop.f32.mrf.mxu2 }
 0x173   : > { %v1169_v42 = vadd.f32 %v1168_v40, %v1127_v41  ;;  %v1601_v40 = vld [vmem:[%s6312_s16 + $0x88] sm:$0xff] }
 0x174   : > { %v1633_v41 = vld [vmem:[%s6312_s16 + $0x188] sm:$0xff] }
 0x177   : > { %1375 = vxpose.xlu2.b32.end [4/4] (short) (narrow) %v1169_v42, 64  ;;  %v1598_v42 = vld [vmem:[%s6312_s16 + $0x70] sm:$0xff] }
 0x178   : > { %1656 = vmatpush.msra.mxu3 %v1598_v42  ;;  %v3540_v42 = vld [vmem:[%s6312_s16 + $0x350] sm:$0xff] }
 0x186   : > { %v4465_v43 = vpop.f32.mrf.mxu2 }
 0x187   : > { %6339 = vst [vmem:[#allocation2_spill] sm:$0xff] %v4465_v43 }
 0x1db   : > { %v1315_v44 = vpop.f32.mrf.mxu3  ;;  %v1344_v45 = vpop.f32.mrf.mxu2 }
 0x1dc   : > { %v1364_v49 = vmul.f32 %v1356_v60, %v1315_v44  ;;  %v1365_v55 = vmul.f32 %v1357_v61, %v1344_v45  ;;  %v1630_v44 = vld [vmem:[%s6312_s16 + $0x170] sm:$0xff]  ;;  %v1599_v45 = vld [vmem:[%s6312_s16 + $0x78] sm:$0xff] }
 0x1dd   : > { %1697 = vmatpush.msrb.mxu2 %v1630_v44  ;;  %v1591_v60 = vld [vmem:[%s6312_s16 + $0x38] sm:$0xff]  ;;  %v3506_v44 = vld [vmem:[%s6312_s16 + $0x240] sm:$0xff] }
 0x1de   : > { %v1623_v61 = vld [vmem:[%s6312_s16 + $0x138] sm:$0xff] }
 0x1e3   : > { %v1318_v46 = vpop.f32.mrf.mxu3  ;;  %v1347_v47 = vpop.f32.mrf.mxu2 }
 0x1e4   : > { %v1366_v62 = vmul.f32 %v1358_v57, %v1318_v46  ;;  %v1367_v0 = vmul.f32 %v1359_v36, %v1347_v47  ;;  %v1631_v46 = vld [vmem:[%s6312_s16 + $0x178] sm:$0xff]  ;;  %v1596_v47 = vld [vmem:[%s6312_s16 + $0x60] sm:$0xff]  ;;  %v1593_v57 = vld [vmem:[%s6312_s16 + $0x48] sm:$0xff] }
 0x1e5   : > { %1657 = vmatpush.msra.mxu3 %v1596_v47  ;;  %v1625_v36 = vld [vmem:[%s6312_s16 + $0x148] sm:$0xff] }
 0x1eb   : > { %v1321_v25 = vpop.f32.mrf.mxu3  ;;  %v1350_v7 = vpop.f32.mrf.mxu2 }
 0x1ec   : > { %v1368_v58 = vmul.f32 %v1360_v51, %v1321_v25  ;;  %v1369_v59 = vmul.f32 %v1361_v52, %v1350_v7  ;;  %v1628_v25 = vld [vmem:[%s6312_s16 + $0x160] sm:$0xff]  ;;  %v1594_v51 = vld [vmem:[%s6312_s16 + $0x50] sm:$0xff] }
 0x1ed   : > { %v1626_v52 = vld [vmem:[%s6312_s16 + $0x150] sm:$0xff]  ;;  %1698 = vmatpush.msrb.mxu2 %v1628_v25  ;;  %1658 = vmatpush.msra.mxu3 %v1594_v51 }
 0x1ee   : > { %v3504_v25 = vld [vmem:[%s6312_s16 + $0x230] sm:$0xff] }
 0x1ef   : > { %1699 = vmatpush.msrb.mxu2 %v1626_v52  ;;  %v3500_v51 = vld [vmem:[%s6312_s16 + $0x210] sm:$0xff] }
 0x1f0   : > { %v3532_v52 = vld [vmem:[%s6312_s16 + $0x310] sm:$0xff] }
 0x1f3   : > { %v1324_v53 = vpop.f32.mrf.mxu3  ;;  %v1353_v54 = vpop.f32.mrf.mxu2 }
 0x1f4   : > { %v1370_v56 = vmul.f32 %v1362_v48, %v1324_v53  ;;  %v1371_v30 = vmul.f32 %v1363_v50, %v1353_v54  ;;  %v1597_v48 = vld [vmem:[%s6312_s16 + $0x68] sm:$0xff]  ;;  %v1595_v53 = vld [vmem:[%s6312_s16 + $0x58] sm:$0xff] }
 0x1f5   : > { %v1629_v50 = vld [vmem:[%s6312_s16 + $0x168] sm:$0xff]  ;;  %v1627_v54 = vld [vmem:[%s6312_s16 + $0x158] sm:$0xff] }
 0x1f6   : > { %1441 = vmatpush.msrb.mxu0 %v1370_v56  ;;  %1482 = vmatpush.msra.mxu1 %v1371_v30  ;;  %v1592_v56 = vld [vmem:[%s6312_s16 + $0x40] sm:$0xff] }
 0x1f7   : > { %v1624_v30 = vld [vmem:[%s6312_s16 + $0x140] sm:$0xff]  ;;  %1659 = vmatpush.msra.mxu3 %v1592_v56 }
 0x1f8   : > { %1442 = vmatpush.msrb.mxu0 %v1368_v58  ;;  %1483 = vmatpush.msra.mxu1 %v1369_v59  ;;  %v1388_v39 = vpop.trf.xlu2  ;;  %v1590_v58 = vld [vmem:[%s6312_s16 + $0x30] sm:$0xff]  ;;  %v3498_v56 = vld [vmem:[%s6312_s16 + $0x200] sm:$0xff] }
 0x1f9   : > { %v1622_v59 = vld [vmem:[%s6312_s16 + $0x130] sm:$0xff]  ;;  %1700 = vmatpush.msrb.mxu2 %v1624_v30  ;;  %1660 = vmatpush.msra.mxu3 %v1590_v58  ;;  %v3530_v30 = vld [vmem:[%s6312_s16 + $0x300] sm:$0xff] }
 0x1fa   : > { %1443 = vmatpush.msrb.mxu0 %v1366_v62  ;;  %1484 = vmatpush.msra.mxu1 %v1367_v0  ;;  %v1588_v62 = vld [vmem:[%s6312_s16 + $0x20] sm:$0xff] }
 0x1fb   : > { %v1620_v0 = vld [vmem:[%s6312_s16 + $0x120] sm:$0xff]  ;;  %1701 = vmatpush.msrb.mxu2 %v1622_v59  ;;  %1661 = vmatpush.msra.mxu3 %v1588_v62 }
 0x1fc   : > { %1444 = vmatpush.msrb.mxu0 %v1364_v49  ;;  %1485 = vmatpush.msra.mxu1 %v1365_v55  ;;  %v1621_v49 = vld [vmem:[%s6312_s16 + $0x128] sm:$0xff]  ;;  %v3606_v62 = vld [vmem:[%s6312_s16 + $0x4e0] sm:$0xff] }
 0x1fd   : > { %3482 = vmatmul.msk.f32.vlgmr.msrb.gmra.mxu0 %vm1404_vm2, %v1388_v39  ;;  %3490 = vmatmul.msk.f32.vlgmr.msra.gmra.mxu1 %vm1404_vm2, %v1388_v39  ;;  %v1589_v39 = vld [vmem:[%s6312_s16 + $0x28] sm:$0xff] }
 0x1fe   : > { %1730 = vmatpush.msra.mxu0 %v1615_v9  ;;  %1771 = vmatpush.msrb.mxu1 %v1647_v10  ;;  %v1616_v9 = vld [vmem:[%s6312_s16 + $0x100] sm:$0xff]  ;;  %v1585_v10 = vld [vmem:[%s6312_s16 + $0x8] sm:$0xff] }
 0x1ff   : > { %1702 = vmatpush.msrb.mxu2 %v1620_v0  ;;  %v3638_v0 = vld [vmem:[%s6312_s16 + $0x5e0] sm:$0xff] }
 0x200   : > { %v1389_v63 = vpop.trf.xlu2  ;;  %1731 = vmatpush.msra.mxu0 %v1613_v13  ;;  %1772 = vmatpush.msrb.mxu1 %v1645_v14  ;;  %v3528_v14 = vld [vmem:[%s6312_s16 + $0x2f0] sm:$0xff] }
 0x202   : > { %1732 = vmatpush.msra.mxu0 %v1611_v6  ;;  %1773 = vmatpush.msrb.mxu1 %v1643_v18  ;;  %v3524_v6 = vld [vmem:[%s6312_s16 + $0x2d0] sm:$0xff] }
 0x203   : > { %v3556_v18 = vld [vmem:[%s6312_s16 + $0x3d0] sm:$0xff] }
 0x204   : > { %1733 = vmatpush.msra.mxu0 %v1609_v20  ;;  %1774 = vmatpush.msrb.mxu1 %v1641_v3  ;;  %v3522_v20 = vld [vmem:[%s6312_s16 + $0x2c0] sm:$0xff] }
 0x205   : > { %3483 = vmatmul.msk.f32.gmra.mxu0 %vm1404_vm2, %v1389_v63  ;;  %3491 = vmatmul.msk.f32.gmra.mxu1 %vm1404_vm2, %v1389_v63  ;;  %v1586_v63 = vld [vmem:[%s6312_s16 + $0x10] sm:$0xff]  ;;  %v3554_v3 = vld [vmem:[%s6312_s16 + $0x3c0] sm:$0xff] }
 0x206   : > { %1734 = vmatpush.msra.mxu0 %v1607_v23  ;;  %1775 = vmatpush.msrb.mxu1 %v1639_v24  ;;  %v3518_v23 = vld [vmem:[%s6312_s16 + $0x2a0] sm:$0xff] }
 0x207   : > { %1662 = vmatpush.msra.mxu3 %v1586_v63  ;;  %v3550_v24 = vld [vmem:[%s6312_s16 + $0x3a0] sm:$0xff] }
 0x208   : > { %v1390_v1 = vpop.trf.xlu2  ;;  %1735 = vmatpush.msra.mxu0 %v1605_v28  ;;  %1776 = vmatpush.msrb.mxu1 %v1637_v29  ;;  %v3516_v28 = vld [vmem:[%s6312_s16 + $0x290] sm:$0xff]  ;;  %v3634_v63 = vld [vmem:[%s6312_s16 + $0x5c0] sm:$0xff] }
 0x209   : > { %1663 = vmatpush.msra.mxu3 %v1584_v8  ;;  %v3548_v29 = vld [vmem:[%s6312_s16 + $0x390] sm:$0xff]  ;;  %v3630_v8 = vld [vmem:[%s6312_s16 + $0x5a0] sm:$0xff] }
 0x20a   : > { %1736 = vmatpush.msra.mxu0 %v1603_v34  ;;  %1777 = vmatpush.msrb.mxu1 %v1635_v35  ;;  %v3544_v34 = vld [vmem:[%s6312_s16 + $0x370] sm:$0xff] }
 0x20c   : > { %1737 = vmatpush.msra.mxu0 %v1601_v40  ;;  %1778 = vmatpush.msrb.mxu1 %v1633_v41  ;;  %v3542_v40 = vld [vmem:[%s6312_s16 + $0x360] sm:$0xff]  ;;  %v3508_v41 = vld [vmem:[%s6312_s16 + $0x250] sm:$0xff] }
 0x20d   : > { %3484 = vmatmul.msk.f32.gmra.mxu0 %vm1404_vm2, %v1390_v1  ;;  %3492 = vmatmul.msk.f32.gmra.mxu1 %vm1404_vm2, %v1390_v1  ;;  %v1618_v1 = vld [vmem:[%s6312_s16 + $0x110] sm:$0xff] }
 0x20e   : > { %1738 = vmatpush.msra.mxu0 %v1599_v45  ;;  %1779 = vmatpush.msrb.mxu1 %v1631_v46  ;;  %v3538_v45 = vld [vmem:[%s6312_s16 + $0x340] sm:$0xff] }
 0x20f   : > { %1703 = vmatpush.msrb.mxu2 %v1618_v1  ;;  %v3600_v1 = vld [vmem:[%s6312_s16 + $0x4b0] sm:$0xff] }
 0x210   : > { %v1391_v2 = vpop.trf.xlu2  ;;  %1739 = vmatpush.msra.mxu0 %v1597_v48  ;;  %1780 = vmatpush.msrb.mxu1 %v1629_v50  ;;  %v3502_v48 = vld [vmem:[%s6312_s16 + $0x220] sm:$0xff] }
 0x211   : > { %1704 = vmatpush.msrb.mxu2 %v1616_v9  ;;  %v3534_v50 = vld [vmem:[%s6312_s16 + $0x320] sm:$0xff]  ;;  %v3596_v9 = vld [vmem:[%s6312_s16 + $0x490] sm:$0xff] }
 0x212   : > { %1740 = vmatpush.msra.mxu0 %v1595_v53  ;;  %1781 = vmatpush.msrb.mxu1 %v1627_v54 }
 0x214   : > { %1741 = vmatpush.msra.mxu0 %v1593_v57  ;;  %1782 = vmatpush.msrb.mxu1 %v1625_v36 }
 0x215   : > { %3485 = vmatmul.msk.f32.gmra.mxu0 %vm1404_vm2, %v1391_v2  ;;  %3493 = vmatmul.msk.f32.gmra.mxu1 %vm1404_vm2, %v1391_v2  ;;  %v1587_v2 = vld [vmem:[%s6312_s16 + $0x18] sm:$0xff] }
 0x216   : > { %1742 = vmatpush.msra.mxu0 %v1591_v60  ;;  %1783 = vmatpush.msrb.mxu1 %v1623_v61  ;;  %v3608_v60 = vld [vmem:[%s6312_s16 + $0x4f0] sm:$0xff] }
 0x217   : > { %v3640_v61 = vld [vmem:[%s6312_s16 + $0x5f0] sm:$0xff] }
 0x218   : > { %v1392_v16 = vpop.trf.xlu2  ;;  %1743 = vmatpush.msra.mxu0 %v1589_v39  ;;  %1784 = vmatpush.msrb.mxu1 %v1621_v49  ;;  %v3604_v39 = vld [vmem:[%s6312_s16 + $0x4d0] sm:$0xff] }
 0x219   : > { %v3636_v49 = vld [vmem:[%s6312_s16 + $0x5d0] sm:$0xff] }
 0x21a   : > { %1744 = vmatpush.msra.mxu0 %v1587_v2  ;;  %1785 = vmatpush.msrb.mxu1 %v1619_v5  ;;  %v3632_v2 = vld [vmem:[%s6312_s16 + $0x5b0] sm:$0xff]  ;;  %v3598_v5 = vld [vmem:[%s6312_s16 + $0x4a0] sm:$0xff] }
 0x21c   : > { %1745 = vmatpush.msra.mxu0 %v1585_v10  ;;  %1786 = vmatpush.msrb.mxu1 %v1617_v11  ;;  %v3628_v10 = vld [vmem:[%s6312_s16 + $0x590] sm:$0xff]  ;;  %v3594_v11 = vld [vmem:[%s6312_s16 + $0x480] sm:$0xff] }
 0x21d   : > { %3486 = vmatmul.msk.f32.gmra.mxu0 %vm1404_vm2, %v1392_v16  ;;  %3494 = vmatmul.msk.f32.gmra.mxu1 %vm1404_vm2, %v1392_v16  ;;  %v3526_v16 = vld [vmem:[%s6312_s16 + $0x2e0] sm:$0xff] }
 0x21e   : > { %1918 = vmatpush.msrb.mxu0 %v3528_v14  ;;  %1959 = vmatpush.msra.mxu1 %v3560_v15  ;;  %v3626_v14 = vld [vmem:[%s6312_s16 + $0x580] sm:$0xff]  ;;  %v3592_v15 = vld [vmem:[%s6312_s16 + $0x470] sm:$0xff] }
 0x220   : > { %v1393_v31 = vpop.trf.xlu2  ;;  %1919 = vmatpush.msrb.mxu0 %v3526_v16  ;;  %1960 = vmatpush.msra.mxu1 %v3558_v17  ;;  %v3624_v16 = vld [vmem:[%s6312_s16 + $0x570] sm:$0xff]  ;;  %v3590_v17 = vld [vmem:[%s6312_s16 + $0x460] sm:$0xff] }
 0x222   : > { %1920 = vmatpush.msrb.mxu0 %v3524_v6  ;;  %1961 = vmatpush.msra.mxu1 %v3556_v18  ;;  %v3622_v6 = vld [vmem:[%s6312_s16 + $0x560] sm:$0xff]  ;;  %v3588_v18 = vld [vmem:[%s6312_s16 + $0x450] sm:$0xff] }
 0x224   : > { %1921 = vmatpush.msrb.mxu0 %v3522_v20  ;;  %1962 = vmatpush.msra.mxu1 %v3554_v3  ;;  %v3620_v20 = vld [vmem:[%s6312_s16 + $0x550] sm:$0xff]  ;;  %v3586_v3 = vld [vmem:[%s6312_s16 + $0x440] sm:$0xff] }
 0x225   : > { %3487 = vmatmul.msk.f32.gmra.mxu0 %vm1404_vm2, %v1393_v31  ;;  %3495 = vmatmul.msk.f32.gmra.mxu1 %vm1404_vm2, %v1393_v31  ;;  %v3514_v31 = vld [vmem:[%s6312_s16 + $0x280] sm:$0xff] }
 0x226   : > { %1922 = vmatpush.msrb.mxu0 %v3520_v21  ;;  %1963 = vmatpush.msra.mxu1 %v3552_v22  ;;  %v3618_v21 = vld [vmem:[%s6312_s16 + $0x540] sm:$0xff]  ;;  %v3584_v22 = vld [vmem:[%s6312_s16 + $0x430] sm:$0xff] }
 0x228   : > { %v1394_v7 = vpop.trf.xlu2  ;;  %1923 = vmatpush.msrb.mxu0 %v3518_v23  ;;  %1964 = vmatpush.msra.mxu1 %v3550_v24  ;;  %v3616_v23 = vld [vmem:[%s6312_s16 + $0x530] sm:$0xff]  ;;  %v3582_v24 = vld [vmem:[%s6312_s16 + $0x420] sm:$0xff] }
 0x22a   : > { %1924 = vmatpush.msrb.mxu0 %v3516_v28  ;;  %1965 = vmatpush.msra.mxu1 %v3548_v29  ;;  %v3614_v28 = vld [vmem:[%s6312_s16 + $0x520] sm:$0xff]  ;;  %v3580_v29 = vld [vmem:[%s6312_s16 + $0x410] sm:$0xff] }
 0x22c   : > { %1925 = vmatpush.msrb.mxu0 %v3514_v31  ;;  %1966 = vmatpush.msra.mxu1 %v3546_v32  ;;  %v3612_v31 = vld [vmem:[%s6312_s16 + $0x510] sm:$0xff]  ;;  %v3578_v32 = vld [vmem:[%s6312_s16 + $0x400] sm:$0xff] }
 0x22d   : > { %3488 = vmatmul.msk.f32.gmra.mxu0 %vm1404_vm2, %v1394_v7  ;;  %3496 = vmatmul.msk.f32.gmra.mxu1 %vm1404_vm2, %v1394_v7  ;;  %v3536_v7 = vld [vmem:[%s6312_s16 + $0x330] sm:$0xff] }
 0x22e   : > { %1926 = vmatpush.msrb.mxu0 %v3512_v33  ;;  %1967 = vmatpush.msra.mxu1 %v3544_v34  ;;  %v3610_v33 = vld [vmem:[%s6312_s16 + $0x500] sm:$0xff] }
 0x230   : > { %v1395_v55 = vpop.trf.xlu2  ;;  %1927 = vmatpush.msrb.mxu0 %v3510_v38  ;;  %1968 = vmatpush.msra.mxu1 %v3542_v40 }
 0x232   : > { %1928 = vmatpush.msrb.mxu0 %v3508_v41  ;;  %1969 = vmatpush.msra.mxu1 %v3540_v42 }
 0x234   : > { %1929 = vmatpush.msrb.mxu0 %v3506_v44  ;;  %1970 = vmatpush.msra.mxu1 %v3538_v45 }
 0x235   : > { %3489 = vmatmul.msk.f32.gmra.mxu0 %vm1404_vm2, %v1395_v55  ;;  %3497 = vmatmul.msk.f32.gmra.mxu1 %vm1404_vm2, %v1395_v55  ;;  %v3602_v55 = vld [vmem:[%s6312_s16 + $0x4c0] sm:$0xff] }
 0x236   : > { %1930 = vmatpush.msrb.mxu0 %v3504_v25  ;;  %1971 = vmatpush.msra.mxu1 %v3536_v7 }
 0x238   : > { %1931 = vmatpush.msrb.mxu0 %v3502_v48  ;;  %1972 = vmatpush.msra.mxu1 %v3534_v50 }
 0x23a   : > { %1932 = vmatpush.msrb.mxu0 %v3500_v51  ;;  %1973 = vmatpush.msra.mxu1 %v3532_v52 }
 0x23c   : > { %1933 = vmatpush.msrb.mxu0 %v3498_v56  ;;  %1974 = vmatpush.msra.mxu1 %v3530_v30 }
 0x27a   : > { %v4699_v12 = vpop.f32.mrf.mxu0  ;;  %v4701_v13 = vpop.f32.mrf.mxu1 }
 0x27b   : > { %1664 = vmatmul.f32.vlgmr.msra.gmra.mxu3 %v4699_v12  ;;  %1705 = vmatmul.f32.vlgmr.msrb.gmra.mxu2 %v4701_v13 }
 0x27c   : > { %1746 = vmatmul.f32.vlgmr.msra.gmra.mxu0 %v4699_v12  ;;  %1787 = vmatmul.f32.vlgmr.msrb.gmra.mxu1 %v4701_v13 }
 0x27d   : > { %2155 = vmatpush.msra.mxu0 %v3608_v60  ;;  %2196 = vmatpush.msrb.mxu1 %v3640_v61 }
 0x27f   : > { %2156 = vmatpush.msra.mxu0 %v3606_v62  ;;  %2197 = vmatpush.msrb.mxu1 %v3638_v0 }
 0x281   : > { %2157 = vmatpush.msra.mxu0 %v3604_v39  ;;  %2198 = vmatpush.msrb.mxu1 %v3636_v49 }
 0x282   : > { %v4725_v4 = vpop.f32.mrf.mxu0  ;;  %v4727_v19 = vpop.f32.mrf.mxu1 }
 0x283   : > { %1667 = vmatmul.f32.gmra.mxu3 %v4725_v4  ;;  %1708 = vmatmul.f32.gmra.mxu2 %v4727_v19 }
 0x284   : > { %1749 = vmatmul.f32.gmra.mxu0 %v4725_v4  ;;  %1790 = vmatmul.f32.gmra.mxu1 %v4727_v19 }
 0x285   : > { %2158 = vmatpush.msra.mxu0 %v3602_v55  ;;  %2199 = vmatpush.msrb.mxu1 %v3634_v63 }
 0x287   : > { %2159 = vmatpush.msra.mxu0 %v3600_v1  ;;  %2200 = vmatpush.msrb.mxu1 %v3632_v2 }
 0x289   : > { %2160 = vmatpush.msra.mxu0 %v3598_v5  ;;  %2201 = vmatpush.msrb.mxu1 %v3630_v8 }
 0x28a   : > { %v4751_v26 = vpop.f32.mrf.mxu0  ;;  %v4753_v27 = vpop.f32.mrf.mxu1 }
 0x28b   : > { %1670 = vmatmul.f32.gmra.mxu3 %v4751_v26  ;;  %1711 = vmatmul.f32.gmra.mxu2 %v4753_v27 }
 0x28c   : > { %1752 = vmatmul.f32.gmra.mxu0 %v4751_v26  ;;  %1793 = vmatmul.f32.gmra.mxu1 %v4753_v27 }
 0x28d   : > { %2161 = vmatpush.msra.mxu0 %v3596_v9  ;;  %2202 = vmatpush.msrb.mxu1 %v3628_v10 }
 0x28f   : > { %2162 = vmatpush.msra.mxu0 %v3594_v11  ;;  %2203 = vmatpush.msrb.mxu1 %v3626_v14 }
 0x291   : > { %2163 = vmatpush.msra.mxu0 %v3592_v15  ;;  %2204 = vmatpush.msrb.mxu1 %v3624_v16 }
 0x292   : > { %v4777_v35 = vpop.f32.mrf.mxu0  ;;  %v4779_v37 = vpop.f32.mrf.mxu1 }
 0x293   : > { %1673 = vmatmul.f32.gmra.mxu3 %v4777_v35  ;;  %1714 = vmatmul.f32.gmra.mxu2 %v4779_v37 }
 0x294   : > { %1755 = vmatmul.f32.gmra.mxu0 %v4777_v35  ;;  %1796 = vmatmul.f32.gmra.mxu1 %v4779_v37 }
 0x295   : > { %2164 = vmatpush.msra.mxu0 %v3590_v17  ;;  %2205 = vmatpush.msrb.mxu1 %v3622_v6 }
 0x297   : > { %2165 = vmatpush.msra.mxu0 %v3588_v18  ;;  %2206 = vmatpush.msrb.mxu1 %v3620_v20 }
 0x299   : > { %2166 = vmatpush.msra.mxu0 %v3586_v3  ;;  %2207 = vmatpush.msrb.mxu1 %v3618_v21 }
 0x29a   : > { %v4803_v46 = vpop.f32.mrf.mxu0  ;;  %v4805_v47 = vpop.f32.mrf.mxu1 }
 0x29b   : > { %1676 = vmatmul.f32.gmra.mxu3 %v4803_v46  ;;  %1717 = vmatmul.f32.gmra.mxu2 %v4805_v47 }
 0x29c   : > { %1758 = vmatmul.f32.gmra.mxu0 %v4803_v46  ;;  %1799 = vmatmul.f32.gmra.mxu1 %v4805_v47 }
 0x29d   : > { %2167 = vmatpush.msra.mxu0 %v3584_v22  ;;  %2208 = vmatpush.msrb.mxu1 %v3616_v23 }
 0x29f   : > { %2168 = vmatpush.msra.mxu0 %v3582_v24  ;;  %2209 = vmatpush.msrb.mxu1 %v3614_v28 }
 0x2a1   : > { %2169 = vmatpush.msra.mxu0 %v3580_v29  ;;  %2210 = vmatpush.msrb.mxu1 %v3612_v31 }
 0x2a2   : > { %v4829_v53 = vpop.f32.mrf.mxu0  ;;  %v4831_v54 = vpop.f32.mrf.mxu1 }
 0x2a3   : > { %1679 = vmatmul.f32.gmra.mxu3 %v4829_v53  ;;  %1720 = vmatmul.f32.gmra.mxu2 %v4831_v54 }
 0x2a4   : > { %1761 = vmatmul.f32.gmra.mxu0 %v4829_v53  ;;  %1802 = vmatmul.f32.gmra.mxu1 %v4831_v54 }
 0x2a5   : > { %2170 = vmatpush.msra.mxu0 %v3578_v32  ;;  %2211 = vmatpush.msrb.mxu1 %v3610_v33 }
 0x2aa   : > { %v4843_v57 = vpop.f32.mrf.mxu0  ;;  %v4845_v36 = vpop.f32.mrf.mxu1 }
 0x2ab   : > { %1682 = vmatmul.f32.gmra.mxu3 %v4843_v57  ;;  %1723 = vmatmul.f32.gmra.mxu2 %v4845_v36 }
 0x2ac   : > { %1764 = vmatmul.f32.gmra.mxu0 %v4843_v57  ;;  %1805 = vmatmul.f32.gmra.mxu1 %v4845_v36 }
 0x2b2   : > { %v4851_v58 = vpop.f32.mrf.mxu0  ;;  %v4853_v59 = vpop.f32.mrf.mxu1 }
 0x2b3   : > { %1685 = vmatmul.f32.gmra.mxu3 %v4851_v58  ;;  %1726 = vmatmul.f32.gmra.mxu2 %v4853_v59 }
 0x2b4   : > { %1767 = vmatmul.f32.gmra.mxu0 %v4851_v58  ;;  %1808 = vmatmul.f32.gmra.mxu1 %v4853_v59 }
 0x2bc   : > { %1934 = vmatmul.f32.vlgmr.msrb.gmra.mxu0 %v4699_v12  ;;  %1975 = vmatmul.f32.vlgmr.msra.gmra.mxu1 %v4701_v13 }
 0x2c4   : > { %1937 = vmatmul.f32.gmra.mxu0 %v4725_v4  ;;  %1978 = vmatmul.f32.gmra.mxu1 %v4727_v19 }
 0x2cc   : > { %1940 = vmatmul.f32.gmra.mxu0 %v4751_v26  ;;  %1981 = vmatmul.f32.gmra.mxu1 %v4753_v27 }
 0x2d4   : > { %1943 = vmatmul.f32.gmra.mxu0 %v4777_v35  ;;  %1984 = vmatmul.f32.gmra.mxu1 %v4779_v37 }
 0x2dc   : > { %1946 = vmatmul.f32.gmra.mxu0 %v4803_v46  ;;  %1987 = vmatmul.f32.gmra.mxu1 %v4805_v47 }
 0x2e4   : > { %1949 = vmatmul.f32.gmra.mxu0 %v4829_v53  ;;  %1990 = vmatmul.f32.gmra.mxu1 %v4831_v54 }
 0x2ec   : > { %1952 = vmatmul.f32.gmra.mxu0 %v4843_v57  ;;  %1993 = vmatmul.f32.gmra.mxu1 %v4845_v36 }
 0x2f4   : > { %1955 = vmatmul.f32.gmra.mxu0 %v4851_v58  ;;  %1996 = vmatmul.f32.gmra.mxu1 %v4853_v59 }
 0x2f9   : > { %v4971_v34 = vpop.f32.mrf.mxu0  ;;  %v4973_v38 = vpop.f32.mrf.mxu1 }
 0x2fa   : > { %v1789_v33 = vadd.f32 %v4973_v38, %v4971_v34  ;;  %v3561_v34 = vld [vmem:[%s6312_s16 + $0x3f8] sm:$0xff]  ;;  %v3559_v38 = vld [vmem:[%s6312_s16 + $0x3e8] sm:$0xff] }
 0x2fc   : > { %2171 = vmatmul.f32.vlgmr.msra.gmra.mxu0 %v4699_v12  ;;  %2212 = vmatmul.f32.vlgmr.msrb.gmra.mxu1 %v4701_v13 }
 0x2fe   : > { %v4977_v40 = vpop.f32.mrf.mxu3  ;;  %v4979_v41 = vpop.f32.mrf.mxu2 }
 0x301   : > { %v1750_v42 = vpop.f32.mrf.mxu0  ;;  %v1791_v44 = vpop.f32.mrf.mxu1 }
 0x302   : > { %v1792_v31 = vadd.f32 %v1791_v44, %v1750_v42  ;;  %v1707_v44 = vadd.f32 %v4979_v41, %v4977_v40  ;;  %v3529_v40 = vld [vmem:[%s6312_s16 + $0x2f8] sm:$0xff]  ;;  %v3555_v41 = vld [vmem:[%s6312_s16 + $0x3c8] sm:$0xff] }
 0x304   : > { %2174 = vmatmul.f32.gmra.mxu0 %v4725_v4  ;;  %2215 = vmatmul.f32.gmra.mxu1 %v4727_v19 }
 0x306   : > { %v4983_v45 = vpop.f32.mrf.mxu3  ;;  %v4985_v25 = vpop.f32.mrf.mxu2 }
 0x307   : > { %v1710_v42 = vadd.f32 %v4985_v25, %v4983_v45  ;;  %v3557_v45 = vld [vmem:[%s6312_s16 + $0x3d8] sm:$0xff]  ;;  %v1577_v25 = vld [vmem:[%s6316_s20 + $0x8] sm:$0xff] }
 0x309   : > { %v1753_v7 = vpop.f32.mrf.mxu0  ;;  %v1794_v48 = vpop.f32.mrf.mxu1 }
 0x30a   : > { %v1795_v28 = vadd.f32 %v1794_v48, %v1753_v7 }
 0x30c   : > { %2177 = vmatmul.f32.gmra.mxu0 %v4751_v26  ;;  %2218 = vmatmul.f32.gmra.mxu1 %v4753_v27 }
 0x30e   : > { %v1671_v50 = vpop.f32.mrf.mxu3  ;;  %v1712_v51 = vpop.f32.mrf.mxu2 }
 0x311   : > { %v1756_v52 = vpop.f32.mrf.mxu0  ;;  %v1797_v56 = vpop.f32.mrf.mxu1 }
 0x312   : > { %v1798_v23 = vadd.f32 %v1797_v56, %v1756_v52  ;;  %v1713_v52 = vadd.f32 %v1712_v51, %v1671_v50  ;;  %v3527_v50 = vld [vmem:[%s6312_s16 + $0x2e8] sm:$0xff]  ;;  %v3553_v51 = vld [vmem:[%s6312_s16 + $0x3b8] sm:$0xff] }
 0x314   : > { %2180 = vmatmul.f32.gmra.mxu0 %v4777_v35  ;;  %2221 = vmatmul.f32.gmra.mxu1 %v4779_v37 }
 0x316   : > { %v1674_v30 = vpop.f32.mrf.mxu3  ;;  %v1715_v60 = vpop.f32.mrf.mxu2 }
 0x317   : > { %v1716_v32 = vadd.f32 %v1715_v60, %v1674_v30  ;;  %v3525_v30 = vld [vmem:[%s6312_s16 + $0x2d8] sm:$0xff]  ;;  %v3551_v60 = vld [vmem:[%s6312_s16 + $0x3a8] sm:$0xff] }
 0x319   : > { %v1759_v61 = vpop.f32.mrf.mxu0  ;;  %v1800_v62 = vpop.f32.mrf.mxu1 }
 0x31a   : > { %v1801_v20 = vadd.f32 %v1800_v62, %v1759_v61  ;;  %v1576_v61 = vld [vmem:[%s6316_s20] sm:$0xff] }
 0x31c   : > { %2183 = vmatmul.f32.gmra.mxu0 %v4803_v46  ;;  %2224 = vmatmul.f32.gmra.mxu1 %v4805_v47 }
 0x31e   : > { %v1677_v0 = vpop.f32.mrf.mxu3  ;;  %v1718_v39 = vpop.f32.mrf.mxu2 }
 0x31f   : > { %v1719_v29 = vadd.f32 %v1718_v39, %v1677_v0  ;;  %v3549_v0 = vld [vmem:[%s6312_s16 + $0x398] sm:$0xff]  ;;  %v3523_v39 = vld [vmem:[%s6312_s16 + $0x2c8] sm:$0xff] }
 0x321   : > { %v1762_v49 = vpop.f32.mrf.mxu0  ;;  %v1803_v55 = vpop.f32.mrf.mxu1 }
 0x322   : > { %v1804_v16 = vadd.f32 %v1803_v55, %v1762_v49  ;;  %v1578_v49 = vld [vmem:[%s6316_s20 + $0x10] sm:$0xff] }
 0x324   : > { %2186 = vmatmul.f32.gmra.mxu0 %v4829_v53  ;;  %2227 = vmatmul.f32.gmra.mxu1 %v4831_v54 }
 0x326   : > { %v1680_v63 = vpop.f32.mrf.mxu3  ;;  %v1721_v1 = vpop.f32.mrf.mxu2 }
 0x327   : > { %v1722_v24 = vadd.f32 %v1721_v1, %v1680_v63  ;;  %v3521_v1 = vld [vmem:[%s6312_s16 + $0x2b8] sm:$0xff] }
 0x329   : > { %v1765_v2 = vpop.f32.mrf.mxu0  ;;  %v1806_v5 = vpop.f32.mrf.mxu1 }
 0x32a   : > { %v1807_v15 = vadd.f32 %v1806_v5, %v1765_v2  ;;  %v3547_v2 = vld [vmem:[%s6312_s16 + $0x388] sm:$0xff] }
 0x32b   : > { %v3519_v5 = vld [vmem:[%s6312_s16 + $0x2a8] sm:$0xff] }
 0x32c   : > { %2189 = vmatmul.f32.gmra.mxu0 %v4843_v57  ;;  %2230 = vmatmul.f32.gmra.mxu1 %v4845_v36 }
 0x32e   : > { %v1683_v8 = vpop.f32.mrf.mxu3  ;;  %v1724_v9 = vpop.f32.mrf.mxu2 }
 0x32f   : > { %v1725_v3 = vadd.f32 %v1724_v9, %v1683_v8  ;;  %v3545_v8 = vld [vmem:[%s6312_s16 + $0x378] sm:$0xff] }
 0x330   : > { %v3517_v9 = vld [vmem:[%s6312_s16 + $0x298] sm:$0xff] }
 0x331   : > { %v1768_v10 = vpop.f32.mrf.mxu0  ;;  %v1809_v11 = vpop.f32.mrf.mxu1 }
 0x332   : > { %v1810_v14 = vadd.f32 %v1809_v11, %v1768_v10  ;;  %v3543_v10 = vld [vmem:[%s6312_s16 + $0x368] sm:$0xff]  ;;  %v3541_v11 = vld [vmem:[%s6312_s16 + $0x358] sm:$0xff] }
 0x334   : > { %1885 = vmatpush.msra.mxu2 %v1810_v14  ;;  %2192 = vmatmul.f32.gmra.mxu0 %v4851_v58  ;;  %v3515_v14 = vld [vmem:[%s6312_s16 + $0x288] sm:$0xff] }
 0x335   : > { %2233 = vmatmul.f32.gmra.mxu1 %v4853_v59 }
 0x336   : > { %1886 = vmatpush.msra.mxu2 %v1807_v15  ;;  %v1686_v17 = vpop.f32.mrf.mxu3  ;;  %v1727_v6 = vpop.f32.mrf.mxu2  ;;  %v1579_v15 = vld [vmem:[%s6316_s20 + $0x18] sm:$0xff] }
 0x337   : > { %v1728_v18 = vadd.f32 %v1727_v6, %v1686_v17  ;;  %v3513_v6 = vld [vmem:[%s6312_s16 + $0x278] sm:$0xff] }
 0x338   : > { %1887 = vmatpush.msra.mxu2 %v1804_v16 }
 0x339   : > { %v4999_v21 = vpop.f32.mrf.mxu0  ;;  %v5001_v22 = vpop.f32.mrf.mxu1  ;;  %1844 = vmatpush.msrb.mxu3 %v1728_v18  ;;  %v3539_v18 = vld [vmem:[%s6312_s16 + $0x348] sm:$0xff] }
 0x33a   : > { %1888 = vmatpush.msra.mxu2 %v1801_v20  ;;  %v3511_v20 = vld [vmem:[%s6312_s16 + $0x268] sm:$0xff] }
 0x33b   : > { %1845 = vmatpush.msrb.mxu3 %v1725_v3  ;;  %v3537_v3 = vld [vmem:[%s6312_s16 + $0x338] sm:$0xff] }
 0x33c   : > { %1889 = vmatpush.msra.mxu2 %v1798_v23  ;;  %v3509_v23 = vld [vmem:[%s6312_s16 + $0x258] sm:$0xff] }
 0x33d   : > { %1846 = vmatpush.msrb.mxu3 %v1722_v24  ;;  %v3535_v24 = vld [vmem:[%s6312_s16 + $0x328] sm:$0xff] }
 0x33e   : > { %1890 = vmatpush.msra.mxu2 %v1795_v28  ;;  %v3507_v28 = vld [vmem:[%s6312_s16 + $0x248] sm:$0xff] }
 0x33f   : > { %1847 = vmatpush.msrb.mxu3 %v1719_v29  ;;  %v3533_v29 = vld [vmem:[%s6312_s16 + $0x318] sm:$0xff] }
 0x340   : > { %1891 = vmatpush.msra.mxu2 %v1792_v31  ;;  %v1580_v31 = vld [vmem:[%s6316_s20 + $0x20] sm:$0xff] }
 0x341   : > { %v5008_v56 = vpop.f32.mrf.mxu0  ;;  %v5010_v62 = vpop.f32.mrf.mxu1  ;;  %1848 = vmatpush.msrb.mxu3 %v1716_v32 }
 0x342   : > { %1892 = vmatpush.msra.mxu2 %v1789_v33 }
 0x343   : > { %3570 = vmatmul.msk.f32.vlgmr.msra.gmra.mxu2 %vm688_vm0, %v1576_v61  ;;  %1849 = vmatpush.msrb.mxu3 %v1713_v52  ;;  %v3531_v52 = vld [vmem:[%s6312_s16 + $0x308] sm:$0xff] }
 0x344   : > { %2041 = vmatpush.msrb.mxu2 %v3561_v34  ;;  %v3501_v34 = vld [vmem:[%s6312_s16 + $0x218] sm:$0xff] }
 0x345   : > { %1850 = vmatpush.msrb.mxu3 %v1710_v42  ;;  %v3503_v42 = vld [vmem:[%s6312_s16 + $0x228] sm:$0xff] }
 0x346   : > { %2042 = vmatpush.msrb.mxu2 %v3559_v38  ;;  %v3499_v38 = vld [vmem:[%s6312_s16 + $0x208] sm:$0xff] }
 0x347   : > { %1851 = vmatpush.msrb.mxu3 %v1707_v44  ;;  %v1581_v44 = vld [vmem:[%s6316_s20 + $0x28] sm:$0xff] }
 0x348   : > { %3562 = vmatmul.msk.f32.vlgmr.msrb.gmra.mxu3 %vm688_vm0, %v1576_v61  ;;  %2043 = vmatpush.msrb.mxu2 %v3557_v45  ;;  %v3505_v61 = vld [vmem:[%s6312_s16 + $0x238] sm:$0xff] }
 0x349   : > { %v5030_v7 = vpop.f32.mrf.mxu0  ;;  %v5032_v48 = vpop.f32.mrf.mxu1  ;;  %2000 = vmatpush.msra.mxu3 %v3529_v40  ;;  %v1582_v40 = vld [vmem:[%s6316_s20 + $0x30] sm:$0xff] }
 0x34a   : > { %2044 = vmatpush.msrb.mxu2 %v3555_v41 }
 0x34b   : > { %3571 = vmatmul.msk.f32.gmra.mxu2 %vm688_vm0, %v1577_v25  ;;  %2001 = vmatpush.msra.mxu3 %v3527_v50 }
 0x34c   : > { %2045 = vmatpush.msrb.mxu2 %v3553_v51  ;;  %v1583_v51 = vld [vmem:[%s6316_s20 + $0x38] sm:$0xff] }
 0x34d   : > { %2002 = vmatpush.msra.mxu3 %v3525_v30 }
 0x34e   : > { %2046 = vmatpush.msrb.mxu2 %v3551_v60 }
 0x34f   : > { %2003 = vmatpush.msra.mxu3 %v3523_v39 }
 0x350   : > { %3563 = vmatmul.msk.f32.gmra.mxu3 %vm688_vm0, %v1577_v25  ;;  %2047 = vmatpush.msrb.mxu2 %v3549_v0 }
 0x351   : > { %v5063_v55 = vpop.f32.mrf.mxu0  ;;  %v5065_v63 = vpop.f32.mrf.mxu1  ;;  %2004 = vmatpush.msra.mxu3 %v3521_v1  ;;  %v3639_v1 = vld [vmem:[%s6312_s16 + $0x5e8] sm:$0xff] }
 0x352   : > { %2048 = vmatpush.msrb.mxu2 %v3547_v2  ;;  %v3637_v2 = vld [vmem:[%s6312_s16 + $0x5d8] sm:$0xff] }
 0x353   : > { %3572 = vmatmul.msk.f32.gmra.mxu2 %vm688_vm0, %v1578_v49  ;;  %2005 = vmatpush.msra.mxu3 %v3519_v5 }
 0x354   : > { %2049 = vmatpush.msrb.mxu2 %v3545_v8 }
 0x355   : > { %2006 = vmatpush.msra.mxu3 %v3517_v9  ;;  %v3609_v9 = vld [vmem:[%s6312_s16 + $0x4f8] sm:$0xff] }
 0x356   : > { %2050 = vmatpush.msrb.mxu2 %v3543_v10  ;;  %v3635_v10 = vld [vmem:[%s6312_s16 + $0x5c8] sm:$0xff] }
 0x357   : > { %2007 = vmatpush.msra.mxu3 %v3515_v14  ;;  %v3633_v14 = vld [vmem:[%s6312_s16 + $0x5b8] sm:$0xff] }
 0x358   : > { %3564 = vmatmul.msk.f32.gmra.mxu3 %vm688_vm0, %v1578_v49  ;;  %2051 = vmatpush.msrb.mxu2 %v3541_v11  ;;  %v3641_v49 = vld [vmem:[%s6312_s16 + $0x5f8] sm:$0xff]  ;;  %v3607_v11 = vld [vmem:[%s6312_s16 + $0x4e8] sm:$0xff] }
 0x359   : > { %v5096_v16 = vpop.f32.mrf.mxu0  ;;  %v5098_v17 = vpop.f32.mrf.mxu1  ;;  %2008 = vmatpush.msra.mxu3 %v3513_v6  ;;  %v3631_v6 = vld [vmem:[%s6312_s16 + $0x5a8] sm:$0xff] }
 0x35a   : > { %2052 = vmatpush.msrb.mxu2 %v3539_v18  ;;  %v3603_v18 = vld [vmem:[%s6312_s16 + $0x4c8] sm:$0xff] }
 0x35b   : > { %3573 = vmatmul.msk.f32.gmra.mxu2 %vm688_vm0, %v1579_v15  ;;  %2009 = vmatpush.msra.mxu3 %v3511_v20  ;;  %v3629_v20 = vld [vmem:[%s6312_s16 + $0x598] sm:$0xff] }
 0x35c   : > { %2053 = vmatpush.msrb.mxu2 %v3537_v3 }
 0x35d   : > { %2010 = vmatpush.msra.mxu3 %v3509_v23 }
 0x35e   : > { %2054 = vmatpush.msrb.mxu2 %v3535_v24  ;;  %v3601_v24 = vld [vmem:[%s6312_s16 + $0x4b8] sm:$0xff] }
 0x35f   : > { %2011 = vmatpush.msra.mxu3 %v3507_v28  ;;  %v3627_v28 = vld [vmem:[%s6312_s16 + $0x588] sm:$0xff] }
 0x360   : > { %3565 = vmatmul.msk.f32.gmra.mxu3 %vm688_vm0, %v1579_v15  ;;  %2055 = vmatpush.msrb.mxu2 %v3533_v29  ;;  %v3605_v15 = vld [vmem:[%s6312_s16 + $0x4d8] sm:$0xff]  ;;  %v3599_v29 = vld [vmem:[%s6312_s16 + $0x4a8] sm:$0xff] }
 0x361   : > { %v5129_v32 = vpop.f32.mrf.mxu0  ;;  %v5131_v33 = vpop.f32.mrf.mxu1  ;;  %2012 = vmatpush.msra.mxu3 %v3505_v61  ;;  %v3597_v61 = vld [vmem:[%s6312_s16 + $0x498] sm:$0xff] }
 0x362   : > { %6340 = vst [vmem:[#allocation3_spill] sm:$0xff] %v5131_v33  ;;  %2056 = vmatpush.msrb.mxu2 %v3531_v52  ;;  %v3623_v52 = vld [vmem:[%s6312_s16 + $0x568] sm:$0xff] }
 0x363   : > { %3574 = vmatmul.msk.f32.gmra.mxu2 %vm688_vm0, %v1580_v31  ;;  %2013 = vmatpush.msra.mxu3 %v3503_v42  ;;  %v3595_v42 = vld [vmem:[%s6312_s16 + $0x488] sm:$0xff] }
 0x364   : > { %2278 = vmatpush.msra.mxu2 %v3641_v49  ;;  %v3591_v49 = vld [vmem:[%s6312_s16 + $0x468] sm:$0xff] }
 0x365   : > { %2014 = vmatpush.msra.mxu3 %v3501_v34  ;;  %v3621_v34 = vld [vmem:[%s6312_s16 + $0x558] sm:$0xff] }
 0x366   : > { %2279 = vmatpush.msra.mxu2 %v3639_v1  ;;  %v3617_v1 = vld [vmem:[%s6312_s16 + $0x538] sm:$0xff] }
 0x367   : > { %2015 = vmatpush.msra.mxu3 %v3499_v38 }
 0x368   : > { %3566 = vmatmul.msk.f32.gmra.mxu3 %vm688_vm0, %v1580_v31  ;;  %2280 = vmatpush.msra.mxu2 %v3637_v2  ;;  %v3625_v31 = vld [vmem:[%s6312_s16 + $0x578] sm:$0xff] }
 0x369   : > { %v5153_v45 = vpop.f32.mrf.mxu0  ;;  %v5155_v25 = vpop.f32.mrf.mxu1  ;;  %2237 = vmatpush.msrb.mxu3 %v3609_v9  ;;  %v3589_v2 = vld [vmem:[%s6312_s16 + $0x458] sm:$0xff]  ;;  %v3615_v9 = vld [vmem:[%s6312_s16 + $0x528] sm:$0xff] }
 0x36a   : > { %6341 = vst [vmem:[#allocation4_spill] sm:$0xff] %v5153_v45  ;;  %2281 = vmatpush.msra.mxu2 %v3635_v10  ;;  %v3587_v10 = vld [vmem:[%s6312_s16 + $0x448] sm:$0xff] }
 0x36b   : > { %6342 = vst [vmem:[#allocation5_spill] sm:$0xff] %v5155_v25  ;;  %3575 = vmatmul.msk.f32.gmra.mxu2 %vm688_vm0, %v1581_v44  ;;  %2238 = vmatpush.msrb.mxu3 %v3607_v11  ;;  %v3613_v11 = vld [vmem:[%s6312_s16 + $0x518] sm:$0xff] }
 0x36c   : > { %2282 = vmatpush.msra.mxu2 %v3633_v14 }
 0x36d   : > { %2239 = vmatpush.msrb.mxu3 %v3605_v15 }
 0x36e   : > { %2283 = vmatpush.msra.mxu2 %v3631_v6  ;;  %v3585_v6 = vld [vmem:[%s6312_s16 + $0x438] sm:$0xff] }
 0x36f   : > { %2240 = vmatpush.msrb.mxu3 %v3603_v18  ;;  %v3611_v18 = vld [vmem:[%s6312_s16 + $0x508] sm:$0xff] }
 0x370   : > { %3567 = vmatmul.msk.f32.gmra.mxu3 %vm688_vm0, %v1581_v44  ;;  %2284 = vmatpush.msra.mxu2 %v3629_v20  ;;  %v3583_v20 = vld [vmem:[%s6312_s16 + $0x428] sm:$0xff] }
 0x371   : > { %v5162_v41 = vpop.f32.mrf.mxu0  ;;  %v5164_v50 = vpop.f32.mrf.mxu1  ;;  %2241 = vmatpush.msrb.mxu3 %v3601_v24  ;;  %v3581_v24 = vld [vmem:[%s6312_s16 + $0x418] sm:$0xff] }
 0x372   : > { %6343 = vst [vmem:[#allocation6_spill] sm:$0xff] %v5162_v41  ;;  %2285 = vmatpush.msra.mxu2 %v3627_v28  ;;  %v3579_v28 = vld [vmem:[%s6312_s16 + $0x408] sm:$0xff] }
 0x373   : > { %6344 = vst [vmem:[#allocation7_spill] sm:$0xff] %v5164_v50  ;;  %3576 = vmatmul.msk.f32.gmra.mxu2 %vm688_vm0, %v1582_v40  ;;  %2242 = vmatpush.msrb.mxu3 %v3599_v29 }
 0x374   : > { %2286 = vmatpush.msra.mxu2 %v3625_v31 }
 0x375   : > { %2243 = vmatpush.msrb.mxu3 %v3597_v61 }
 0x376   : > { %2287 = vmatpush.msra.mxu2 %v3623_v52 }
 0x377   : > { %2244 = vmatpush.msrb.mxu3 %v3595_v42 }
 0x378   : > { %3568 = vmatmul.msk.f32.gmra.mxu3 %vm688_vm0, %v1582_v40  ;;  %v3593_v40 = vld [vmem:[%s6312_s16 + $0x478] sm:$0xff]  ;;  %2288 = vmatpush.msra.mxu2 %v3621_v34 }
 0x379   : > { %v5171_v30 = vpop.f32.mrf.mxu0  ;;  %v5173_v60 = vpop.f32.mrf.mxu1  ;;  %2245 = vmatpush.msrb.mxu3 %v3593_v40 }
 0x37b   : > { %3577 = vmatmul.msk.f32.gmra.mxu2 %vm688_vm0, %v1583_v51  ;;  %2246 = vmatpush.msrb.mxu3 %v3591_v49 }
 0x37d   : > { %2247 = vmatpush.msrb.mxu3 %v3589_v2 }
 0x37f   : > { %2248 = vmatpush.msrb.mxu3 %v3587_v10 }
 0x380   : > { %3569 = vmatmul.msk.f32.gmra.mxu3 %vm688_vm0, %v1583_v51  ;;  %v3619_v51 = vld [vmem:[%s6312_s16 + $0x548] sm:$0xff] }
 0x381   : > { %v5177_v0 = vpop.f32.mrf.mxu0  ;;  %v5179_v39 = vpop.f32.mrf.mxu1  ;;  %2289 = vmatpush.msra.mxu2 %v3619_v51  ;;  %2249 = vmatpush.msrb.mxu3 %v3585_v6 }
 0x382   : > { %v2217_v2 = vadd.f32 %v5179_v39, %v5177_v0 }
 0x383   : > { %2057 = vmatmul.f32.vlgmr.msrb.gmra.mxu2 %v4701_v13  ;;  %2250 = vmatpush.msrb.mxu3 %v3583_v20 }
 0x384   : > { %2290 = vmatpush.msra.mxu2 %v3617_v1 }
 0x385   : > { %2251 = vmatpush.msrb.mxu3 %v3581_v24 }
 0x386   : > { %2291 = vmatpush.msra.mxu2 %v3615_v9 }
 0x387   : > { %2252 = vmatpush.msrb.mxu3 %v3579_v28 }
 0x388   : > { %2016 = vmatmul.f32.vlgmr.msra.gmra.mxu3 %v4699_v12  ;;  %2292 = vmatpush.msra.mxu2 %v3613_v11 }
 0x389   : > { %v5192_v5 = vpop.f32.mrf.mxu0  ;;  %v5194_v8 = vpop.f32.mrf.mxu1 }
 0x38a   : > { %2293 = vmatpush.msra.mxu2 %v3611_v18  ;;  %v2220_v1 = vadd.f32 %v5194_v8, %v5192_v5 }
 0x38b   : > { %2060 = vmatmul.f32.gmra.mxu2 %v4727_v19 }
 0x390   : > { %2019 = vmatmul.f32.gmra.mxu3 %v4725_v4 }
 0x391   : > { %v5222_v3 = vpop.f32.mrf.mxu0  ;;  %v5224_v23 = vpop.f32.mrf.mxu1 }
 0x392   : > { %v2223_v49 = vadd.f32 %v5224_v23, %v5222_v3  ;;  %v5312_v3 = vld [vmem:[%s6317_s21] sm:$0xff] }
 0x393   : > { %2063 = vmatmul.f32.gmra.mxu2 %v4753_v27 }
 0x398   : > { %2022 = vmatmul.f32.gmra.mxu3 %v4751_v26 }
 0x399   : > { %v2184_v38 = vpop.f32.mrf.mxu0  ;;  %v2225_v44 = vpop.f32.mrf.mxu1 }
 0x39a   : > { %v2226_v51 = vadd.f32 %v2225_v44, %v2184_v38  ;;  %v2214_v38 = vadd.f32 %v5173_v60, %v5171_v30  ;;  %v5323_v30 = vld [vmem:[%s6317_s21 + $0x8] sm:$0xff] }
 0x39b   : > { %2066 = vmatmul.f32.gmra.mxu2 %v4779_v37 }
 0x3a0   : > { %2025 = vmatmul.f32.gmra.mxu3 %v4777_v35 }
 0x3a1   : > { %v2187_v14 = vpop.f32.mrf.mxu0  ;;  %v2228_v15 = vpop.f32.mrf.mxu1 }
 0x3a2   : > { %v2229_v40 = vadd.f32 %v2228_v15, %v2187_v14 }
 0x3a3   : > { %2069 = vmatmul.f32.gmra.mxu2 %v4805_v47 }
 0x3a8   : > { %2028 = vmatmul.f32.gmra.mxu3 %v4803_v46 }
 0x3a9   : > { %v2190_v29 = vpop.f32.mrf.mxu0  ;;  %v2231_v31 = vpop.f32.mrf.mxu1 }
 0x3aa   : > { %v2232_v34 = vadd.f32 %v2231_v31, %v2190_v29 }
 0x3ab   : > { %2072 = vmatmul.f32.gmra.mxu2 %v4831_v54 }
 0x3b0   : > { %2031 = vmatmul.f32.gmra.mxu3 %v4829_v53 }
 0x3b1   : > { %v2193_v61 = vpop.f32.mrf.mxu0 }
 0x3b2   : > { %v2234_v52 = vpop.f32.mrf.mxu1 }
 0x3b3   : > { %v2235_v42 = vadd.f32 %v2234_v52, %v2193_v61  ;;  %2075 = vmatmul.f32.gmra.mxu2 %v4845_v36 }
 0x3b5   : > { %2351 = vmatpush.msrb.mxu0 %v2235_v42 }
 0x3b7   : > { %2352 = vmatpush.msrb.mxu0 %v2232_v34 }
 0x3b8   : > { %2034 = vmatmul.f32.gmra.mxu3 %v4843_v57 }
 0x3b9   : > { %2353 = vmatpush.msrb.mxu0 %v2229_v40 }
 0x3bb   : > { %2354 = vmatpush.msrb.mxu0 %v2226_v51  ;;  %2078 = vmatmul.f32.gmra.mxu2 %v4853_v59 }
 0x3bd   : > { %2355 = vmatpush.msrb.mxu0 %v2223_v49 }
 0x3bf   : > { %2356 = vmatpush.msrb.mxu0 %v2220_v1 }
 0x3c0   : > { %2037 = vmatmul.f32.gmra.mxu3 %v4851_v58 }
 0x3c1   : > { %2357 = vmatpush.msrb.mxu0 %v2217_v2 }
 0x3c3   : > { %2358 = vmatpush.msrb.mxu0 %v2214_v38  ;;  %2294 = vmatmul.f32.vlgmr.msra.gmra.mxu2 %v4701_v13 }
 0x3c4   : > { %3642 = vmatmul.msk.f32.vlgmr.msrb.gmra.mxu0 %vm688_vm0, %v5312_v3 }
 0x3c6   : > { %v5317_v5 = vpop.f32.mrf.mxu2 }
 0x3c8   : > { %2253 = vmatmul.f32.vlgmr.msrb.gmra.mxu3 %v4699_v12  ;;  %v5336_v12 = vld [vmem:[%s6317_s21 + $0x10] sm:$0xff] }
 0x3cb   : > { %2297 = vmatmul.f32.gmra.mxu2 %v4727_v19  ;;  %v5326_v60 = vpop.f32.mrf.mxu3 }
 0x3cc   : > { %3643 = vmatmul.msk.f32.gmra.mxu0 %vm688_vm0, %v5323_v30 }
 0x3ce   : > { %v5330_v13 = vpop.f32.mrf.mxu2 }
 0x3d0   : > { %2256 = vmatmul.f32.gmra.mxu3 %v4725_v4  ;;  %v5349_v4 = vld [vmem:[%s6317_s21 + $0x18] sm:$0xff] }
 0x3d3   : > { %2300 = vmatmul.f32.gmra.mxu2 %v4753_v27  ;;  %v5339_v0 = vpop.f32.mrf.mxu3 }
 0x3d4   : > { %3644 = vmatmul.msk.f32.gmra.mxu0 %vm688_vm0, %v5336_v12 }
 0x3d6   : > { %v5343_v19 = vpop.f32.mrf.mxu2 }
 0x3d8   : > { %2259 = vmatmul.f32.gmra.mxu3 %v4751_v26  ;;  %v5362_v26 = vld [vmem:[%s6317_s21 + $0x20] sm:$0xff] }
 0x3db   : > { %2303 = vmatmul.f32.gmra.mxu2 %v4779_v37  ;;  %v5352_v39 = vpop.f32.mrf.mxu3 }
 0x3dc   : > { %3645 = vmatmul.msk.f32.gmra.mxu0 %vm688_vm0, %v5349_v4 }
 0x3de   : > { %v5356_v27 = vpop.f32.mrf.mxu2 }
 0x3e0   : > { %2262 = vmatmul.f32.gmra.mxu3 %v4777_v35  ;;  %v5375_v35 = vld [vmem:[%s6317_s21 + $0x28] sm:$0xff] }
 0x3e3   : > { %2306 = vmatmul.f32.gmra.mxu2 %v4805_v47  ;;  %v5365_v8 = vpop.f32.mrf.mxu3 }
 0x3e4   : > { %3646 = vmatmul.msk.f32.gmra.mxu0 %vm688_vm0, %v5362_v26 }
 0x3e6   : > { %v5369_v37 = vpop.f32.mrf.mxu2 }
 0x3e8   : > { %2265 = vmatmul.f32.gmra.mxu3 %v4803_v46  ;;  %v5388_v46 = vld [vmem:[%s6317_s21 + $0x30] sm:$0xff] }
 0x3eb   : > { %2309 = vmatmul.f32.gmra.mxu2 %v4831_v54  ;;  %v5378_v23 = vpop.f32.mrf.mxu3 }
 0x3ec   : > { %3647 = vmatmul.msk.f32.gmra.mxu0 %vm688_vm0, %v5375_v35 }
 0x3ee   : > { %v5382_v47 = vpop.f32.mrf.mxu2 }
 0x3ef   : > { %6345 = vst [vmem:[#allocation8_spill] sm:$0xff] %v5382_v47 }
 0x3f0   : > { %2268 = vmatmul.f32.gmra.mxu3 %v4829_v53  ;;  %v2089_v53 = vld [vmem:[%s6317_s21 + $0x38] sm:$0xff] }
 0x3f3   : > { %2312 = vmatmul.f32.gmra.mxu2 %v4845_v36  ;;  %v5391_v44 = vpop.f32.mrf.mxu3 }
 0x3f4   : > { %3648 = vmatmul.msk.f32.gmra.mxu0 %vm688_vm0, %v5388_v46 }
 0x3f6   : > { %v5395_v54 = vpop.f32.mrf.mxu2 }
 0x3f7   : > { %6346 = vst [vmem:[#allocation9_spill] sm:$0xff] %v5395_v54 }
 0x3f8   : > { %2271 = vmatmul.f32.gmra.mxu3 %v4843_v57 }
 0x3fb   : > { %2315 = vmatmul.f32.gmra.mxu2 %v4853_v59  ;;  %v5402_v9 = vpop.f32.mrf.mxu3 }
 0x3fc   : > { %6347 = vst [vmem:[#allocation10_spill] sm:$0xff] %v5402_v9  ;;  %3649 = vmatmul.msk.f32.gmra.mxu0 %vm688_vm0, %v2089_v53 }
 0x3fe   : > { %v5405_v36 = vpop.f32.mrf.mxu2 }
 0x3ff   : > { %6348 = vst [vmem:[#allocation11_spill] sm:$0xff] %v5405_v36 }
 0x400   : > { %2274 = vmatmul.f32.gmra.mxu3 %v4851_v58 }
 0x403   : > { %v5408_v10 = vpop.f32.mrf.mxu3 }
 0x404   : > { %6349 = vst [vmem:[#allocation12_spill] sm:$0xff] %v5408_v10 }
 0x406   : > { %v5410_v11 = vpop.f32.mrf.mxu2 }
 0x40b   : > { %v2017_v14 = vpop.f32.mrf.mxu3 }
 0x40e   : > { %v5412_v57 = vpop.f32.mrf.mxu2 }
 0x413   : > { %v5414_v15 = vpop.f32.mrf.mxu3 }
 0x416   : > { %v5416_v6 = vpop.f32.mrf.mxu2 }
 0x41b   : > { %v5418_v59 = vpop.f32.mrf.mxu3 }
 0x41e   : > { %v5420_v18 = vpop.f32.mrf.mxu2 }
 0x423   : > { %v5422_v20 = vpop.f32.mrf.mxu3 }
 0x426   : > { %v5424_v24 = vpop.f32.mrf.mxu2 }
 0x42b   : > { %v5426_v58 = vpop.f32.mrf.mxu3 }
 0x42e   : > { %v5428_v28 = vpop.f32.mrf.mxu2 }
 0x42f   : > { %6350 = vst [vmem:[#allocation13_spill] sm:$0xff] %v5428_v28 }
 0x433   : > { %v5430_v29 = vpop.f32.mrf.mxu3 }
 0x434   : > { %6351 = vst [vmem:[#allocation14_spill] sm:$0xff] %v5430_v29 }
 0x436   : > { %v5432_v31 = vpop.f32.mrf.mxu2 }
 0x437   : > { %6352 = vst [vmem:[#allocation15_spill] sm:$0xff] %v5432_v31 }
 0x43b   : > { %v5434_v61 = vpop.f32.mrf.mxu3 }
 0x43c   : > { %6353 = vst [vmem:[#allocation16_spill] sm:$0xff] %v5434_v61 }
 0x43e   : > { %v5436_v52 = vpop.f32.mrf.mxu2 }
 0x43f   : > { %6354 = vst [vmem:[#allocation17_spill] sm:$0xff] %v5436_v52 }
 0x443   : > { %v5438_v42 = vpop.f32.mrf.mxu3 }
 0x444   : > { %6355 = vst [vmem:[#allocation18_spill] sm:$0xff] %v5438_v42 }
 0x446   : > { %v2295_v34 = vpop.f32.mrf.mxu2 }
 0x44b   : > { %v2254_v40 = vpop.f32.mrf.mxu3 }
 0x44c   : > { %v2296_v47 = vadd.f32 %v2295_v34, %v2254_v40 }
 0x44e   : > { %v2298_v51 = vpop.f32.mrf.mxu2 }
 0x453   : > { %v2257_v49 = vpop.f32.mrf.mxu3 }
 0x454   : > { %v2299_v29 = vadd.f32 %v2298_v51, %v2257_v49 }
 0x456   : > { %v2301_v1 = vpop.f32.mrf.mxu2 }
 0x45b   : > { %v2260_v2 = vpop.f32.mrf.mxu3 }
 0x45c   : > { %v2302_v33 = vadd.f32 %v2301_v1, %v2260_v2  ;;  %v6356_v1 = vld [vmem:[#allocation8_spill] sm:$0xff]  ;;  %v6357_v2 = vld [vmem:[#allocation14_spill] sm:$0xff] }
 0x45e   : > { %v2304_v38 = vpop.f32.mrf.mxu2 }
 0x463   : > { %v2263_v43 = vpop.f32.mrf.mxu3 }
 0x464   : > { %v2305_v28 = vadd.f32 %v2304_v38, %v2263_v43  ;;  %v2360_v43 = vpop.f32.mrf.mxu0  ;;  %v2033_v38 = vadd.f32 %v6357_v2, %v6356_v1  ;;  %v2587_v1 = vld [vmem:[%s6314_s18 + $0x1a0] sm:$0xff]  ;;  %v2556_v2 = vld [vmem:[%s6314_s18 + $0xa8] sm:$0xff] }
 0x466   : > { %v2307_v50 = vpop.f32.mrf.mxu2 }
 0x46b   : > { %v2266_v36 = vpop.f32.mrf.mxu3 }
 0x46c   : > { %v2308_v9 = vadd.f32 %v2307_v50, %v2266_v36  ;;  %v2024_v36 = vadd.f32 %v5418_v59, %v5343_v19  ;;  %v1945_v19 = vadd.f32 %v5063_v55, %v5365_v8 }
 0x46e   : > { %v2310_v41 = vpop.f32.mrf.mxu2 }
 0x473   : > { %v2269_v10 = vpop.f32.mrf.mxu3 }
 0x474   : > { %v2311_v42 = vadd.f32 %v2310_v41, %v2269_v10  ;;  %v2441_v41 = vld [vmem:[%s6313_s17] sm:$0x3] }
 0x476   : > { %v2313_v25 = vpop.f32.mrf.mxu2 }
 0x47b   : > { %v2272_v31 = vpop.f32.mrf.mxu3 }
 0x47c   : > { %v2314_v52 = vadd.f32 %v2313_v25, %v2272_v31  ;;  %v2018_v25 = vadd.f32 %v2017_v14, %v5317_v5  ;;  %v2021_v5 = vadd.f32 %v5414_v15, %v5330_v13  ;;  %v1986_v31 = vadd.f32 %v5065_v63, %v1945_v19  ;;  %v2559_v19 = vld [vmem:[%s6314_s18 + $0xc0] sm:$0xff] }
 0x47e   : > { %v2316_v54 = vpop.f32.mrf.mxu2 }
 0x483   : > { %v2275_v61 = vpop.f32.mrf.mxu3 }
 0x484   : > { %v2317_v45 = vadd.f32 %v2316_v54, %v2275_v61 }
 0x486   : > { %2392 = vmatpush.msra.mxu1 %v2317_v45  ;;  %v1936_v45 = vadd.f32 %v4999_v21, %v5326_v60 }
 0x488   : > { %2393 = vmatpush.msra.mxu1 %v2314_v52  ;;  %v1977_v50 = vadd.f32 %v5001_v22, %v1936_v45 }
 0x48a   : > { %2394 = vmatpush.msra.mxu1 %v2311_v42  ;;  %v2030_v42 = vadd.f32 %v5426_v58, %v5369_v37  ;;  %v1951_v37 = vadd.f32 %v5129_v32, %v5391_v44  ;;  %v2565_v44 = vld [vmem:[%s6314_s18 + $0xf0] sm:$0xff] }
 0x48b   : > { %2599 = vmatpush.msra.mxu3 %v2565_v44  ;;  %v2554_v44 = vld [vmem:[%s6314_s18 + $0x98] sm:$0xff] }
 0x48c   : > { %2395 = vmatpush.msra.mxu1 %v2308_v9  ;;  %v1942_v9 = vadd.f32 %v5030_v7, %v5352_v39  ;;  %v2065_v7 = vadd.f32 %v5416_v6, %v2024_v36  ;;  %v2071_v49 = vadd.f32 %v5424_v24, %v2030_v42  ;;  %v6363_v36 = vld [vmem:[#allocation16_spill] sm:$0xff] }
 0x48d   : > { %v2589_v42 = vld [vmem:[%s6314_s18 + $0x1b0] sm:$0xff] }
 0x48e   : > { %2396 = vmatpush.msra.mxu1 %v2305_v28  ;;  %v1983_v14 = vadd.f32 %v5032_v48, %v1942_v9  ;;  %v2027_v28 = vadd.f32 %v5422_v20, %v5356_v27  ;;  %v1948_v27 = vadd.f32 %v5096_v16, %v5378_v23  ;;  %v2561_v9 = vld [vmem:[%s6314_s18 + $0xd0] sm:$0xff] }
 0x490   : > { %2397 = vmatpush.msra.mxu1 %v2302_v33  ;;  %v2363_v33 = vpop.f32.mrf.mxu0  ;;  %v2068_v55 = vadd.f32 %v5420_v18, %v2027_v28  ;;  %v1989_v40 = vadd.f32 %v5098_v17, %v1948_v27  ;;  %v6365_v27 = vld [vmem:[#allocation15_spill] sm:$0xff] }
 0x492   : > { %2398 = vmatpush.msra.mxu1 %v2299_v29 }
 0x494   : > { %2399 = vmatpush.msra.mxu1 %v2296_v47 }
 0x495   : > { %3650 = vmatmul.msk.f32.vlgmr.msra.gmra.mxu1 %vm688_vm0, %v5312_v3  ;;  %v2425_v3 = vadd.f32 %v2360_v43, %v1977_v50 }
 0x498   : > { %v2366_v60 = vpop.f32.mrf.mxu0 }
 0x499   : > { %v2429_v15 = vadd.f32 %v2366_v60, %v1983_v14 }
 0x49d   : > { %3651 = vmatmul.msk.f32.gmra.mxu1 %vm688_vm0, %v5323_v30  ;;  %v5462_v30 = vperm.slane %v2441_v41, 0 }
 0x49f   : > { %v5472_v47 = vadd.f32 %v5462_v30, %v2425_v3  ;;  %v5500_v29 = vadd.f32 %v5462_v30, %v2429_v15  ;;  %v2597_v3 = vld [vmem:[%s6314_s18 + $0x1f0] sm:$0xff] }
 0x4a0   : > { %2640 = vmatpush.msrb.mxu2 %v2597_v3  ;;  %v2593_v15 = vld [vmem:[%s6314_s18 + $0x1d0] sm:$0xff] }
 0x4a5   : > { %3652 = vmatmul.msk.f32.gmra.mxu1 %vm688_vm0, %v5336_v12  ;;  %v2059_v12 = vadd.f32 %v5410_v11, %v2018_v25  ;;  %v2369_v11 = vpop.f32.mrf.mxu0 }
 0x4a6   : > { %v2431_v52 = vadd.f32 %v2369_v11, %v1986_v31 }
 0x4a8   : > { %v5514_v34 = vadd.f32 %v5462_v30, %v2431_v52  ;;  %v2592_v52 = vld [vmem:[%s6314_s18 + $0x1c8] sm:$0xff] }
 0x4ad   : > { %3653 = vmatmul.msk.f32.gmra.mxu1 %vm688_vm0, %v5349_v4  ;;  %v5465_v4 = vperm.slane %v2441_v41, 1  ;;  %v2372_v6 = vpop.f32.mrf.mxu0  ;;  %v6359_v41 = vld [vmem:[#allocation13_spill] sm:$0xff] }
 0x4ae   : > { %v2433_v18 = vadd.f32 %v2372_v6, %v1989_v40  ;;  %v2074_v50 = vadd.f32 %v6359_v41, %v2033_v38  ;;  %v2560_v6 = vld [vmem:[%s6314_s18 + $0xc8] sm:$0xff]  ;;  %v2558_v40 = vld [vmem:[%s6314_s18 + $0xb8] sm:$0xff] }
 0x4af   : > { %v2588_v38 = vld [vmem:[%s6314_s18 + $0x1a8] sm:$0xff] }
 0x4b0   : > { %v5528_v43 = vadd.f32 %v5462_v30, %v2433_v18  ;;  %v2590_v18 = vld [vmem:[%s6314_s18 + $0x1b8] sm:$0xff] }
 0x4b5   : > { %3654 = vmatmul.msk.f32.gmra.mxu1 %vm688_vm0, %v5362_v26  ;;  %v2375_v16 = vpop.f32.mrf.mxu0 }
 0x4bd   : > { %3655 = vmatmul.msk.f32.gmra.mxu1 %vm688_vm0, %v5375_v35  ;;  %v1939_v35 = vadd.f32 %v5008_v56, %v5339_v0  ;;  %v2062_v56 = vadd.f32 %v5412_v57, %v2021_v5  ;;  %v2598_v5 = vld [vmem:[%s6314_s18 + $0x1f8] sm:$0xff] }
 0x4be   : > { %2722 = vmatpush.msrb.mxu1 %v2598_v5  ;;  %v2583_v5 = vld [vmem:[%s6314_s18 + $0x180] sm:$0xff] }
 0x4c5   : > { %3656 = vmatmul.msk.f32.gmra.mxu1 %vm688_vm0, %v5388_v46  ;;  %v1980_v46 = vadd.f32 %v5010_v62, %v1939_v35  ;;  %v6361_v35 = vld [vmem:[#allocation4_spill] sm:$0xff] }
 0x4cd   : > { %3657 = vmatmul.msk.f32.gmra.mxu1 %vm688_vm0, %v2089_v53  ;;  %v2427_v53 = vadd.f32 %v2363_v33, %v1980_v46  ;;  %v6358_v33 = vld [vmem:[#allocation3_spill] sm:$0xff]  ;;  %v2563_v46 = vld [vmem:[%s6314_s18 + $0xe0] sm:$0xff] }
 0x4ce   : > { %v1992_v45 = vadd.f32 %v6358_v33, %v1951_v37  ;;  %2600 = vmatpush.msra.mxu3 %v2563_v46  ;;  %v2553_v33 = vld [vmem:[%s6314_s18 + $0x90] sm:$0xff]  ;;  %v2552_v46 = vld [vmem:[%s6314_s18 + $0x88] sm:$0xff] }
 0x4cf   : > { %v5486_v10 = vadd.f32 %v5462_v30, %v2427_v53  ;;  %v2378_v53 = vpop.f32.mrf.mxu0 }
 0x4d0   : > { %v2435_v25 = vadd.f32 %v2375_v16, %v1992_v45  ;;  %2601 = vmatpush.msra.mxu3 %v2561_v9  ;;  %v6366_v16 = vld [vmem:[#allocation12_spill] sm:$0xff]  ;;  %v6368_v45 = vld [vmem:[#allocation11_spill] sm:$0xff] }
 0x4d1   : > { %v2549_v9 = vld [vmem:[%s6314_s18 + $0x70] sm:$0xff] }
 0x4d2   : > { %v5569_v14 = vadd.f32 %v5462_v30, %v2435_v25  ;;  %2602 = vmatpush.msra.mxu3 %v2559_v19  ;;  %v2579_v19 = vld [vmem:[%s6314_s18 + $0x160] sm:$0xff] }
 0x4d7   : > { %v2381_v3 = vpop.f32.mrf.mxu0 }
 0x512   : > { %v2401_v26 = vpop.f32.mrf.mxu1 }
 0x513   : > { %v2426_v21 = vadd.f32 %v2401_v26, %v2059_v12  ;;  %v2566_v12 = vld [vmem:[%s6314_s18 + $0xf8] sm:$0xff]  ;;  %v6360_v26 = vld [vmem:[#allocation10_spill] sm:$0xff] }
 0x514   : > { %2681 = vmatpush.msra.mxu0 %v2566_v12  ;;  %v2586_v12 = vld [vmem:[%s6314_s18 + $0x198] sm:$0xff] }
 0x515   : > { %v5475_v22 = vadd.f32 %v5465_v4, %v2426_v21  ;;  %v1954_v21 = vadd.f32 %v6361_v35, %v6360_v26  ;;  %v6370_v26 = vld [vmem:[#allocation7_spill] sm:$0xff] }
 0x517   : > { %v2463_v54 = vmax.f32 %v5472_v47, %v5475_v22 }
 0x519   : > { %2464 = vmax.xlane.f32.xlu0 %v2463_v54  ;;  %v2595_v54 = vld [vmem:[%s6314_s18 + $0x1e0] sm:$0xff] }
 0x51a   : > { %v2404_v0 = vpop.f32.mrf.mxu1  ;;  %2641 = vmatpush.msrb.mxu2 %v2595_v54  ;;  %v2584_v54 = vld [vmem:[%s6314_s18 + $0x188] sm:$0xff] }
 0x51b   : > { %v2428_v13 = vadd.f32 %v2404_v0, %v2062_v56  ;;  %v2564_v56 = vld [vmem:[%s6314_s18 + $0xe8] sm:$0xff] }
 0x51c   : > { %v2596_v0 = vld [vmem:[%s6314_s18 + $0x1e8] sm:$0xff]  ;;  %2682 = vmatpush.msra.mxu0 %v2564_v56  ;;  %2642 = vmatpush.msrb.mxu2 %v2593_v15  ;;  %v6371_v56 = vld [vmem:[#allocation17_spill] sm:$0xff] }
 0x51d   : > { %v5489_v62 = vadd.f32 %v5465_v4, %v2428_v13  ;;  %v6362_v13 = vld [vmem:[#allocation9_spill] sm:$0xff]  ;;  %2723 = vmatpush.msrb.mxu1 %v2596_v0 }
 0x51e   : > { %v2036_v11 = vadd.f32 %v6363_v36, %v6362_v13  ;;  %v2581_v13 = vld [vmem:[%s6314_s18 + $0x170] sm:$0xff]  ;;  %v2582_v15 = vld [vmem:[%s6314_s18 + $0x178] sm:$0xff] }
 0x51f   : > { %v2466_v57 = vmax.f32 %v5486_v10, %v5489_v62 }
 0x521   : > { %2467 = vmax.xlane.f32.xlu1 %v2466_v57 }
 0x522   : > { %v2407_v39 = vpop.f32.mrf.mxu1 }
 0x523   : > { %v2430_v59 = vadd.f32 %v2407_v39, %v2065_v7  ;;  %v2562_v7 = vld [vmem:[%s6314_s18 + $0xd8] sm:$0xff] }
 0x524   : > { %v2594_v39 = vld [vmem:[%s6314_s18 + $0x1d8] sm:$0xff]  ;;  %2683 = vmatpush.msra.mxu0 %v2562_v7 }
 0x525   : > { %v5503_v48 = vadd.f32 %v5465_v4, %v2430_v59  ;;  %v6364_v59 = vld [vmem:[#allocation5_spill] sm:$0xff]  ;;  %2724 = vmatpush.msrb.mxu1 %v2594_v39  ;;  %v2547_v39 = vld [vmem:[%s6314_s18 + $0x60] sm:$0xff] }
 0x526   : > { %v1995_v28 = vadd.f32 %v6364_v59, %v1954_v21  ;;  %2684 = vmatpush.msra.mxu0 %v2560_v6  ;;  %v2548_v59 = vld [vmem:[%s6314_s18 + $0x68] sm:$0xff] }
 0x527   : > { %v2469_v61 = vmax.f32 %v5500_v29, %v5503_v48  ;;  %2725 = vmatpush.msrb.mxu1 %v2592_v52  ;;  %v1241_v52 = vld [vmem:[%s6309_s13] sm:$0xff] }
 0x528   : > { %2685 = vmatpush.msra.mxu0 %v2558_v40  ;;  %v2576_v40 = vld [vmem:[%s6314_s18 + $0x148] sm:$0xff] }
 0x529   : > { %2470 = vmax.xlane.f32.xlu0 %v2469_v61  ;;  %v2591_v61 = vld [vmem:[%s6314_s18 + $0x1c0] sm:$0xff]  ;;  %2726 = vmatpush.msrb.mxu1 %v2590_v18  ;;  %v2573_v18 = vld [vmem:[%s6314_s18 + $0x130] sm:$0xff] }
 0x52a   : > { %v2410_v8 = vpop.f32.mrf.mxu1  ;;  %2643 = vmatpush.msrb.mxu2 %v2591_v61  ;;  %2686 = vmatpush.msra.mxu0 %v2556_v2  ;;  %v2537_v2 = vld [vmem:[%s6314_s18 + $0x10] sm:$0xff] }
 0x52b   : > { %v2432_v20 = vadd.f32 %v2410_v8, %v2068_v55  ;;  %v2557_v55 = vld [vmem:[%s6314_s18 + $0xb0] sm:$0xff]  ;;  %v2437_v8 = vadd.f32 %v2378_v53, %v1995_v28  ;;  %2727 = vmatpush.msrb.mxu1 %v2588_v38  ;;  %v2580_v28 = vld [vmem:[%s6314_s18 + $0x168] sm:$0xff] }
 0x52c   : > { %2603 = vmatpush.msra.mxu3 %v2557_v55  ;;  %2644 = vmatpush.msrb.mxu2 %v2589_v42  ;;  %v2546_v55 = vld [vmem:[%s6314_s18 + $0x58] sm:$0xff]  ;;  %v2544_v42 = vld [vmem:[%s6314_s18 + $0x48] sm:$0xff]  ;;  %v2569_v38 = vld [vmem:[%s6314_s18 + $0x110] sm:$0xff] }
 0x52d   : > { %v5517_v63 = vadd.f32 %v5465_v4, %v2432_v20  ;;  %v2077_v20 = vadd.f32 %v6365_v27, %v2036_v11  ;;  %v5631_v41 = vadd.f32 %v5462_v30, %v2437_v8  ;;  %2687 = vmatpush.msra.mxu0 %v2554_v44  ;;  %2728 = vmatpush.msrb.mxu1 %v2586_v12  ;;  %v2550_v11 = vld [vmem:[%s6314_s18 + $0x78] sm:$0xff]  ;;  %v2543_v27 = vld [vmem:[%s6314_s18 + $0x40] sm:$0xff]  ;;  %v2568_v44 = vld [vmem:[%s6314_s18 + $0x108] sm:$0xff] }
 0x52e   : > { %2645 = vmatpush.msrb.mxu2 %v2587_v1  ;;  %v2578_v8 = vld [vmem:[%s6314_s18 + $0x158] sm:$0xff]  ;;  %v2572_v1 = vld [vmem:[%s6314_s18 + $0x128] sm:$0xff] }
 0x52f   : > { %v2472_v51 = vmax.f32 %v5514_v34, %v5517_v63  ;;  %2688 = vmatpush.msra.mxu0 %v2552_v46  ;;  %2729 = vmatpush.msrb.mxu1 %v2584_v54 }
 0x531   : > { %2473 = vmax.xlane.f32.xlu1 %v2472_v51  ;;  %2689 = vmatpush.msra.mxu0 %v2550_v11 }
 0x532   : > { %v2413_v23 = vpop.f32.mrf.mxu1  ;;  %2730 = vmatpush.msrb.mxu1 %v2582_v15 }
 0x533   : > { %v2434_v58 = vadd.f32 %v2413_v23, %v2071_v49  ;;  %v2555_v49 = vld [vmem:[%s6314_s18 + $0xa0] sm:$0xff]  ;;  %2690 = vmatpush.msra.mxu0 %v2548_v59 }
 0x534   : > { %v6367_v23 = vld [vmem:[#allocation6_spill] sm:$0xff]  ;;  %2604 = vmatpush.msra.mxu3 %v2555_v49  ;;  %2731 = vmatpush.msrb.mxu1 %v2580_v28  ;;  %v2542_v49 = vld [vmem:[%s6314_s18 + $0x38] sm:$0xff] }
 0x535   : > { %v5531_v17 = vadd.f32 %v5465_v4, %v2434_v58  ;;  %v1957_v37 = vadd.f32 %v6367_v23, %v6366_v16  ;;  %2691 = vmatpush.msra.mxu0 %v2546_v55  ;;  %v2574_v16 = vld [vmem:[%s6314_s18 + $0x138] sm:$0xff]  ;;  %v2539_v23 = vld [vmem:[%s6314_s18 + $0x20] sm:$0xff] }
 0x536   : > { %2605 = vmatpush.msra.mxu3 %v2553_v33  ;;  %2732 = vmatpush.msrb.mxu1 %v2578_v8  ;;  %v2538_v33 = vld [vmem:[%s6314_s18 + $0x18] sm:$0xff] }
 0x537   : > { %v2475_v24 = vmax.f32 %v5528_v43, %v5531_v17  ;;  %v1998_v35 = vadd.f32 %v6370_v26, %v1957_v37  ;;  %2692 = vmatpush.msra.mxu0 %v2544_v42  ;;  %v2571_v37 = vld [vmem:[%s6314_s18 + $0x120] sm:$0xff] }
 0x538   : > { %2733 = vmatpush.msrb.mxu1 %v2576_v40 }
 0x539   : > { %2476 = vmax.xlane.f32.xlu0 %v2475_v24  ;;  %v6369_v24 = vld [vmem:[#allocation18_spill] sm:$0xff]  ;;  %v2439_v53 = vadd.f32 %v2381_v3, %v1998_v35  ;;  %2693 = vmatpush.msra.mxu0 %v2542_v49  ;;  %v3721_v49 = vld [vmem:[%s6315_s19 + $0x2f8] sm:$0xff] }
 0x53a   : > { %v2416_v32 = vpop.f32.mrf.mxu1  ;;  %v2039_v25 = vadd.f32 %v6369_v24, %v6368_v45  ;;  %2734 = vmatpush.msrb.mxu1 %v2574_v16  ;;  %v2570_v45 = vld [vmem:[%s6314_s18 + $0x118] sm:$0xff]  ;;  %v2535_v24 = vld [vmem:[%s6314_s18] sm:$0xff]  ;;  %v2889_v16 = vld [vmem:[%s6315_s19 + $0xf0] sm:$0xff] }
 0x53b   : > { %v2436_v60 = vadd.f32 %v2416_v32, %v2074_v50  ;;  %v2585_v32 = vld [vmem:[%s6314_s18 + $0x190] sm:$0xff] }
 0x53c   : > { %2646 = vmatpush.msrb.mxu2 %v2585_v32  ;;  %v2080_v0 = vadd.f32 %v6371_v56, %v2039_v25  ;;  %2735 = vmatpush.msrb.mxu1 %v2572_v1  ;;  %v2567_v25 = vld [vmem:[%s6314_s18 + $0x100] sm:$0xff]  ;;  %v2536_v32 = vld [vmem:[%s6314_s18 + $0x8] sm:$0xff]  ;;  %v2874_v1 = vld [vmem:[%s6315_s19 + $0x78] sm:$0xff] }
 0x53d   : > { %v5572_v57 = vadd.f32 %v5465_v4, %v2436_v60  ;;  %v2551_v60 = vld [vmem:[%s6314_s18 + $0x80] sm:$0xff] }
 0x53e   : > { %2606 = vmatpush.msra.mxu3 %v2551_v60  ;;  %2647 = vmatpush.msrb.mxu2 %v2583_v5 }
 0x53f   : > { %v2478_v31 = vmax.f32 %v5569_v14, %v5572_v57  ;;  %2736 = vmatpush.msrb.mxu1 %v2570_v45 }
 0x540   : > { %2607 = vmatpush.msra.mxu3 %v2549_v9  ;;  %2648 = vmatpush.msrb.mxu2 %v2581_v13 }
 0x541   : > { %2479 = vmax.xlane.f32.xlu1 %v2478_v31  ;;  %v5686_v31 = vadd.f32 %v5462_v30, %v2439_v53  ;;  %v2545_v30 = vld [vmem:[%s6314_s18 + $0x50] sm:$0xff]  ;;  %2737 = vmatpush.msrb.mxu1 %v2568_v44 }
 0x542   : > { %v2419_v51 = vpop.f32.mrf.mxu1  ;;  %2608 = vmatpush.msra.mxu3 %v2547_v39  ;;  %2649 = vmatpush.msrb.mxu2 %v2579_v19 }
 0x543   : > { %v2438_v58 = vadd.f32 %v2419_v51, %v2077_v20  ;;  %v2575_v20 = vld [vmem:[%s6314_s18 + $0x140] sm:$0xff]  ;;  %v2541_v51 = vld [vmem:[%s6314_s18 + $0x30] sm:$0xff]  ;;  %3080 = vmatpush.msra.mxu1 %v3721_v49 }
 0x544   : > { %2609 = vmatpush.msra.mxu3 %v2545_v30  ;;  %v2871_v49 = vld [vmem:[%s6315_s19 + $0x60] sm:$0xff] }
 0x545   : > { %v5634_v50 = vadd.f32 %v5465_v4, %v2438_v58  ;;  %v2540_v58 = vld [vmem:[%s6314_s18 + $0x28] sm:$0xff] }
 0x546   : > { %2610 = vmatpush.msra.mxu3 %v2543_v27  ;;  %2694 = vmatpush.msra.mxu0 %v2540_v58  ;;  %v3719_v58 = vld [vmem:[%s6315_s19 + $0x2e8] sm:$0xff] }
 0x547   : > { %v2481_v21 = vmax.f32 %v5631_v41, %v5634_v50 }
 0x548   : > { %2611 = vmatpush.msra.mxu3 %v2541_v51  ;;  %2695 = vmatpush.msra.mxu0 %v2538_v33  ;;  %v2873_v33 = vld [vmem:[%s6315_s19 + $0x70] sm:$0xff] }
 0x549   : > { %2482 = vmax.xlane.f32.xlu2 %v2481_v21 }
 0x54a   : > { %v2422_v36 = vpop.f32.mrf.mxu1  ;;  %2612 = vmatpush.msra.mxu3 %v2539_v23  ;;  %2696 = vmatpush.msra.mxu0 %v2536_v32  ;;  %v3720_v23 = vld [vmem:[%s6315_s19 + $0x2f0] sm:$0xff] }
 0x54b   : > { %v2440_v7 = vadd.f32 %v2422_v36, %v2080_v0  ;;  %3081 = vmatpush.msra.mxu1 %v3720_v23  ;;  %v3702_v23 = vld [vmem:[%s6315_s19 + $0x260] sm:$0xff] }
 0x54c   : > { %2613 = vmatpush.msra.mxu3 %v2537_v2  ;;  %v3705_v2 = vld [vmem:[%s6315_s19 + $0x278] sm:$0xff] }
 0x54d   : > { %v5689_v61 = vadd.f32 %v5465_v4, %v2440_v7  ;;  %v2577_v4 = vld [vmem:[%s6314_s18 + $0x150] sm:$0xff]  ;;  %3039 = vmatpush.msrb.mxu0 %v3705_v2  ;;  %3082 = vmatpush.msra.mxu1 %v3719_v58  ;;  %v2870_v58 = vld [vmem:[%s6315_s19 + $0x58] sm:$0xff] }
 0x54e   : > { %2650 = vmatpush.msrb.mxu2 %v2577_v4  ;;  %2614 = vmatpush.msra.mxu3 %v2535_v24  ;;  %v3701_v2 = vld [vmem:[%s6315_s19 + $0x258] sm:$0xff] }
 0x54f   : > { %v2484_v6 = vmax.f32 %v5686_v31, %v5689_v61 }
 0x550   : > { %2651 = vmatpush.msrb.mxu2 %v2575_v20  ;;  %2891 = vmatpush.msrb.mxu3 %v2874_v1  ;;  %v2883_v1 = vld [vmem:[%s6315_s19 + $0xc0] sm:$0xff] }
 0x551   : > { %2485 = vmax.xlane.f32.xlu0 %v2484_v6 }
 0x552   : > { %2652 = vmatpush.msrb.mxu2 %v2573_v18  ;;  %v2890_v18 = vld [vmem:[%s6315_s19 + $0xf8] sm:$0xff]  ;;  %2892 = vmatpush.msrb.mxu3 %v2873_v33  ;;  %v2869_v33 = vld [vmem:[%s6315_s19 + $0x50] sm:$0xff] }
 0x554   : > { %2653 = vmatpush.msrb.mxu2 %v2571_v37  ;;  %v2888_v37 = vld [vmem:[%s6315_s19 + $0xe8] sm:$0xff] }
 0x556   : > { %2654 = vmatpush.msrb.mxu2 %v2569_v38 }
 0x558   : > { %2655 = vmatpush.msrb.mxu2 %v2567_v25  ;;  %v3704_v25 = vld [vmem:[%s6315_s19 + $0x270] sm:$0xff] }
 0x559   : > { %3040 = vmatpush.msrb.mxu0 %v3704_v25  ;;  %v3713_v25 = vld [vmem:[%s6315_s19 + $0x2b8] sm:$0xff] }
 0x55a   : > { %1244 = vperm.xlu1 %3799, %v1241_v52   ;;  %2932 = vmatpush.msra.mxu2 %v2890_v18 }
 0x55c   : > { %2933 = vmatpush.msra.mxu2 %v2889_v16  ;;  %v2884_v16 = vld [vmem:[%s6315_s19 + $0xc8] sm:$0xff] }
 0x55e   : > { %2934 = vmatpush.msra.mxu2 %v2888_v37  ;;  %v3715_v37 = vld [vmem:[%s6315_s19 + $0x2c8] sm:$0xff] }
 0x58c   : > { %v2465_v3 = vpop.xlane.xlu0 %2464 }
 0x58d   : > { %v2487_v12 = vsub.f32 %v5472_v47, %v2465_v3  ;;  %v2488_v26 = vsub.f32 %v5475_v22, %v2465_v3 }
 0x58f   : > { %v2503_v35 = vmul.f32 1.442695, %v2487_v12  ;;  %v2505_v21 = vmul.f32 1.442695, %v2488_v26  ;;  %v2887_v12 = vld [vmem:[%s6315_s19 + $0xe0] sm:$0xff] }
 0x590   : > { %v3718_v26 = vld [vmem:[%s6315_s19 + $0x2e0] sm:$0xff]  ;;  %2935 = vmatpush.msra.mxu2 %v2887_v12  ;;  %v3699_v12 = vld [vmem:[%s6315_s19 + $0x248] sm:$0xff] }
 0x591   : > { %3800 = vpow2.f32 %v2503_v35  ;;  %3083 = vmatpush.msra.mxu1 %v3718_v26  ;;  %v3712_v26 = vld [vmem:[%s6315_s19 + $0x2b0] sm:$0xff] }
 0x592   : > { %3802 = vpow2.f32 %v2505_v21  ;;  %v2872_v21 = vld [vmem:[%s6315_s19 + $0x68] sm:$0xff] }
 0x593   : > { %2893 = vmatpush.msrb.mxu3 %v2872_v21  ;;  %v2867_v21 = vld [vmem:[%s6315_s19 + $0x40] sm:$0xff] }
 0x594   : > { %v2468_v60 = vpop.xlane.xlu1 %2467 }
 0x595   : > { %v2489_v5 = vsub.f32 %v5486_v10, %v2468_v60  ;;  %v2490_v46 = vsub.f32 %v5489_v62, %v2468_v60  ;;  %v3703_v60 = vld [vmem:[%s6315_s19 + $0x268] sm:$0xff]  ;;  %2894 = vmatpush.msrb.mxu3 %v2871_v49  ;;  %v2863_v49 = vld [vmem:[%s6315_s19 + $0x20] sm:$0xff] }
 0x596   : > { %3041 = vmatpush.msrb.mxu0 %v3703_v60  ;;  %v2880_v60 = vld [vmem:[%s6315_s19 + $0xa8] sm:$0xff] }
 0x597   : > { %v5772_v54 = vpop.eup %3800  ;;  %v2507_v53 = vmul.f32 1.442695, %v2489_v5  ;;  %v2509_v56 = vmul.f32 1.442695, %v2490_v46  ;;  %v2886_v5 = vld [vmem:[%s6315_s19 + $0xd8] sm:$0xff]  ;;  %2895 = vmatpush.msrb.mxu3 %v2870_v58 }
 0x598   : > { %v5774_v0 = vpop.eup %3802  ;;  %2615 = vmatmul.f32.vlgmr.msra.gmra.mxu3 %v5772_v54  ;;  %2697 = vmatmul.f32.vlgmr.msra.gmra.mxu0 %v5772_v54  ;;  %v3717_v46 = vld [vmem:[%s6315_s19 + $0x2d8] sm:$0xff] }
 0x599   : > { %3804 = vpow2.f32 %v2507_v53  ;;  %2656 = vmatmul.f32.vlgmr.msrb.gmra.mxu2 %v5774_v0  ;;  %2738 = vmatmul.f32.vlgmr.msrb.gmra.mxu1 %v5774_v0  ;;  %v2885_v53 = vld [vmem:[%s6315_s19 + $0xd0] sm:$0xff]  ;;  %v2862_v58 = vld [vmem:[%s6315_s19 + $0x18] sm:$0xff] }
 0x59a   : > { %3806 = vpow2.f32 %v2509_v56  ;;  %v3716_v56 = vld [vmem:[%s6315_s19 + $0x2d0] sm:$0xff]  ;;  %2936 = vmatpush.msra.mxu2 %v2886_v5  ;;  %3084 = vmatpush.msra.mxu1 %v3717_v46  ;;  %v3698_v5 = vld [vmem:[%s6315_s19 + $0x240] sm:$0xff]  ;;  %v3711_v46 = vld [vmem:[%s6315_s19 + $0x2a8] sm:$0xff] }
 0x59b   : > { %3042 = vmatpush.msrb.mxu0 %v3702_v23  ;;  %2896 = vmatpush.msrb.mxu3 %v2869_v33  ;;  %v3694_v23 = vld [vmem:[%s6315_s19 + $0x220] sm:$0xff]  ;;  %v2861_v33 = vld [vmem:[%s6315_s19 + $0x10] sm:$0xff] }
 0x59c   : > { %v2471_v9 = vpop.xlane.xlu0 %2470  ;;  %2937 = vmatpush.msra.mxu2 %v2885_v53  ;;  %3085 = vmatpush.msra.mxu1 %v3716_v56  ;;  %v2866_v53 = vld [vmem:[%s6315_s19 + $0x38] sm:$0xff]  ;;  %v2879_v56 = vld [vmem:[%s6315_s19 + $0xa0] sm:$0xff] }
 0x59d   : > { %v2491_v13 = vsub.f32 %v5500_v29, %v2471_v9  ;;  %v2492_v36 = vsub.f32 %v5503_v48, %v2471_v9  ;;  %3043 = vmatpush.msrb.mxu0 %v3701_v2  ;;  %v3693_v2 = vld [vmem:[%s6315_s19 + $0x218] sm:$0xff] }
 0x59e   : > { %2938 = vmatpush.msra.mxu2 %v2884_v16  ;;  %3086 = vmatpush.msra.mxu1 %v3715_v37  ;;  %v2876_v16 = vld [vmem:[%s6315_s19 + $0x88] sm:$0xff] }
 0x59f   : > { %v5782_v11 = vpop.eup %3804  ;;  %v2511_v15 = vmul.f32 1.442695, %v2491_v13  ;;  %v2513_v7 = vmul.f32 1.442695, %v2492_v36  ;;  %v3707_v37 = vld [vmem:[%s6315_s19 + $0x288] sm:$0xff] }
 0x5a0   : > { %v5784_v39 = vpop.eup %3806  ;;  %2618 = vmatmul.f32.gmra.mxu3 %v5782_v11  ;;  %2700 = vmatmul.f32.gmra.mxu0 %v5782_v11 }
 0x5a1   : > { %3808 = vpow2.f32 %v2511_v15  ;;  %2659 = vmatmul.f32.gmra.mxu2 %v5784_v39  ;;  %2741 = vmatmul.f32.gmra.mxu1 %v5784_v39 }
 0x5a2   : > { %3810 = vpow2.f32 %v2513_v7  ;;  %2939 = vmatpush.msra.mxu2 %v2883_v1  ;;  %v2875_v1 = vld [vmem:[%s6315_s19 + $0x80] sm:$0xff] }
 0x5a4   : > { %v2474_v19 = vpop.xlane.xlu1 %2473 }
 0x5a5   : > { %v2493_v59 = vsub.f32 %v5514_v34, %v2474_v19  ;;  %v2494_v28 = vsub.f32 %v5517_v63, %v2474_v19 }
 0x5a7   : > { %v5792_v6 = vpop.eup %3808  ;;  %v2515_v52 = vmul.f32 1.442695, %v2493_v59  ;;  %v2517_v30 = vmul.f32 1.442695, %v2494_v28 }
 0x5a8   : > { %v5794_v4 = vpop.eup %3810  ;;  %2621 = vmatmul.f32.gmra.mxu3 %v5792_v6  ;;  %2703 = vmatmul.f32.gmra.mxu0 %v5792_v6 }
 0x5a9   : > { %3812 = vpow2.f32 %v2515_v52  ;;  %2662 = vmatmul.f32.gmra.mxu2 %v5794_v4  ;;  %2744 = vmatmul.f32.gmra.mxu1 %v5794_v4 }
 0x5aa   : > { %3814 = vpow2.f32 %v2517_v30 }
 0x5ac   : > { %v2477_v55 = vpop.xlane.xlu0 %2476 }
 0x5ad   : > { %v2495_v8 = vsub.f32 %v5528_v43, %v2477_v55  ;;  %v2496_v27 = vsub.f32 %v5531_v17, %v2477_v55 }
 0x5af   : > { %v5802_v20 = vpop.eup %3812  ;;  %v2519_v42 = vmul.f32 1.442695, %v2495_v8  ;;  %v2521_v40 = vmul.f32 1.442695, %v2496_v27 }
 0x5b0   : > { %v5804_v51 = vpop.eup %3814  ;;  %2624 = vmatmul.f32.gmra.mxu3 %v5802_v20  ;;  %2706 = vmatmul.f32.gmra.mxu0 %v5802_v20 }
 0x5b1   : > { %3816 = vpow2.f32 %v2519_v42  ;;  %2665 = vmatmul.f32.gmra.mxu2 %v5804_v51  ;;  %2747 = vmatmul.f32.gmra.mxu1 %v5804_v51 }
 0x5b2   : > { %3818 = vpow2.f32 %v2521_v40 }
 0x5b4   : > { %v2480_v38 = vpop.xlane.xlu1 %2479 }
 0x5b5   : > { %v2497_v45 = vsub.f32 %v5569_v14, %v2480_v38  ;;  %v2498_v24 = vsub.f32 %v5572_v57, %v2480_v38  ;;  %v3714_v38 = vld [vmem:[%s6315_s19 + $0x2c0] sm:$0xff] }
 0x5b6   : > { %3087 = vmatpush.msra.mxu1 %v3714_v38  ;;  %v3706_v38 = vld [vmem:[%s6315_s19 + $0x280] sm:$0xff] }
 0x5b7   : > { %v5842_v32 = vpop.eup %3816  ;;  %v2523_v44 = vmul.f32 1.442695, %v2497_v45  ;;  %v2525_v3 = vmul.f32 1.442695, %v2498_v24  ;;  %v2882_v45 = vld [vmem:[%s6315_s19 + $0xb8] sm:$0xff]  ;;  %v3700_v24 = vld [vmem:[%s6315_s19 + $0x250] sm:$0xff] }
 0x5b8   : > { %v5850_v35 = vpop.eup %3818  ;;  %2627 = vmatmul.f32.gmra.mxu3 %v5842_v32  ;;  %2709 = vmatmul.f32.gmra.mxu0 %v5842_v32 }
 0x5b9   : > { %3820 = vpow2.f32 %v2523_v44  ;;  %2668 = vmatmul.f32.gmra.mxu2 %v5850_v35  ;;  %2750 = vmatmul.f32.gmra.mxu1 %v5850_v35  ;;  %v2868_v44 = vld [vmem:[%s6315_s19 + $0x48] sm:$0xff] }
 0x5ba   : > { %3822 = vpow2.f32 %v2525_v3  ;;  %2940 = vmatpush.msra.mxu2 %v2882_v45  ;;  %3044 = vmatpush.msrb.mxu0 %v3700_v24  ;;  %v2881_v3 = vld [vmem:[%s6315_s19 + $0xb0] sm:$0xff]  ;;  %v2860_v24 = vld [vmem:[%s6315_s19 + $0x8] sm:$0xff] }
 0x5bb   : > { %3088 = vmatpush.msra.mxu1 %v3713_v25  ;;  %2897 = vmatpush.msrb.mxu3 %v2868_v44  ;;  %v3692_v45 = vld [vmem:[%s6315_s19 + $0x210] sm:$0xff]  ;;  %v3691_v25 = vld [vmem:[%s6315_s19 + $0x208] sm:$0xff]  ;;  %v2859_v44 = vld [vmem:[%s6315_s19] sm:$0xff] }
 0x5bc   : > { %v2483_v9 = vpop.xlane.xlu2 %2482  ;;  %2941 = vmatpush.msra.mxu2 %v2881_v3  ;;  %3045 = vmatpush.msrb.mxu0 %v3699_v12  ;;  %v3690_v3 = vld [vmem:[%s6315_s19 + $0x200] sm:$0xff] }
 0x5bd   : > { %v2499_v13 = vsub.f32 %v5631_v41, %v2483_v9  ;;  %v2500_v36 = vsub.f32 %v5634_v50, %v2483_v9  ;;  %3089 = vmatpush.msra.mxu1 %v3712_v26  ;;  %2898 = vmatpush.msrb.mxu3 %v2867_v21  ;;  %v3697_v9 = vld [vmem:[%s6315_s19 + $0x238] sm:$0xff] }
 0x5be   : > { %2942 = vmatpush.msra.mxu2 %v2880_v60  ;;  %3046 = vmatpush.msrb.mxu0 %v3698_v5 }
 0x5bf   : > { %v5876_v15 = vpop.eup %3820  ;;  %v2527_v7 = vmul.f32 1.442695, %v2499_v13  ;;  %v2529_v19 = vmul.f32 1.442695, %v2500_v36  ;;  %3090 = vmatpush.msra.mxu1 %v3711_v46  ;;  %2899 = vmatpush.msrb.mxu3 %v2866_v53  ;;  %v3710_v13 = vld [vmem:[%s6315_s19 + $0x2a0] sm:$0xff]  ;;  %v2865_v36 = vld [vmem:[%s6315_s19 + $0x30] sm:$0xff] }
 0x5c0   : > { %v5878_v59 = vpop.eup %3822  ;;  %2630 = vmatmul.f32.gmra.mxu3 %v5876_v15  ;;  %2712 = vmatmul.f32.gmra.mxu0 %v5876_v15 }
 0x5c1   : > { %3824 = vpow2.f32 %v2527_v7  ;;  %2671 = vmatmul.f32.gmra.mxu2 %v5878_v59  ;;  %2753 = vmatmul.f32.gmra.mxu1 %v5878_v59  ;;  %v2878_v7 = vld [vmem:[%s6315_s19 + $0x98] sm:$0xff] }
 0x5c2   : > { %3826 = vpow2.f32 %v2529_v19  ;;  %2943 = vmatpush.msra.mxu2 %v2879_v56  ;;  %3047 = vmatpush.msrb.mxu0 %v3697_v9  ;;  %v3696_v19 = vld [vmem:[%s6315_s19 + $0x230] sm:$0xff] }
 0x5c3   : > { %3091 = vmatpush.msra.mxu1 %v3710_v13  ;;  %2900 = vmatpush.msrb.mxu3 %v2865_v36 }
 0x5c4   : > { %v2486_v28 = vpop.xlane.xlu0 %2485  ;;  %2944 = vmatpush.msra.mxu2 %v2878_v7  ;;  %3048 = vmatpush.msrb.mxu0 %v3696_v19 }
 0x5c5   : > { %v2501_v52 = vsub.f32 %v5686_v31, %v2486_v28  ;;  %v2502_v30 = vsub.f32 %v5689_v61, %v2486_v28  ;;  %v3709_v28 = vld [vmem:[%s6315_s19 + $0x298] sm:$0xff] }
 0x5c6   : > { %3092 = vmatpush.msra.mxu1 %v3709_v28 }
 0x5c7   : > { %v5886_v55 = vpop.eup %3824  ;;  %v2531_v8 = vmul.f32 1.442695, %v2501_v52  ;;  %v2533_v27 = vmul.f32 1.442695, %v2502_v30  ;;  %v2864_v52 = vld [vmem:[%s6315_s19 + $0x28] sm:$0xff]  ;;  %v2877_v30 = vld [vmem:[%s6315_s19 + $0x90] sm:$0xff] }
 0x5c8   : > { %v5888_v42 = vpop.eup %3826  ;;  %2633 = vmatmul.f32.gmra.mxu3 %v5886_v55  ;;  %2715 = vmatmul.f32.gmra.mxu0 %v5886_v55 }
 0x5c9   : > { %3828 = vpow2.f32 %v2531_v8  ;;  %2674 = vmatmul.f32.gmra.mxu2 %v5888_v42  ;;  %2756 = vmatmul.f32.gmra.mxu1 %v5888_v42  ;;  %v3695_v8 = vld [vmem:[%s6315_s19 + $0x228] sm:$0xff] }
 0x5ca   : > { %3830 = vpow2.f32 %v2533_v27  ;;  %2901 = vmatpush.msrb.mxu3 %v2864_v52  ;;  %2945 = vmatpush.msra.mxu2 %v2877_v30  ;;  %v3708_v27 = vld [vmem:[%s6315_s19 + $0x290] sm:$0xff] }
 0x5cb   : > { %3049 = vmatpush.msrb.mxu0 %v3695_v8  ;;  %3093 = vmatpush.msra.mxu1 %v3708_v27 }
 0x5cc   : > { %2902 = vmatpush.msrb.mxu3 %v2863_v49  ;;  %2946 = vmatpush.msra.mxu2 %v2876_v16 }
 0x5cd   : > { %3050 = vmatpush.msrb.mxu0 %v3694_v23  ;;  %3094 = vmatpush.msra.mxu1 %v3707_v37 }
 0x5ce   : > { %2903 = vmatpush.msrb.mxu3 %v2862_v58  ;;  %2947 = vmatpush.msra.mxu2 %v2875_v1 }
 0x5cf   : > { %v5894_v40 = vpop.eup %3828  ;;  %3051 = vmatpush.msrb.mxu0 %v3693_v2  ;;  %3095 = vmatpush.msra.mxu1 %v3706_v38 }
 0x5d0   : > { %v5896_v18 = vpop.eup %3830  ;;  %2636 = vmatmul.f32.gmra.mxu3 %v5894_v40  ;;  %2718 = vmatmul.f32.gmra.mxu0 %v5894_v40 }
 0x5d1   : > { %2677 = vmatmul.f32.gmra.mxu2 %v5896_v18  ;;  %2759 = vmatmul.f32.gmra.mxu1 %v5896_v18 }
 0x5d2   : > { %2904 = vmatpush.msrb.mxu3 %v2861_v33  ;;  %3052 = vmatpush.msrb.mxu0 %v3692_v45 }
 0x5d4   : > { %2905 = vmatpush.msrb.mxu3 %v2860_v24  ;;  %3053 = vmatpush.msrb.mxu0 %v3691_v25 }
 0x5d6   : > { %2906 = vmatpush.msrb.mxu3 %v2859_v44  ;;  %3054 = vmatpush.msrb.mxu0 %v3690_v3 }
 0x615   : > { %v2698_v12 = vpop.f32.mrf.mxu0 }
 0x616   : > { %v2739_v26 = vpop.f32.mrf.mxu1 }
 0x617   : > { %v2740_v21 = vadd.f32 %v2739_v26, %v2698_v12 }
 0x619   : > { %3832 = vrcp.f32 %v2740_v21 }
 0x61b   : > { %v2616_v60 = vpop.f32.mrf.mxu3 }
 0x61c   : > { %v2657_v5 = vpop.f32.mrf.mxu2 }
 0x61d   : > { %v2658_v46 = vadd.f32 %v2657_v5, %v2616_v60  ;;  %v2701_v53 = vpop.f32.mrf.mxu0 }
 0x61e   : > { %v2742_v56 = vpop.f32.mrf.mxu1 }
 0x61f   : > { %v3833_v9 = vpop.eup %3832  ;;  %3834 = vrcp.f32 %v2658_v46  ;;  %v2743_v13 = vadd.f32 %v2742_v56, %v2701_v53 }
 0x620   : > { %v2780_v36 = vmul.f32 %v3833_v9, %v2740_v21  ;;  %v3672_v21 = vld [vmem:[%s6315_s19 + $0x170] sm:$0xff] }
 0x621   : > { %3836 = vrcp.f32 %v2743_v13 }
 0x622   : > { %v2796_v7 = vsub.f32 2.0, %v2780_v36 }
 0x623   : > { %v2619_v19 = vpop.f32.mrf.mxu3 }
 0x624   : > { %v2812_v28 = vmul.f32 %v3833_v9, %v2796_v7  ;;  %v2660_v52 = vpop.f32.mrf.mxu2  ;;  %v3671_v9 = vld [vmem:[%s6315_s19 + $0x168] sm:$0xff]  ;;  %v3689_v7 = vld [vmem:[%s6315_s19 + $0x1f8] sm:$0xff] }
 0x625   : > { %v3835_v30 = vpop.eup %3834  ;;  %v2661_v8 = vadd.f32 %v2660_v52, %v2619_v19  ;;  %v2704_v27 = vpop.f32.mrf.mxu0  ;;  %3203 = vmatpush.msra.mxu0 %v3689_v7  ;;  %v3683_v7 = vld [vmem:[%s6315_s19 + $0x1c8] sm:$0xff] }
 0x626   : > { %v2828_v49 = vmul.f32 %v5774_v0, %v2812_v28  ;;  %v2779_v16 = vmul.f32 %v3835_v30, %v2658_v46  ;;  %v2745_v23 = vpop.f32.mrf.mxu1  ;;  %v3673_v0 = vld [vmem:[%s6315_s19 + $0x178] sm:$0xff] }
 0x627   : > { %v3837_v37 = vpop.eup %3836  ;;  %3838 = vrcp.f32 %v2661_v8  ;;  %v2746_v58 = vadd.f32 %v2745_v23, %v2704_v27  ;;  %3162 = vmatpush.msrb.mxu2 %v3673_v0 }
 0x628   : > { %v6042_v1 = vmul.f32 %v2828_v49, %v5475_v22  ;;  %v2795_v2 = vsub.f32 2.0, %v2779_v16  ;;  %v2782_v38 = vmul.f32 %v3837_v37, %v2743_v13 }
 0x629   : > { %3840 = vrcp.f32 %v2746_v58  ;;  %3163 = vmatpush.msrb.mxu2 %v3672_v21 }
 0x62a   : > { %v2811_v33 = vmul.f32 %v3835_v30, %v2795_v2  ;;  %v2798_v45 = vsub.f32 2.0, %v2782_v38  ;;  %2948 = vmatmul.f32.vlgmr.msra.gmra.mxu2 %v6042_v1  ;;  %3096 = vmatmul.f32.vlgmr.msra.gmra.mxu1 %v6042_v1  ;;  %v3688_v30 = vld [vmem:[%s6315_s19 + $0x1f0] sm:$0xff]  ;;  %v3687_v2 = vld [vmem:[%s6315_s19 + $0x1e8] sm:$0xff] }
 0x62b   : > { %v2622_v24 = vpop.f32.mrf.mxu3  ;;  %3164 = vmatpush.msrb.mxu2 %v3671_v9  ;;  %3204 = vmatpush.msra.mxu0 %v3688_v30 }
 0x62c   : > { %v2827_v25 = vmul.f32 %v5772_v54, %v2811_v33  ;;  %v2814_v44 = vmul.f32 %v3837_v37, %v2798_v45  ;;  %v2663_v3 = vpop.f32.mrf.mxu2 }
 0x62d   : > { %v3839_v22 = vpop.eup %3838  ;;  %v2664_v12 = vadd.f32 %v2663_v3, %v2622_v24  ;;  %v2707_v26 = vpop.f32.mrf.mxu0  ;;  %3205 = vmatpush.msra.mxu0 %v3687_v2  ;;  %v3680_v2 = vld [vmem:[%s6315_s19 + $0x1b0] sm:$0xff] }
 0x62e   : > { %v6054_v60 = vmul.f32 %v2827_v25, %v5472_v47  ;;  %v2781_v5 = vmul.f32 %v3839_v22, %v2661_v8  ;;  %v2748_v46 = vpop.f32.mrf.mxu1  ;;  %v2830_v53 = vmul.f32 %v5784_v39, %v2814_v44  ;;  %v3670_v39 = vld [vmem:[%s6315_s19 + $0x160] sm:$0xff]  ;;  %v3667_v25 = vld [vmem:[%s6315_s19 + $0x148] sm:$0xff] }
 0x62f   : > { %v3841_v56 = vpop.eup %3840  ;;  %3842 = vrcp.f32 %v2664_v12  ;;  %v2749_v54 = vadd.f32 %v2748_v46, %v2707_v26  ;;  %3165 = vmatpush.msrb.mxu2 %v3670_v39  ;;  %v3686_v44 = vld [vmem:[%s6315_s19 + $0x1e0] sm:$0xff]  ;;  %v3684_v46 = vld [vmem:[%s6315_s19 + $0x1d0] sm:$0xff] }
 0x630   : > { %v2797_v13 = vsub.f32 2.0, %v2781_v5  ;;  %v2784_v36 = vmul.f32 %v3841_v56, %v2746_v58  ;;  %2907 = vmatmul.f32.vlgmr.msrb.gmra.mxu3 %v6054_v60  ;;  %3055 = vmatmul.f32.vlgmr.msrb.gmra.mxu0 %v6054_v60  ;;  %v6063_v47 = vmul.f32 %v2830_v53, %v5489_v62  ;;  %v3669_v62 = vld [vmem:[%s6315_s19 + $0x158] sm:$0xff]  ;;  %v3668_v58 = vld [vmem:[%s6315_s19 + $0x150] sm:$0xff] }
 0x631   : > { %3844 = vrcp.f32 %v2749_v54  ;;  %3166 = vmatpush.msrb.mxu2 %v3669_v62  ;;  %3206 = vmatpush.msra.mxu0 %v3686_v44  ;;  %v3664_v39 = vld [vmem:[%s6315_s19 + $0x130] sm:$0xff] }
 0x632   : > { %v2813_v19 = vmul.f32 %v3839_v22, %v2797_v13  ;;  %v2800_v28 = vsub.f32 2.0, %v2784_v36  ;;  %2951 = vmatmul.f32.gmra.mxu2 %v6063_v47  ;;  %3099 = vmatmul.f32.gmra.mxu1 %v6063_v47 }
 0x633   : > { %v2625_v52 = vpop.f32.mrf.mxu3  ;;  %3167 = vmatpush.msrb.mxu2 %v3668_v58 }
 0x634   : > { %v2816_v8 = vmul.f32 %v3841_v56, %v2800_v28  ;;  %v2666_v27 = vpop.f32.mrf.mxu2  ;;  %v2829_v49 = vmul.f32 %v5782_v11, %v2813_v19 }
 0x635   : > { %v3843_v16 = vpop.eup %3842  ;;  %v2667_v23 = vadd.f32 %v2666_v27, %v2625_v52  ;;  %v2710_v37 = vpop.f32.mrf.mxu0  ;;  %3168 = vmatpush.msrb.mxu2 %v3667_v25  ;;  %v3682_v27 = vld [vmem:[%s6315_s19 + $0x1c0] sm:$0xff]  ;;  %v3679_v25 = vld [vmem:[%s6315_s19 + $0x1a8] sm:$0xff] }
 0x636   : > { %v2783_v38 = vmul.f32 %v3843_v16, %v2664_v12  ;;  %v2751_v33 = vpop.f32.mrf.mxu1  ;;  %v6087_v45 = vmul.f32 %v2829_v49, %v5486_v10  ;;  %v2832_v11 = vmul.f32 %v5794_v4, %v2816_v8  ;;  %v3666_v4 = vld [vmem:[%s6315_s19 + $0x140] sm:$0xff]  ;;  %v3685_v12 = vld [vmem:[%s6315_s19 + $0x1d8] sm:$0xff]  ;;  %v3663_v8 = vld [vmem:[%s6315_s19 + $0x128] sm:$0xff] }
 0x637   : > { %v3845_v24 = vpop.eup %3844  ;;  %3846 = vrcp.f32 %v2667_v23  ;;  %v2752_v0 = vadd.f32 %v2751_v33, %v2710_v37  ;;  %3169 = vmatpush.msrb.mxu2 %v3666_v4  ;;  %3207 = vmatpush.msra.mxu0 %v3685_v12 }
 0x638   : > { %v2799_v3 = vsub.f32 2.0, %v2783_v38  ;;  %v2786_v22 = vmul.f32 %v3845_v24, %v2749_v54  ;;  %2910 = vmatmul.f32.gmra.mxu3 %v6087_v45  ;;  %3058 = vmatmul.f32.gmra.mxu0 %v6087_v45  ;;  %v6099_v10 = vmul.f32 %v2832_v11, %v5503_v48  ;;  %v3665_v48 = vld [vmem:[%s6315_s19 + $0x138] sm:$0xff] }
 0x639   : > { %3848 = vrcp.f32 %v2752_v0  ;;  %3170 = vmatpush.msrb.mxu2 %v3665_v48  ;;  %3208 = vmatpush.msra.mxu0 %v3684_v46 }
 0x63a   : > { %v2815_v26 = vmul.f32 %v3843_v16, %v2799_v3  ;;  %v2802_v21 = vsub.f32 2.0, %v2786_v22  ;;  %2954 = vmatmul.f32.gmra.mxu2 %v6099_v10  ;;  %3102 = vmatmul.f32.gmra.mxu1 %v6099_v10 }
 0x63b   : > { %v2628_v5 = vpop.f32.mrf.mxu3  ;;  %3171 = vmatpush.msrb.mxu2 %v3664_v39  ;;  %3209 = vmatpush.msra.mxu0 %v3683_v7 }
 0x63c   : > { %v2818_v53 = vmul.f32 %v3845_v24, %v2802_v21  ;;  %v2669_v56 = vpop.f32.mrf.mxu2  ;;  %v2831_v54 = vmul.f32 %v5792_v6, %v2815_v26  ;;  %v3659_v21 = vld [vmem:[%s6315_s19 + $0x108] sm:$0xff] }
 0x63d   : > { %v3847_v9 = vpop.eup %3846  ;;  %v2670_v13 = vadd.f32 %v2669_v56, %v2628_v5  ;;  %v2713_v36 = vpop.f32.mrf.mxu0  ;;  %3172 = vmatpush.msrb.mxu2 %v3663_v8  ;;  %3210 = vmatpush.msra.mxu0 %v3682_v27  ;;  %v3678_v5 = vld [vmem:[%s6315_s19 + $0x1a0] sm:$0xff] }
 0x63e   : > { %v2785_v19 = vmul.f32 %v3847_v9, %v2667_v23  ;;  %v2754_v28 = vpop.f32.mrf.mxu1  ;;  %v6123_v52 = vmul.f32 %v2831_v54, %v5500_v29  ;;  %v2834_v6 = vmul.f32 %v5804_v51, %v2818_v53  ;;  %v3662_v51 = vld [vmem:[%s6315_s19 + $0x120] sm:$0xff]  ;;  %v3681_v23 = vld [vmem:[%s6315_s19 + $0x1b8] sm:$0xff] }
 0x63f   : > { %v3849_v62 = vpop.eup %3848  ;;  %3850 = vrcp.f32 %v2670_v13  ;;  %v2755_v30 = vadd.f32 %v2754_v28, %v2713_v36  ;;  %3173 = vmatpush.msrb.mxu2 %v3662_v51  ;;  %3211 = vmatpush.msra.mxu0 %v3681_v23  ;;  %v3677_v54 = vld [vmem:[%s6315_s19 + $0x198] sm:$0xff]  ;;  %v3675_v28 = vld [vmem:[%s6315_s19 + $0x188] sm:$0xff]  ;;  %v3674_v51 = vld [vmem:[%s6315_s19 + $0x180] sm:$0xff] }
 0x640   : > { %v2801_v49 = vsub.f32 2.0, %v2785_v19  ;;  %v2788_v16 = vmul.f32 %v3849_v62, %v2752_v0  ;;  %2913 = vmatmul.f32.gmra.mxu3 %v6123_v52  ;;  %3061 = vmatmul.f32.gmra.mxu0 %v6123_v52  ;;  %v6135_v29 = vmul.f32 %v2834_v6, %v5517_v63  ;;  %v3661_v63 = vld [vmem:[%s6315_s19 + $0x118] sm:$0xff]  ;;  %v3660_v0 = vld [vmem:[%s6315_s19 + $0x110] sm:$0xff] }
 0x641   : > { %3852 = vrcp.f32 %v2755_v30  ;;  %3174 = vmatpush.msrb.mxu2 %v3661_v63  ;;  %3212 = vmatpush.msra.mxu0 %v3680_v2 }
 0x642   : > { %v2817_v37 = vmul.f32 %v3847_v9, %v2801_v49  ;;  %v2804_v58 = vsub.f32 2.0, %v2788_v16  ;;  %2957 = vmatmul.f32.gmra.mxu2 %v6135_v29  ;;  %3105 = vmatmul.f32.gmra.mxu1 %v6135_v29 }
 0x643   : > { %v2631_v38 = vpop.f32.mrf.mxu3  ;;  %3175 = vmatpush.msrb.mxu2 %v3660_v0  ;;  %3213 = vmatpush.msra.mxu0 %v3679_v25 }
 0x644   : > { %v2820_v33 = vmul.f32 %v3849_v62, %v2804_v58  ;;  %v2672_v11 = vpop.f32.mrf.mxu2  ;;  %v2833_v24 = vmul.f32 %v5802_v20, %v2817_v37 }
 0x645   : > { %v3851_v44 = vpop.eup %3850  ;;  %v2673_v3 = vadd.f32 %v2672_v11, %v2631_v38  ;;  %v2716_v22 = vpop.f32.mrf.mxu0  ;;  %3176 = vmatpush.msrb.mxu2 %v3659_v21  ;;  %3214 = vmatpush.msra.mxu0 %v3678_v5 }
 0x646   : > { %v2787_v4 = vmul.f32 %v3851_v44, %v2670_v13  ;;  %v2757_v12 = vpop.f32.mrf.mxu1  ;;  %v6159_v26 = vmul.f32 %v2833_v24, %v5514_v34  ;;  %v2836_v20 = vmul.f32 %v5850_v35, %v2820_v33  ;;  %v3658_v35 = vld [vmem:[%s6315_s19 + $0x100] sm:$0xff] }
 0x647   : > { %v3853_v48 = vpop.eup %3852  ;;  %3854 = vrcp.f32 %v2673_v3  ;;  %v2758_v46 = vadd.f32 %v2757_v12, %v2716_v22  ;;  %3177 = vmatpush.msrb.mxu2 %v3658_v35  ;;  %3215 = vmatpush.msra.mxu0 %v3677_v54 }
 0x648   : > { %v2803_v53 = vsub.f32 2.0, %v2787_v4  ;;  %v2790_v56 = vmul.f32 %v3853_v48, %v2755_v30  ;;  %2916 = vmatmul.f32.gmra.mxu3 %v6159_v26  ;;  %3064 = vmatmul.f32.gmra.mxu0 %v6159_v26  ;;  %v6171_v34 = vmul.f32 %v2836_v20, %v5531_v17  ;;  %v3676_v17 = vld [vmem:[%s6315_s19 + $0x190] sm:$0xff] }
 0x649   : > { %3856 = vrcp.f32 %v2758_v46  ;;  %3216 = vmatpush.msra.mxu0 %v3676_v17 }
 0x64a   : > { %v2819_v9 = vmul.f32 %v3851_v44, %v2803_v53  ;;  %v2806_v13 = vsub.f32 2.0, %v2790_v56  ;;  %2960 = vmatmul.f32.gmra.mxu2 %v6171_v34  ;;  %3108 = vmatmul.f32.gmra.mxu1 %v6171_v34 }
 0x64b   : > { %v2634_v36 = vpop.f32.mrf.mxu3  ;;  %3217 = vmatpush.msra.mxu0 %v3675_v28 }
 0x64c   : > { %v2822_v39 = vmul.f32 %v3853_v48, %v2806_v13  ;;  %v2675_v7 = vpop.f32.mrf.mxu2  ;;  %v2835_v19 = vmul.f32 %v5842_v32, %v2819_v9 }
 0x64d   : > { %v3855_v6 = vpop.eup %3854  ;;  %v2676_v62 = vadd.f32 %v2675_v7, %v2634_v36  ;;  %v2719_v30 = vpop.f32.mrf.mxu0  ;;  %3218 = vmatpush.msra.mxu0 %v3674_v51 }
 0x64e   : > { %v2789_v8 = vmul.f32 %v3855_v6, %v2673_v3  ;;  %v2760_v27 = vpop.f32.mrf.mxu1  ;;  %v2851_v49 = vmul.f32 %v2835_v19, %v5528_v43  ;;  %v2838_v16 = vmul.f32 %v5878_v59, %v2822_v39 }
 0x64f   : > { %v3857_v23 = vpop.eup %3856  ;;  %3858 = vrcp.f32 %v2676_v62  ;;  %v2761_v32 = vadd.f32 %v2760_v27, %v2719_v30 }
 0x650   : > { %v2805_v37 = vsub.f32 2.0, %v2789_v8  ;;  %v2792_v58 = vmul.f32 %v3857_v23, %v2758_v46  ;;  %2919 = vmatmul.f32.gmra.mxu3 %v2851_v49  ;;  %3067 = vmatmul.f32.gmra.mxu0 %v2851_v49  ;;  %v2854_v63 = vmul.f32 %v2838_v16, %v5572_v57 }
 0x651   : > { %3860 = vrcp.f32 %v2761_v32 }
 0x652   : > { %v2821_v2 = vmul.f32 %v3855_v6, %v2805_v37  ;;  %v2808_v43 = vsub.f32 2.0, %v2792_v58  ;;  %2963 = vmatmul.f32.gmra.mxu2 %v2854_v63  ;;  %3111 = vmatmul.f32.gmra.mxu1 %v2854_v63 }
 0x653   : > { %v2637_v59 = vpop.f32.mrf.mxu3 }
 0x654   : > { %v2824_v38 = vmul.f32 %v3857_v23, %v2808_v43  ;;  %v2678_v33 = vpop.f32.mrf.mxu2  ;;  %v2837_v11 = vmul.f32 %v5876_v15, %v2821_v2 }
 0x655   : > { %v3859_v24 = vpop.eup %3858  ;;  %v2679_v0 = vadd.f32 %v2678_v33, %v2637_v59 }
 0x656   : > { %v2791_v25 = vmul.f32 %v3859_v24, %v2676_v62  ;;  %v2853_v44 = vmul.f32 %v2837_v11, %v5569_v14  ;;  %v2840_v3 = vmul.f32 %v5888_v42, %v2824_v38 }
 0x657   : > { %v3861_v22 = vpop.eup %3860  ;;  %3862 = vrcp.f32 %v2679_v0 }
 0x658   : > { %v2807_v57 = vsub.f32 2.0, %v2791_v25  ;;  %v2794_v4 = vmul.f32 %v3861_v22, %v2761_v32  ;;  %2922 = vmatmul.f32.gmra.mxu3 %v2853_v44  ;;  %3070 = vmatmul.f32.gmra.mxu0 %v2853_v44  ;;  %v2856_v12 = vmul.f32 %v2840_v3, %v5634_v50 }
 0x65a   : > { %v2823_v20 = vmul.f32 %v3859_v24, %v2807_v57  ;;  %v2810_v21 = vsub.f32 2.0, %v2794_v4  ;;  %2966 = vmatmul.f32.gmra.mxu2 %v2856_v12  ;;  %3114 = vmatmul.f32.gmra.mxu1 %v2856_v12  ;;  %v3865_v4 = vld [vmem:[%s6316_s20] sm:$0xff] }
 0x65c   : > { %v2826_v15 = vmul.f32 %v3861_v22, %v2810_v21  ;;  %v2839_v5 = vmul.f32 %v5886_v55, %v2823_v20  ;;  %v3864_v22 = vld [vmem:[%s6317_s21] sm:$0xff]  ;;  %v3867_v20 = vld [vmem:[%s6316_s20 + $0x8] sm:$0xff]  ;;  %v3868_v21 = vld [vmem:[%s6317_s21 + $0x10] sm:$0xff] }
 0x65d   : > { %v3863_v48 = vpop.eup %3862 }
 0x65e   : > { %v2793_v46 = vmul.f32 %v3863_v48, %v2679_v0  ;;  %v2855_v14 = vmul.f32 %v2839_v5, %v5631_v41  ;;  %v2842_v42 = vmul.f32 %v5896_v18, %v2826_v15  ;;  %v3869_v15 = vld [vmem:[%s6316_s20 + $0x10] sm:$0xff]  ;;  %v3870_v5 = vld [vmem:[%s6317_s21 + $0x18] sm:$0xff] }
 0x660   : > { %v2809_v53 = vsub.f32 2.0, %v2793_v46  ;;  %2925 = vmatmul.f32.gmra.mxu3 %v2855_v14  ;;  %3073 = vmatmul.f32.gmra.mxu0 %v2855_v14  ;;  %v2858_v56 = vmul.f32 %v2842_v42, %v5689_v61  ;;  %v3872_v46 = vld [vmem:[%s6317_s21 + $0x20] sm:$0xff]  ;;  %v3874_v42 = vld [vmem:[%s6317_s21 + $0x28] sm:$0xff] }
 0x662   : > { %v2825_v35 = vmul.f32 %v3863_v48, %v2809_v53  ;;  %2969 = vmatmul.f32.gmra.mxu2 %v2858_v56  ;;  %3117 = vmatmul.f32.gmra.mxu1 %v2858_v56  ;;  %v3871_v48 = vld [vmem:[%s6316_s20 + $0x18] sm:$0xff]  ;;  %v3875_v53 = vld [vmem:[%s6316_s20 + $0x28] sm:$0xff] }
 0x664   : > { %v2841_v50 = vmul.f32 %v5894_v40, %v2825_v35  ;;  %v3877_v35 = vld [vmem:[%s6316_s20 + $0x30] sm:$0xff] }
 0x666   : > { %v2857_v54 = vmul.f32 %v2841_v50, %v5686_v31  ;;  %v3878_v50 = vld [vmem:[%s6317_s21 + $0x38] sm:$0xff] }
 0x668   : > { %2928 = vmatmul.f32.gmra.mxu3 %v2857_v54  ;;  %3076 = vmatmul.f32.gmra.mxu0 %v2857_v54 }
 0x66a   : > { %3178 = vmatmul.f32.vlgmr.msrb.gmra.mxu2 %v6054_v60 }
 0x670   : > { %3219 = vmatmul.f32.vlgmr.msra.gmra.mxu0 %v6042_v1 }
 0x672   : > { %3181 = vmatmul.f32.gmra.mxu2 %v6087_v45 }
 0x678   : > { %3222 = vmatmul.f32.gmra.mxu0 %v6063_v47 }
 0x67a   : > { %3184 = vmatmul.f32.gmra.mxu2 %v6123_v52 }
 0x680   : > { %3225 = vmatmul.f32.gmra.mxu0 %v6099_v10 }
 0x682   : > { %3187 = vmatmul.f32.gmra.mxu2 %v6159_v26 }
 0x688   : > { %3228 = vmatmul.f32.gmra.mxu0 %v6135_v29 }
 0x68a   : > { %3190 = vmatmul.f32.gmra.mxu2 %v2851_v49 }
 0x690   : > { %3231 = vmatmul.f32.gmra.mxu0 %v6171_v34 }
 0x692   : > { %3193 = vmatmul.f32.gmra.mxu2 %v2853_v44 }
 0x698   : > { %3234 = vmatmul.f32.gmra.mxu0 %v2854_v63 }
 0x69a   : > { %3196 = vmatmul.f32.gmra.mxu2 %v2855_v14  ;;  %v3873_v14 = vld [vmem:[%s6316_s20 + $0x20] sm:$0xff] }
 0x6a0   : > { %3237 = vmatmul.f32.gmra.mxu0 %v2856_v12  ;;  %v3866_v12 = vld [vmem:[%s6317_s21 + $0x8] sm:$0xff] }
 0x6a2   : > { %3199 = vmatmul.f32.gmra.mxu2 %v2857_v54  ;;  %v3879_v54 = vld [vmem:[%s6316_s20 + $0x38] sm:$0xff] }
 0x6a7   : > { %v3097_v41 = vpop.f32.mrf.mxu1 }
 0x6a8   : > { %3240 = vmatmul.f32.gmra.mxu0 %v2858_v56  ;;  %v3876_v56 = vld [vmem:[%s6317_s21 + $0x30] sm:$0xff] }
 0x6ad   : > { %v2949_v31 = vpop.f32.mrf.mxu2  ;;  %v3056_v61 = vpop.f32.mrf.mxu0 }
 0x6ae   : > { %v3098_v55 = vadd.f32 %v3097_v41, %v3056_v61 }
 0x6af   : > { %v3100_v40 = vpop.f32.mrf.mxu1 }
 0x6b3   : > { %v2908_v18 = vpop.f32.mrf.mxu3 }
 0x6b4   : > { %v2950_v1 = vadd.f32 %v2949_v31, %v2908_v18 }
 0x6b5   : > { %v2952_v60 = vpop.f32.mrf.mxu2  ;;  %v3059_v47 = vpop.f32.mrf.mxu0 }
 0x6b6   : > { %v3101_v0 = vadd.f32 %v3100_v40, %v3059_v47 }
 0x6b7   : > { %v3103_v45 = vpop.f32.mrf.mxu1 }
 0x6bb   : > { %v2911_v10 = vpop.f32.mrf.mxu3 }
 0x6bc   : > { %v2953_v57 = vadd.f32 %v2952_v60, %v2911_v10 }
 0x6bd   : > { %v2955_v52 = vpop.f32.mrf.mxu2  ;;  %v3062_v29 = vpop.f32.mrf.mxu0 }
 0x6be   : > { %v3104_v11 = vadd.f32 %v3103_v45, %v3062_v29 }
 0x6bf   : > { %v3106_v26 = vpop.f32.mrf.mxu1 }
 0x6c3   : > { %v2914_v34 = vpop.f32.mrf.mxu3 }
 0x6c4   : > { %v2956_v3 = vadd.f32 %v2955_v52, %v2914_v34 }
 0x6c5   : > { %v2958_v9 = vpop.f32.mrf.mxu2  ;;  %v3065_v13 = vpop.f32.mrf.mxu0 }
 0x6c6   : > { %v3107_v38 = vadd.f32 %v3106_v26, %v3065_v13 }
 0x6c7   : > { %v3109_v17 = vpop.f32.mrf.mxu1 }
 0x6cb   : > { %v2917_v36 = vpop.f32.mrf.mxu3 }
 0x6cc   : > { %v2959_v44 = vadd.f32 %v2958_v9, %v2917_v36 }
 0x6cd   : > { %v2961_v39 = vpop.f32.mrf.mxu2  ;;  %v3068_v7 = vpop.f32.mrf.mxu0 }
 0x6ce   : > { %v3110_v43 = vadd.f32 %v3109_v17, %v3068_v7 }
 0x6cf   : > { %v3112_v19 = vpop.f32.mrf.mxu1 }
 0x6d3   : > { %v2920_v28 = vpop.f32.mrf.mxu3 }
 0x6d4   : > { %v2962_v25 = vadd.f32 %v2961_v39, %v2920_v28 }
 0x6d5   : > { %v3071_v6 = vpop.f32.mrf.mxu0  ;;  %v2964_v62 = vpop.f32.mrf.mxu2 }
 0x6d6   : > { %v3113_v58 = vadd.f32 %v3112_v19, %v3071_v6 }
 0x6d7   : > { %v3115_v30 = vpop.f32.mrf.mxu1 }
 0x6db   : > { %v2923_v8 = vpop.f32.mrf.mxu3 }
 0x6dc   : > { %v2965_v24 = vadd.f32 %v2964_v62, %v2923_v8 }
 0x6dd   : > { %v3074_v27 = vpop.f32.mrf.mxu0  ;;  %v2967_v49 = vpop.f32.mrf.mxu2 }
 0x6de   : > { %v3116_v37 = vadd.f32 %v3115_v30, %v3074_v27 }
 0x6df   : > { %v3118_v51 = vpop.f32.mrf.mxu1 }
 0x6e3   : > { %v2926_v16 = vpop.f32.mrf.mxu3 }
 0x6e4   : > { %v2968_v33 = vadd.f32 %v2967_v49, %v2926_v16 }
 0x6e5   : > { %v3077_v23 = vpop.f32.mrf.mxu0  ;;  %v2970_v63 = vpop.f32.mrf.mxu2 }
 0x6e6   : > { %v3119_v32 = vadd.f32 %v3118_v51, %v3077_v23 }
 0x6e8   : > { %3252 = vmatpush.msrb.mxu1 %v3119_v32 }
 0x6ea   : > { %3253 = vmatpush.msrb.mxu1 %v3116_v37 }
 0x6eb   : > { %v2929_v2 = vpop.f32.mrf.mxu3 }
 0x6ec   : > { %v2971_v59 = vadd.f32 %v2970_v63, %v2929_v2  ;;  %3254 = vmatpush.msrb.mxu1 %v3113_v58 }
 0x6ed   : > { %v3179_v41 = vpop.f32.mrf.mxu2  ;;  %v3220_v31 = vpop.f32.mrf.mxu0 }
 0x6ee   : > { %3129 = vmatpush.msra.mxu3 %v2971_v59  ;;  %3255 = vmatpush.msrb.mxu1 %v3110_v43 }
 0x6f0   : > { %3130 = vmatpush.msra.mxu3 %v2968_v33  ;;  %3256 = vmatpush.msrb.mxu1 %v3107_v38 }
 0x6f2   : > { %3131 = vmatpush.msra.mxu3 %v2965_v24  ;;  %3257 = vmatpush.msrb.mxu1 %v3104_v11 }
 0x6f4   : > { %3132 = vmatpush.msra.mxu3 %v2962_v25  ;;  %3258 = vmatpush.msrb.mxu1 %v3101_v0 }
 0x6f5   : > { %v3223_v40 = vpop.f32.mrf.mxu0 }
 0x6f6   : > { %3133 = vmatpush.msra.mxu3 %v2959_v44  ;;  %3259 = vmatpush.msrb.mxu1 %v3098_v55  ;;  %v3182_v55 = vpop.f32.mrf.mxu2 }
 0x6f7   : > { %3730 = vmatmul.msk.f32.vlgmr.msrb.gmra.mxu1 %vm688_vm0, %v3864_v22 }
 0x6f8   : > { %3134 = vmatpush.msra.mxu3 %v2956_v3 }
 0x6fa   : > { %3135 = vmatpush.msra.mxu3 %v2953_v57 }
 0x6fc   : > { %3136 = vmatpush.msra.mxu3 %v2950_v1 }
 0x6fd   : > { %3722 = vmatmul.msk.f32.vlgmr.msra.gmra.mxu3 %vm688_vm0, %v3865_v4  ;;  %v3226_v52 = vpop.f32.mrf.mxu0 }
 0x6fe   : > { %v3185_v10 = vpop.f32.mrf.mxu2 }
 0x6ff   : > { %3731 = vmatmul.msk.f32.gmra.mxu1 %vm688_vm0, %v3866_v12 }
 0x705   : > { %3723 = vmatmul.msk.f32.gmra.mxu3 %vm688_vm0, %v3867_v20  ;;  %v3229_v39 = vpop.f32.mrf.mxu0 }
 0x706   : > { %v3188_v17 = vpop.f32.mrf.mxu2 }
 0x707   : > { %3732 = vmatmul.msk.f32.gmra.mxu1 %vm688_vm0, %v3868_v21 }
 0x70d   : > { %3724 = vmatmul.msk.f32.gmra.mxu3 %vm688_vm0, %v3869_v15  ;;  %v3232_v6 = vpop.f32.mrf.mxu0 }
 0x70e   : > { %v3191_v28 = vpop.f32.mrf.mxu2 }
 0x70f   : > { %3733 = vmatmul.msk.f32.gmra.mxu1 %vm688_vm0, %v3870_v5 }
 0x715   : > { %3725 = vmatmul.msk.f32.gmra.mxu3 %vm688_vm0, %v3871_v48  ;;  %v3235_v27 = vpop.f32.mrf.mxu0 }
 0x716   : > { %v3194_v8 = vpop.f32.mrf.mxu2 }
 0x717   : > { %3734 = vmatmul.msk.f32.gmra.mxu1 %vm688_vm0, %v3872_v46  ;;  %v1245_v46 = vpop.permute.xlu1 %1244 }
 0x71d   : > { %3726 = vmatmul.msk.f32.gmra.mxu3 %vm688_vm0, %v3873_v14  ;;  %v3238_v23 = vpop.f32.mrf.mxu0  ;;  %v6372_v14 = vld [vmem:[#allocation2_spill] sm:$0xff] }
 0x71e   : > { %v3197_v51 = vpop.f32.mrf.mxu2 }
 0x71f   : > { %3735 = vmatmul.msk.f32.gmra.mxu1 %vm688_vm0, %v3874_v42  ;;  %v1268_v42 = vadd.f32 %v6372_v14, %v1245_v46 }
 0x725   : > { %3727 = vmatmul.msk.f32.gmra.mxu3 %vm688_vm0, %v3875_v53  ;;  %v3241_v59 = vpop.f32.mrf.mxu0 }
 0x726   : > { %v3200_v58 = vpop.f32.mrf.mxu2 }
 0x727   : > { %3736 = vmatmul.msk.f32.gmra.mxu1 %vm688_vm0, %v3876_v56 }
 0x72d   : > { %3728 = vmatmul.msk.f32.gmra.mxu3 %vm688_vm0, %v3877_v35 }
 0x72f   : > { %3737 = vmatmul.msk.f32.gmra.mxu1 %vm688_vm0, %v3878_v50 }
 0x735   : > { %3729 = vmatmul.msk.f32.gmra.mxu3 %vm688_vm0, %v3879_v54 }
 0x774   : > { %v3261_v61 = vpop.f32.mrf.mxu1 }
 0x77c   : > { %v3264_v18 = vpop.f32.mrf.mxu1 }
 0x780   : > { %v3138_v1 = vpop.f32.mrf.mxu3 }
 0x781   : > { %v3180_v60 = vadd.f32 %v3179_v41, %v3138_v1 }
 0x783   : > { %v3221_v47 = vadd.f32 %v3220_v31, %v3180_v60 }
 0x784   : > { %v3267_v26 = vpop.f32.mrf.mxu1 }
 0x785   : > { %v3285_v45 = vadd.f32 %v3261_v61, %v3221_v47 }
 0x788   : > { %v3141_v29 = vpop.f32.mrf.mxu3 }
 0x789   : > { %v3183_v34 = vadd.f32 %v3182_v55, %v3141_v29 }
 0x78b   : > { %v3224_v9 = vadd.f32 %v3223_v40, %v3183_v34 }
 0x78c   : > { %v3270_v7 = vpop.f32.mrf.mxu1 }
 0x78d   : > { %v3286_v13 = vadd.f32 %v3264_v18, %v3224_v9 }
 0x790   : > { %v3144_v36 = vpop.f32.mrf.mxu3 }
 0x791   : > { %v3186_v12 = vadd.f32 %v3185_v10, %v3144_v36 }
 0x793   : > { %v3227_v15 = vadd.f32 %v3226_v52, %v3186_v12 }
 0x794   : > { %v3273_v62 = vpop.f32.mrf.mxu1 }
 0x795   : > { %v3287_v48 = vadd.f32 %v3267_v26, %v3227_v15 }
 0x798   : > { %v3147_v19 = vpop.f32.mrf.mxu3 }
 0x799   : > { %v3189_v22 = vadd.f32 %v3188_v17, %v3147_v19 }
 0x79b   : > { %v3230_v20 = vadd.f32 %v3229_v39, %v3189_v22 }
 0x79c   : > { %v3276_v49 = vpop.f32.mrf.mxu1 }
 0x79d   : > { %v3288_v5 = vadd.f32 %v3270_v7, %v3230_v20 }
 0x7a0   : > { %v3150_v30 = vpop.f32.mrf.mxu3 }
 0x7a1   : > { %v3192_v25 = vadd.f32 %v3191_v28, %v3150_v30 }
 0x7a3   : > { %v3233_v57 = vadd.f32 %v3232_v6, %v3192_v25 }
 0x7a4   : > { %v3279_v37 = vpop.f32.mrf.mxu1 }
 0x7a5   : > { %v3289_v21 = vadd.f32 %v3273_v62, %v3233_v57 }
 0x7a8   : > { %v3153_v16 = vpop.f32.mrf.mxu3 }
 0x7a9   : > { %v3195_v11 = vadd.f32 %v3194_v8, %v3153_v16 }
 0x7ab   : > { %v3236_v44 = vadd.f32 %v3235_v27, %v3195_v11 }
 0x7ac   : > { %v3282_v38 = vpop.f32.mrf.mxu1 }
 0x7ad   : > { %v3290_v4 = vadd.f32 %v3276_v49, %v3236_v44 }
 0x7b0   : > { %v3156_v32 = vpop.f32.mrf.mxu3 }
 0x7b1   : > { %v3198_v2 = vadd.f32 %v3197_v51, %v3156_v32 }
 0x7b3   : > { %v3239_v24 = vadd.f32 %v3238_v23, %v3198_v2 }
 0x7b5   : > { %v3291_v3 = vadd.f32 %v3279_v37, %v3239_v24 }
 0x7b8   : > { %v3159_v63 = vpop.f32.mrf.mxu3 }
 0x7b9   : > { %v3201_v43 = vadd.f32 %v3200_v58, %v3159_v63 }
 0x7bb   : > { %v3242_v33 = vadd.f32 %v3241_v59, %v3201_v43 }
 0x7bd   : > { %v3292_v0 = vadd.f32 %v3282_v38, %v3242_v33 }
 0x7bf   : > { %3738 = vmatpush.xpose.msk.msrb.mxu3 %vm688_vm0, %v3292_v0 }
 0x7c3   : > { %3739 = vmatpush.xpose.msk.msrb.mxu3 %vm688_vm0, %v3291_v3 }
 0x7c7   : > { %3740 = vmatpush.xpose.msk.msrb.mxu3 %vm688_vm0, %v3290_v4 }
 0x7cb   : > { %3741 = vmatpush.xpose.msk.msrb.mxu3 %vm688_vm0, %v3289_v21 }
 0x7cf   : > { %3742 = vmatpush.xpose.msk.msrb.mxu3 %vm688_vm0, %v3288_v5 }
 0x7d3   : > { %3743 = vmatpush.xpose.msk.msrb.mxu3 %vm688_vm0, %v3287_v48 }
 0x7d7   : > { %3744 = vmatpush.xpose.msk.msrb.mxu3 %vm688_vm0, %v3286_v13 }
 0x7db   : > { %3745 = vmatpush.xpose.msk.msrb.mxu3 %vm688_vm0, %v3285_v45 }
 0x7de   : > { %3746 = vmatmul.msk.f32.vlgmr.msrb.gmra.mxu3 %vm688_vm0, %v1268_v42 }
 0x861   : > { %v3337_v53 = vpop.f32.mrf.mxu3 }
 0x862   : > { %3340 = vst.msk [vmem:[%s678_s29] sm:$0xff] %vm688_vm0, %v3337_v53 }
 0x863 PF: > { %s32_s3 = sadd.s32 1, %s3886_s3  }
 0x864   : > { %p29_p4 = scmp.ge.s32.totalorder %s32_s3, 4  }
 0x866   :  { %31 = sbr.rel (!%p29_p4) target bundleno = 9 (0x9), region = 149 }

</bundles_post_ra>
